<compile_context>
chip_gen: v6e
topology: v6e:2x2x1
jax: 0.10.0
libtpu: 0.0.40
codegen_flags: <defaults>
</compile_context>

<pallas_src>
import jax
import jax.numpy as jnp
import numpy as np
from jax import lax
from jax.experimental import pallas as pl
from jax.experimental.pallas import tpu as pltpu

_LANE = 128


def _round_up(x, m):
    return (x + m - 1) // m * m


def _block_kernel(x_ref, w1_ref, s1_ref, t1_ref, w2_ref, s2_ref, t2_ref,
                  o_ref, xpad_ref, ypad_ref, col_ref):
    # x_ref   : (1, H, W, Cp)    spatially UNpadded, channel-padded input image
    # w1_ref  : (9*Cp, Cp)       conv1 weights in im2col layout ((dy,dx,ci) -> row)
    # s1_ref  : (1, Cp)          folded BN1 scale  = gamma / sqrt(var + eps)
    # t1_ref  : (1, Cp)          folded BN1 shift  = beta - mean*scale + bias*scale
    # w2_ref, s2_ref, t2_ref     same for stage 2
    # o_ref   : (1, H, W, Cp)
    # xpad_ref: (H+2, W+2, Cp)   VMEM scratch, spatially padded input
    # ypad_ref: (H+2, W+2, Cp)   VMEM scratch, spatially padded conv1 output
    # col_ref : (H*W, 9*Cp)      VMEM scratch, im2col slab (shared by both convs)
    _, H, W, Cp = x_ref.shape

    # Zero only the 1-pixel border of the padded scratches (the interior is
    # fully overwritten below).  Doing it every grid step keeps the kernel
    # correct even when the batch axis is sharded across TensorCores.
    zero_row = jnp.zeros((1, W + 2, Cp), jnp.float32)
    zero_col = jnp.zeros((H, 1, Cp), jnp.float32)
    for pref in (xpad_ref, ypad_ref):
        pref[0:1, :, :] = zero_row
        pref[H + 1:H + 2, :, :] = zero_row
        pref[1:H + 1, 0:1, :] = zero_col
        pref[1:H + 1, W + 1:W + 2, :] = zero_col

    # Spatial padding happens in VMEM (no HBM-side jnp.pad of the full input).
    xpad_ref[1:H + 1, 1:W + 1, :] = x_ref[0]

    def conv_bn_relu(pad_ref, w_ref, s_ref, t_ref):
        # Build the lane-dense im2col slab, then ONE big-K MXU matmul.
        for dy in range(3):
            for dx in range(3):
                k = dy * 3 + dx
                patch = pad_ref[dy:dy + H, dx:dx + W, :]
                col_ref[:, k * Cp:(k + 1) * Cp] = patch.reshape(H * W, Cp)
        y = jnp.dot(col_ref[...], w_ref[...],
                    preferred_element_type=jnp.float32)
        # Conv bias is folded into t; BN (inference) + ReLU, all in f32.
        return jnp.maximum(y * s_ref[...] + t_ref[...], 0.0)

    y1 = conv_bn_relu(xpad_ref, w1_ref, s1_ref, t1_ref)
    ypad_ref[1:H + 1, 1:W + 1, :] = y1.reshape(H, W, Cp)

    y2 = conv_bn_relu(ypad_ref, w2_ref, s2_ref, t2_ref)
    o_ref[0] = y2.reshape(H, W, Cp)


@jax.jit
def block_forward(x_nchw, params):
    """x_nchw: (N, Cin, H, W) float32. Returns (N, Cout, H, W) float32."""
    (w1, b1, s1, t1, w2, b2, s2, t2) = params
    N, Cin, H, W = x_nchw.shape
    Cout = w1.shape[-1]
    Cp = _round_up(max(Cin, Cout, _LANE), _LANE)  # lane-dense channel padding

    # NCHW -> NHWC (channels on the 128-wide lane axis), zero-pad channels.
    x_nhwc = jnp.transpose(x_nchw, (0, 2, 3, 1))
    x_p = jnp.pad(x_nhwc, ((0, 0), (0, 0), (0, 0), (0, Cp - Cin)))

    # Weights: HWIO -> zero-pad channels -> im2col layout (9*Cp, Cp).
    w1_p = jnp.pad(w1, ((0, 0), (0, 0), (0, Cp - Cin), (0, Cp - Cout)))
    w1_p = w1_p.reshape(9 * Cp, Cp)
    w2_p = jnp.pad(w2, ((0, 0), (0, 0), (0, Cp - Cout), (0, Cp - Cout)))
    w2_p = w2_p.reshape(9 * Cp, Cp)

    # Fold the conv bias into the BN shift: y = conv*s + (b*s + t).
    def fold(b, s, t):
        sp = jnp.pad(s, (0, Cp - Cout)).reshape(1, Cp)
        tp = jnp.pad(b * s + t, (0, Cp - Cout)).reshape(1, Cp)
        return sp, tp

    s1_p, t1_p = fold(b1, s1, t1)
    s2_p, t2_p = fold(b2, s2, t2)

    full2 = lambda n: (0, 0)

    out_p = pl.pallas_call(
        _block_kernel,
        out_shape=jax.ShapeDtypeStruct((N, H, W, Cp), jnp.float32),
        grid_spec=pltpu.PrefetchScalarGridSpec(
            num_scalar_prefetch=0,
            grid=(N,),
            in_specs=[
                pl.BlockSpec((1, H, W, Cp), lambda n: (n, 0, 0, 0)),
                pl.BlockSpec((9 * Cp, Cp), full2),
                pl.BlockSpec((1, Cp), full2),
                pl.BlockSpec((1, Cp), full2),
                pl.BlockSpec((9 * Cp, Cp), full2),
                pl.BlockSpec((1, Cp), full2),
                pl.BlockSpec((1, Cp), full2),
            ],
            out_specs=pl.BlockSpec((1, H, W, Cp), lambda n: (n, 0, 0, 0)),
            scratch_shapes=[
                pltpu.VMEM((H + 2, W + 2, Cp), jnp.float32),   # padded input
                pltpu.VMEM((H + 2, W + 2, Cp), jnp.float32),   # padded conv1 out
                pltpu.VMEM((H * W, 9 * Cp), jnp.float32),      # im2col slab
            ],
        ),
        compiler_params=pltpu.CompilerParams(
            dimension_semantics=("parallel",),
            vmem_limit_bytes=32 * 1024 * 1024),
    )(x_p, w1_p, s1_p, t1_p, w2_p, s2_p, t2_p)

    # Drop channel padding, return to NCHW.
    return jnp.transpose(out_p[..., :Cout], (0, 3, 1, 2))


def _reference_forward(x_nchw, params):
    """Pure-JAX reference (same inference-mode BN semantics)."""
    (w1, b1, s1, t1, w2, b2, s2, t2) = params

    def conv(x, w_hwio, b):
        w_oihw = jnp.transpose(w_hwio, (3, 2, 0, 1))
        y = lax.conv_general_dilated(
            x, w_oihw, window_strides=(1, 1), padding="SAME",
            dimension_numbers=("NCHW", "OIHW", "NCHW"))
        return y + b[None, :, None, None]

    y = conv(x_nchw, w1, b1)
    y = jnp.maximum(y * s1[None, :, None, None] + t1[None, :, None, None], 0.0)
    y = conv(y, w2, b2)
    y = jnp.maximum(y * s2[None, :, None, None] + t2[None, :, None, None], 0.0)
    return y


def make_params(key, in_ch, out_ch, eps=1e-5):
    ks = jax.random.split(key, 10)
    # Conv weights in HWIO layout, biases, and BatchNorm (inference) params.
    w1 = jax.random.normal(ks[0], (3, 3, in_ch, out_ch), jnp.float32) * 0.1
    b1 = jax.random.normal(ks[1], (out_ch,), jnp.float32) * 0.1
    w2 = jax.random.normal(ks[2], (3, 3, out_ch, out_ch), jnp.float32) * 0.1
    b2 = jax.random.normal(ks[3], (out_ch,), jnp.float32) * 0.1
    g1 = 1.0 + 0.1 * jax.random.normal(ks[4], (out_ch,), jnp.float32)
    be1 = 0.1 * jax.random.normal(ks[5], (out_ch,), jnp.float32)
    m1 = 0.1 * jax.random.normal(ks[6], (out_ch,), jnp.float32)
    v1 = jnp.abs(1.0 + 0.1 * jax.random.normal(ks[7], (out_ch,), jnp.float32))
    g2 = 1.0 + 0.1 * jax.random.normal(ks[8], (out_ch,), jnp.float32)
    be2 = 0.1 * jax.random.normal(ks[9], (out_ch,), jnp.float32)
    m2 = jnp.zeros((out_ch,), jnp.float32)
    v2 = jnp.ones((out_ch,), jnp.float32)

    s1 = g1 / jnp.sqrt(v1 + eps)
    t1 = be1 - m1 * s1
    s2 = g2 / jnp.sqrt(v2 + eps)
    t2 = be2 - m2 * s2
    return (w1, b1, s1, t1, w2, b2, s2, t2)


if __name__ == "__main__":
    key = jax.random.PRNGKey(0)
    kx, kp = jax.random.split(key)

    N, Cin, Cout, H, W = 2, 4, 8, 16, 16
    x = jax.random.normal(kx, (N, Cin, H, W), jnp.float32)
    params = make_params(kp, Cin, Cout)

    out = block_forward(x, params)
    out = jax.block_until_ready(out)

    ref = jax.block_until_ready(_reference_forward(x, params))
    assert out.shape == (N, Cout, H, W)
    np.testing.assert_allclose(np.asarray(out), np.asarray(ref),
                               rtol=1e-4, atol=1e-4)
    print("KERNEL_OK")
</pallas_src>

<mosaic_0001>
module attributes {stable_mosaic.version = 11 : i64} {
  func.func @_block_kernel(%arg0: i32, %arg1: memref<1x16x16x128xf32, #tpu.memory_space<vmem>>, %arg2: memref<1152x128xf32, #tpu.memory_space<vmem>>, %arg3: memref<1x128xf32, #tpu.memory_space<vmem>>, %arg4: memref<1x128xf32, #tpu.memory_space<vmem>>, %arg5: memref<1152x128xf32, #tpu.memory_space<vmem>>, %arg6: memref<1x128xf32, #tpu.memory_space<vmem>>, %arg7: memref<1x128xf32, #tpu.memory_space<vmem>>, %arg8: memref<1x16x16x128xf32, #tpu.memory_space<vmem>>, %arg9: memref<18x18x128xf32, #tpu.memory_space<vmem>>, %arg10: memref<18x18x128xf32, #tpu.memory_space<vmem>>, %arg11: memref<256x1152xf32, #tpu.memory_space<vmem>>) attributes {dimension_semantics = [#tpu.dimension_semantics<parallel>], iteration_bounds = array<i64: 2>, scalar_prefetch = 0 : i64, scratch_operands = 3 : i64, tpu.core_type = #tpu.core_type<tc>, window_params = [{transform_indices = @transform_0, window_bounds = array<i64: 1, 16, 16, 128>}, {pipeline_mode = #tpu.pipeline_mode<synchronous>, transform_indices = @transform_1, window_bounds = array<i64: 1152, 128>}, {pipeline_mode = #tpu.pipeline_mode<synchronous>, transform_indices = @transform_2, window_bounds = array<i64: 1, 128>}, {pipeline_mode = #tpu.pipeline_mode<synchronous>, transform_indices = @transform_3, window_bounds = array<i64: 1, 128>}, {pipeline_mode = #tpu.pipeline_mode<synchronous>, transform_indices = @transform_4, window_bounds = array<i64: 1152, 128>}, {pipeline_mode = #tpu.pipeline_mode<synchronous>, transform_indices = @transform_5, window_bounds = array<i64: 1, 128>}, {pipeline_mode = #tpu.pipeline_mode<synchronous>, transform_indices = @transform_6, window_bounds = array<i64: 1, 128>}, {transform_indices = @transform_7, window_bounds = array<i64: 1, 16, 16, 128>}]} {
    %cst = arith.constant 0.000000e+00 : f32
    %0 = vector.broadcast %cst : f32 to vector<1x18x128xf32>
    %cst_0 = arith.constant 0.000000e+00 : f32
    %1 = vector.broadcast %cst_0 : f32 to vector<16x1x128xf32>
    %c0 = arith.constant 0 : index
    %c0_1 = arith.constant 0 : index
    %c0_2 = arith.constant 0 : index
    %2 = vector.load %arg9[%c0, %c0_1, %c0_2] : memref<18x18x128xf32, #tpu.memory_space<vmem>>, vector<1x18x128xf32>
    tpu.vector_store %arg9[%c0, %c0_1, %c0_2], %0 {strides = array<i32>} : memref<18x18x128xf32, #tpu.memory_space<vmem>>, vector<1x18x128xf32>,
    %c17 = arith.constant 17 : index
    %c0_3 = arith.constant 0 : index
    %c0_4 = arith.constant 0 : index
    %3 = vector.load %arg9[%c17, %c0_3, %c0_4] : memref<18x18x128xf32, #tpu.memory_space<vmem>>, vector<1x18x128xf32>
    tpu.vector_store %arg9[%c17, %c0_3, %c0_4], %0 {strides = array<i32>} : memref<18x18x128xf32, #tpu.memory_space<vmem>>, vector<1x18x128xf32>,
    %c1 = arith.constant 1 : index
    %c0_5 = arith.constant 0 : index
    %c0_6 = arith.constant 0 : index
    %4 = vector.load %arg9[%c1, %c0_5, %c0_6] : memref<18x18x128xf32, #tpu.memory_space<vmem>>, vector<16x1x128xf32>
    tpu.vector_store %arg9[%c1, %c0_5, %c0_6], %1 {strides = array<i32>} : memref<18x18x128xf32, #tpu.memory_space<vmem>>, vector<16x1x128xf32>,
    %c1_7 = arith.constant 1 : index
    %c17_8 = arith.constant 17 : index
    %c0_9 = arith.constant 0 : index
    %5 = vector.load %arg9[%c1_7, %c17_8, %c0_9] : memref<18x18x128xf32, #tpu.memory_space<vmem>>, vector<16x1x128xf32>
    tpu.vector_store %arg9[%c1_7, %c17_8, %c0_9], %1 {strides = array<i32>} : memref<18x18x128xf32, #tpu.memory_space<vmem>>, vector<16x1x128xf32>,
    %c0_10 = arith.constant 0 : index
    %c0_11 = arith.constant 0 : index
    %c0_12 = arith.constant 0 : index
    %6 = vector.load %arg10[%c0_10, %c0_11, %c0_12] : memref<18x18x128xf32, #tpu.memory_space<vmem>>, vector<1x18x128xf32>
    tpu.vector_store %arg10[%c0_10, %c0_11, %c0_12], %0 {strides = array<i32>} : memref<18x18x128xf32, #tpu.memory_space<vmem>>, vector<1x18x128xf32>,
    %c17_13 = arith.constant 17 : index
    %c0_14 = arith.constant 0 : index
    %c0_15 = arith.constant 0 : index
    %7 = vector.load %arg10[%c17_13, %c0_14, %c0_15] : memref<18x18x128xf32, #tpu.memory_space<vmem>>, vector<1x18x128xf32>
    tpu.vector_store %arg10[%c17_13, %c0_14, %c0_15], %0 {strides = array<i32>} : memref<18x18x128xf32, #tpu.memory_space<vmem>>, vector<1x18x128xf32>,
    %c1_16 = arith.constant 1 : index
    %c0_17 = arith.constant 0 : index
    %c0_18 = arith.constant 0 : index
    %8 = vector.load %arg10[%c1_16, %c0_17, %c0_18] : memref<18x18x128xf32, #tpu.memory_space<vmem>>, vector<16x1x128xf32>
    tpu.vector_store %arg10[%c1_16, %c0_17, %c0_18], %1 {strides = array<i32>} : memref<18x18x128xf32, #tpu.memory_space<vmem>>, vector<16x1x128xf32>,
    %c1_19 = arith.constant 1 : index
    %c17_20 = arith.constant 17 : index
    %c0_21 = arith.constant 0 : index
    %9 = vector.load %arg10[%c1_19, %c17_20, %c0_21] : memref<18x18x128xf32, #tpu.memory_space<vmem>>, vector<16x1x128xf32>
    tpu.vector_store %arg10[%c1_19, %c17_20, %c0_21], %1 {strides = array<i32>} : memref<18x18x128xf32, #tpu.memory_space<vmem>>, vector<16x1x128xf32>,
    %c0_22 = arith.constant 0 : index
    %c0_23 = arith.constant 0 : index
    %c0_24 = arith.constant 0 : index
    %c0_25 = arith.constant 0 : index
    %10 = vector.load %arg1[%c0_22, %c0_23, %c0_24, %c0_25] : memref<1x16x16x128xf32, #tpu.memory_space<vmem>>, vector<1x16x16x128xf32>
    %11 = vector.shape_cast %10 : vector<1x16x16x128xf32> to vector<16x16x128xf32>
    %c1_26 = arith.constant 1 : index
    %c1_27 = arith.constant 1 : index
    %c0_28 = arith.constant 0 : index
    %12 = vector.load %arg9[%c1_26, %c1_27, %c0_28] : memref<18x18x128xf32, #tpu.memory_space<vmem>>, vector<16x16x128xf32>
    tpu.vector_store %arg9[%c1_26, %c1_27, %c0_28], %11 {strides = array<i32>} : memref<18x18x128xf32, #tpu.memory_space<vmem>>, vector<16x16x128xf32>,
    %c0_29 = arith.constant 0 : index
    %c0_30 = arith.constant 0 : index
    %c0_31 = arith.constant 0 : index
    %13 = vector.load %arg9[%c0_29, %c0_30, %c0_31] : memref<18x18x128xf32, #tpu.memory_space<vmem>>, vector<16x16x128xf32>
    %14 = vector.shape_cast %13 : vector<16x16x128xf32> to vector<256x128xf32>
    %c0_32 = arith.constant 0 : index
    %c0_33 = arith.constant 0 : index
    %15 = vector.load %arg11[%c0_32, %c0_33] : memref<256x1152xf32, #tpu.memory_space<vmem>>, vector<256x128xf32>
    tpu.vector_store %arg11[%c0_32, %c0_33], %14 {strides = array<i32>} : memref<256x1152xf32, #tpu.memory_space<vmem>>, vector<256x128xf32>,
    %c0_34 = arith.constant 0 : index
    %c1_35 = arith.constant 1 : index
    %c0_36 = arith.constant 0 : index
    %16 = vector.load %arg9[%c0_34, %c1_35, %c0_36] : memref<18x18x128xf32, #tpu.memory_space<vmem>>, vector<16x16x128xf32>
    %17 = vector.shape_cast %16 : vector<16x16x128xf32> to vector<256x128xf32>
    %c0_37 = arith.constant 0 : index
    %c128 = arith.constant 128 : index
    %18 = vector.load %arg11[%c0_37, %c128] : memref<256x1152xf32, #tpu.memory_space<vmem>>, vector<256x128xf32>
    tpu.vector_store %arg11[%c0_37, %c128], %17 {strides = array<i32>} : memref<256x1152xf32, #tpu.memory_space<vmem>>, vector<256x128xf32>,
    %c0_38 = arith.constant 0 : index
    %c2 = arith.constant 2 : index
    %c0_39 = arith.constant 0 : index
    %19 = vector.load %arg9[%c0_38, %c2, %c0_39] : memref<18x18x128xf32, #tpu.memory_space<vmem>>, vector<16x16x128xf32>
    %20 = vector.shape_cast %19 : vector<16x16x128xf32> to vector<256x128xf32>
    %c0_40 = arith.constant 0 : index
    %c256 = arith.constant 256 : index
    %21 = vector.load %arg11[%c0_40, %c256] : memref<256x1152xf32, #tpu.memory_space<vmem>>, vector<256x128xf32>
    tpu.vector_store %arg11[%c0_40, %c256], %20 {strides = array<i32>} : memref<256x1152xf32, #tpu.memory_space<vmem>>, vector<256x128xf32>,
    %c1_41 = arith.constant 1 : index
    %c0_42 = arith.constant 0 : index
    %c0_43 = arith.constant 0 : index
    %22 = vector.load %arg9[%c1_41, %c0_42, %c0_43] : memref<18x18x128xf32, #tpu.memory_space<vmem>>, vector<16x16x128xf32>
    %23 = vector.shape_cast %22 : vector<16x16x128xf32> to vector<256x128xf32>
    %c0_44 = arith.constant 0 : index
    %c384 = arith.constant 384 : index
    %24 = vector.load %arg11[%c0_44, %c384] : memref<256x1152xf32, #tpu.memory_space<vmem>>, vector<256x128xf32>
    tpu.vector_store %arg11[%c0_44, %c384], %23 {strides = array<i32>} : memref<256x1152xf32, #tpu.memory_space<vmem>>, vector<256x128xf32>,
    %c1_45 = arith.constant 1 : index
    %c1_46 = arith.constant 1 : index
    %c0_47 = arith.constant 0 : index
    %25 = vector.load %arg9[%c1_45, %c1_46, %c0_47] : memref<18x18x128xf32, #tpu.memory_space<vmem>>, vector<16x16x128xf32>
    %26 = vector.shape_cast %25 : vector<16x16x128xf32> to vector<256x128xf32>
    %c0_48 = arith.constant 0 : index
    %c512 = arith.constant 512 : index
    %27 = vector.load %arg11[%c0_48, %c512] : memref<256x1152xf32, #tpu.memory_space<vmem>>, vector<256x128xf32>
    tpu.vector_store %arg11[%c0_48, %c512], %26 {strides = array<i32>} : memref<256x1152xf32, #tpu.memory_space<vmem>>, vector<256x128xf32>,
    %c1_49 = arith.constant 1 : index
    %c2_50 = arith.constant 2 : index
    %c0_51 = arith.constant 0 : index
    %28 = vector.load %arg9[%c1_49, %c2_50, %c0_51] : memref<18x18x128xf32, #tpu.memory_space<vmem>>, vector<16x16x128xf32>
    %29 = vector.shape_cast %28 : vector<16x16x128xf32> to vector<256x128xf32>
    %c0_52 = arith.constant 0 : index
    %c640 = arith.constant 640 : index
    %30 = vector.load %arg11[%c0_52, %c640] : memref<256x1152xf32, #tpu.memory_space<vmem>>, vector<256x128xf32>
    tpu.vector_store %arg11[%c0_52, %c640], %29 {strides = array<i32>} : memref<256x1152xf32, #tpu.memory_space<vmem>>, vector<256x128xf32>,
    %c2_53 = arith.constant 2 : index
    %c0_54 = arith.constant 0 : index
    %c0_55 = arith.constant 0 : index
    %31 = vector.load %arg9[%c2_53, %c0_54, %c0_55] : memref<18x18x128xf32, #tpu.memory_space<vmem>>, vector<16x16x128xf32>
    %32 = vector.shape_cast %31 : vector<16x16x128xf32> to vector<256x128xf32>
    %c0_56 = arith.constant 0 : index
    %c768 = arith.constant 768 : index
    %33 = vector.load %arg11[%c0_56, %c768] : memref<256x1152xf32, #tpu.memory_space<vmem>>, vector<256x128xf32>
    tpu.vector_store %arg11[%c0_56, %c768], %32 {strides = array<i32>} : memref<256x1152xf32, #tpu.memory_space<vmem>>, vector<256x128xf32>,
    %c2_57 = arith.constant 2 : index
    %c1_58 = arith.constant 1 : index
    %c0_59 = arith.constant 0 : index
    %34 = vector.load %arg9[%c2_57, %c1_58, %c0_59] : memref<18x18x128xf32, #tpu.memory_space<vmem>>, vector<16x16x128xf32>
    %35 = vector.shape_cast %34 : vector<16x16x128xf32> to vector<256x128xf32>
    %c0_60 = arith.constant 0 : index
    %c896 = arith.constant 896 : index
    %36 = vector.load %arg11[%c0_60, %c896] : memref<256x1152xf32, #tpu.memory_space<vmem>>, vector<256x128xf32>
    tpu.vector_store %arg11[%c0_60, %c896], %35 {strides = array<i32>} : memref<256x1152xf32, #tpu.memory_space<vmem>>, vector<256x128xf32>,
    %c2_61 = arith.constant 2 : index
    %c2_62 = arith.constant 2 : index
    %c0_63 = arith.constant 0 : index
    %37 = vector.load %arg9[%c2_61, %c2_62, %c0_63] : memref<18x18x128xf32, #tpu.memory_space<vmem>>, vector<16x16x128xf32>
    %38 = vector.shape_cast %37 : vector<16x16x128xf32> to vector<256x128xf32>
    %c0_64 = arith.constant 0 : index
    %c1024 = arith.constant 1024 : index
    %39 = vector.load %arg11[%c0_64, %c1024] : memref<256x1152xf32, #tpu.memory_space<vmem>>, vector<256x128xf32>
    tpu.vector_store %arg11[%c0_64, %c1024], %38 {strides = array<i32>} : memref<256x1152xf32, #tpu.memory_space<vmem>>, vector<256x128xf32>,
    %c0_65 = arith.constant 0 : index
    %c0_66 = arith.constant 0 : index
    %40 = vector.load %arg11[%c0_65, %c0_66] : memref<256x1152xf32, #tpu.memory_space<vmem>>, vector<256x1152xf32>
    %c0_67 = arith.constant 0 : index
    %c0_68 = arith.constant 0 : index
    %41 = vector.load %arg2[%c0_67, %c0_68] : memref<1152x128xf32, #tpu.memory_space<vmem>>, vector<1152x128xf32>
    %cst_69 = arith.constant dense<0.000000e+00> : vector<256x128xf32>
    %42 = tpu.matmul %40, %41, %cst_69 {dimension_numbers = #tpu.dot_dimension_numbers<[1], [0], [0], [1], [0, 0, 1, 1], [], []>} : vector<256x1152xf32>, vector<1152x128xf32>, vector<256x128xf32> -> vector<256x128xf32>
    %c0_70 = arith.constant 0 : index
    %c0_71 = arith.constant 0 : index
    %43 = vector.load %arg3[%c0_70, %c0_71] : memref<1x128xf32, #tpu.memory_space<vmem>>, vector<1x128xf32>
    %44 = vector.broadcast %43 : vector<1x128xf32> to vector<256x128xf32>
    %45 = arith.mulf %42, %44 : vector<256x128xf32>
    %c0_72 = arith.constant 0 : index
    %c0_73 = arith.constant 0 : index
    %46 = vector.load %arg4[%c0_72, %c0_73] : memref<1x128xf32, #tpu.memory_space<vmem>>, vector<1x128xf32>
    %47 = vector.broadcast %46 : vector<1x128xf32> to vector<256x128xf32>
    %48 = arith.addf %45, %47 : vector<256x128xf32>
    %cst_74 = arith.constant 0.000000e+00 : f32
    %49 = vector.broadcast %cst_74 : f32 to vector<256x128xf32>
    %50 = arith.maximumf %48, %49 : vector<256x128xf32>
    %51 = vector.shape_cast %50 : vector<256x128xf32> to vector<16x16x128xf32>
    %c1_75 = arith.constant 1 : index
    %c1_76 = arith.constant 1 : index
    %c0_77 = arith.constant 0 : index
    %52 = vector.load %arg10[%c1_75, %c1_76, %c0_77] : memref<18x18x128xf32, #tpu.memory_space<vmem>>, vector<16x16x128xf32>
    tpu.vector_store %arg10[%c1_75, %c1_76, %c0_77], %51 {strides = array<i32>} : memref<18x18x128xf32, #tpu.memory_space<vmem>>, vector<16x16x128xf32>,
    %c0_78 = arith.constant 0 : index
    %c0_79 = arith.constant 0 : index
    %c0_80 = arith.constant 0 : index
    %53 = vector.load %arg10[%c0_78, %c0_79, %c0_80] : memref<18x18x128xf32, #tpu.memory_space<vmem>>, vector<16x16x128xf32>
    %54 = vector.shape_cast %53 : vector<16x16x128xf32> to vector<256x128xf32>
    %c0_81 = arith.constant 0 : index
    %c0_82 = arith.constant 0 : index
    %55 = vector.load %arg11[%c0_81, %c0_82] : memref<256x1152xf32, #tpu.memory_space<vmem>>, vector<256x128xf32>
    tpu.vector_store %arg11[%c0_81, %c0_82], %54 {strides = array<i32>} : memref<256x1152xf32, #tpu.memory_space<vmem>>, vector<256x128xf32>,
    %c0_83 = arith.constant 0 : index
    %c1_84 = arith.constant 1 : index
    %c0_85 = arith.constant 0 : index
    %56 = vector.load %arg10[%c0_83, %c1_84, %c0_85] : memref<18x18x128xf32, #tpu.memory_space<vmem>>, vector<16x16x128xf32>
    %57 = vector.shape_cast %56 : vector<16x16x128xf32> to vector<256x128xf32>
    %c0_86 = arith.constant 0 : index
    %c128_87 = arith.constant 128 : index
    %58 = vector.load %arg11[%c0_86, %c128_87] : memref<256x1152xf32, #tpu.memory_space<vmem>>, vector<256x128xf32>
    tpu.vector_store %arg11[%c0_86, %c128_87], %57 {strides = array<i32>} : memref<256x1152xf32, #tpu.memory_space<vmem>>, vector<256x128xf32>,
    %c0_88 = arith.constant 0 : index
    %c2_89 = arith.constant 2 : index
    %c0_90 = arith.constant 0 : index
    %59 = vector.load %arg10[%c0_88, %c2_89, %c0_90] : memref<18x18x128xf32, #tpu.memory_space<vmem>>, vector<16x16x128xf32>
    %60 = vector.shape_cast %59 : vector<16x16x128xf32> to vector<256x128xf32>
    %c0_91 = arith.constant 0 : index
    %c256_92 = arith.constant 256 : index
    %61 = vector.load %arg11[%c0_91, %c256_92] : memref<256x1152xf32, #tpu.memory_space<vmem>>, vector<256x128xf32>
    tpu.vector_store %arg11[%c0_91, %c256_92], %60 {strides = array<i32>} : memref<256x1152xf32, #tpu.memory_space<vmem>>, vector<256x128xf32>,
    %c1_93 = arith.constant 1 : index
    %c0_94 = arith.constant 0 : index
    %c0_95 = arith.constant 0 : index
    %62 = vector.load %arg10[%c1_93, %c0_94, %c0_95] : memref<18x18x128xf32, #tpu.memory_space<vmem>>, vector<16x16x128xf32>
    %63 = vector.shape_cast %62 : vector<16x16x128xf32> to vector<256x128xf32>
    %c0_96 = arith.constant 0 : index
    %c384_97 = arith.constant 384 : index
    %64 = vector.load %arg11[%c0_96, %c384_97] : memref<256x1152xf32, #tpu.memory_space<vmem>>, vector<256x128xf32>
    tpu.vector_store %arg11[%c0_96, %c384_97], %63 {strides = array<i32>} : memref<256x1152xf32, #tpu.memory_space<vmem>>, vector<256x128xf32>,
    %c1_98 = arith.constant 1 : index
    %c1_99 = arith.constant 1 : index
    %c0_100 = arith.constant 0 : index
    %65 = vector.load %arg10[%c1_98, %c1_99, %c0_100] : memref<18x18x128xf32, #tpu.memory_space<vmem>>, vector<16x16x128xf32>
    %66 = vector.shape_cast %65 : vector<16x16x128xf32> to vector<256x128xf32>
    %c0_101 = arith.constant 0 : index
    %c512_102 = arith.constant 512 : index
    %67 = vector.load %arg11[%c0_101, %c512_102] : memref<256x1152xf32, #tpu.memory_space<vmem>>, vector<256x128xf32>
    tpu.vector_store %arg11[%c0_101, %c512_102], %66 {strides = array<i32>} : memref<256x1152xf32, #tpu.memory_space<vmem>>, vector<256x128xf32>,
    %c1_103 = arith.constant 1 : index
    %c2_104 = arith.constant 2 : index
    %c0_105 = arith.constant 0 : index
    %68 = vector.load %arg10[%c1_103, %c2_104, %c0_105] : memref<18x18x128xf32, #tpu.memory_space<vmem>>, vector<16x16x128xf32>
    %69 = vector.shape_cast %68 : vector<16x16x128xf32> to vector<256x128xf32>
    %c0_106 = arith.constant 0 : index
    %c640_107 = arith.constant 640 : index
    %70 = vector.load %arg11[%c0_106, %c640_107] : memref<256x1152xf32, #tpu.memory_space<vmem>>, vector<256x128xf32>
    tpu.vector_store %arg11[%c0_106, %c640_107], %69 {strides = array<i32>} : memref<256x1152xf32, #tpu.memory_space<vmem>>, vector<256x128xf32>,
    %c2_108 = arith.constant 2 : index
    %c0_109 = arith.constant 0 : index
    %c0_110 = arith.constant 0 : index
    %71 = vector.load %arg10[%c2_108, %c0_109, %c0_110] : memref<18x18x128xf32, #tpu.memory_space<vmem>>, vector<16x16x128xf32>
    %72 = vector.shape_cast %71 : vector<16x16x128xf32> to vector<256x128xf32>
    %c0_111 = arith.constant 0 : index
    %c768_112 = arith.constant 768 : index
    %73 = vector.load %arg11[%c0_111, %c768_112] : memref<256x1152xf32, #tpu.memory_space<vmem>>, vector<256x128xf32>
    tpu.vector_store %arg11[%c0_111, %c768_112], %72 {strides = array<i32>} : memref<256x1152xf32, #tpu.memory_space<vmem>>, vector<256x128xf32>,
    %c2_113 = arith.constant 2 : index
    %c1_114 = arith.constant 1 : index
    %c0_115 = arith.constant 0 : index
    %74 = vector.load %arg10[%c2_113, %c1_114, %c0_115] : memref<18x18x128xf32, #tpu.memory_space<vmem>>, vector<16x16x128xf32>
    %75 = vector.shape_cast %74 : vector<16x16x128xf32> to vector<256x128xf32>
    %c0_116 = arith.constant 0 : index
    %c896_117 = arith.constant 896 : index
    %76 = vector.load %arg11[%c0_116, %c896_117] : memref<256x1152xf32, #tpu.memory_space<vmem>>, vector<256x128xf32>
    tpu.vector_store %arg11[%c0_116, %c896_117], %75 {strides = array<i32>} : memref<256x1152xf32, #tpu.memory_space<vmem>>, vector<256x128xf32>,
    %c2_118 = arith.constant 2 : index
    %c2_119 = arith.constant 2 : index
    %c0_120 = arith.constant 0 : index
    %77 = vector.load %arg10[%c2_118, %c2_119, %c0_120] : memref<18x18x128xf32, #tpu.memory_space<vmem>>, vector<16x16x128xf32>
    %78 = vector.shape_cast %77 : vector<16x16x128xf32> to vector<256x128xf32>
    %c0_121 = arith.constant 0 : index
    %c1024_122 = arith.constant 1024 : index
    %79 = vector.load %arg11[%c0_121, %c1024_122] : memref<256x1152xf32, #tpu.memory_space<vmem>>, vector<256x128xf32>
    tpu.vector_store %arg11[%c0_121, %c1024_122], %78 {strides = array<i32>} : memref<256x1152xf32, #tpu.memory_space<vmem>>, vector<256x128xf32>,
    %c0_123 = arith.constant 0 : index
    %c0_124 = arith.constant 0 : index
    %80 = vector.load %arg11[%c0_123, %c0_124] : memref<256x1152xf32, #tpu.memory_space<vmem>>, vector<256x1152xf32>
    %c0_125 = arith.constant 0 : index
    %c0_126 = arith.constant 0 : index
    %81 = vector.load %arg5[%c0_125, %c0_126] : memref<1152x128xf32, #tpu.memory_space<vmem>>, vector<1152x128xf32>
    %cst_127 = arith.constant dense<0.000000e+00> : vector<256x128xf32>
    %82 = tpu.matmul %80, %81, %cst_127 {dimension_numbers = #tpu.dot_dimension_numbers<[1], [0], [0], [1], [0, 0, 1, 1], [], []>} : vector<256x1152xf32>, vector<1152x128xf32>, vector<256x128xf32> -> vector<256x128xf32>
    %c0_128 = arith.constant 0 : index
    %c0_129 = arith.constant 0 : index
    %83 = vector.load %arg6[%c0_128, %c0_129] : memref<1x128xf32, #tpu.memory_space<vmem>>, vector<1x128xf32>
    %84 = vector.broadcast %83 : vector<1x128xf32> to vector<256x128xf32>
    %85 = arith.mulf %82, %84 : vector<256x128xf32>
    %c0_130 = arith.constant 0 : index
    %c0_131 = arith.constant 0 : index
    %86 = vector.load %arg7[%c0_130, %c0_131] : memref<1x128xf32, #tpu.memory_space<vmem>>, vector<1x128xf32>
    %87 = vector.broadcast %86 : vector<1x128xf32> to vector<256x128xf32>
    %88 = arith.addf %85, %87 : vector<256x128xf32>
    %cst_132 = arith.constant 0.000000e+00 : f32
    %89 = vector.broadcast %cst_132 : f32 to vector<256x128xf32>
    %90 = arith.maximumf %88, %89 : vector<256x128xf32>
    %91 = vector.shape_cast %90 : vector<256x128xf32> to vector<16x16x128xf32>
    %c0_133 = arith.constant 0 : index
    %c0_134 = arith.constant 0 : index
    %c0_135 = arith.constant 0 : index
    %c0_136 = arith.constant 0 : index
    %92 = vector.load %arg8[%c0_133, %c0_134, %c0_135, %c0_136] : memref<1x16x16x128xf32, #tpu.memory_space<vmem>>, vector<1x16x16x128xf32>
    %93 = vector.shape_cast %92 : vector<1x16x16x128xf32> to vector<16x16x128xf32>
    %94 = vector.shape_cast %91 : vector<16x16x128xf32> to vector<1x16x16x128xf32>
    tpu.vector_store %arg8[%c0_133, %c0_134, %c0_135, %c0_136], %94 {strides = array<i32>} : memref<1x16x16x128xf32, #tpu.memory_space<vmem>>, vector<1x16x16x128xf32>,
    return
  }
  func.func @transform_0(%arg0: i32) -> (i32, i32, i32, i32) {
    %c0_i32 = arith.constant 0 : i32
    %c0_i32_0 = arith.constant 0 : i32
    %c0_i32_1 = arith.constant 0 : i32
    %c0_i32_2 = arith.constant 0 : i32
    return %arg0, %c0_i32, %c0_i32_0, %c0_i32_1 : i32, i32, i32, i32
  }
  func.func @transform_1(%arg0: i32) -> (i32, i32) {
    %c0_i32 = arith.constant 0 : i32
    %c0_i32_0 = arith.constant 0 : i32
    %c0_i32_1 = arith.constant 0 : i32
    return %c0_i32, %c0_i32_0 : i32, i32
  }
  func.func @transform_2(%arg0: i32) -> (i32, i32) {
    %c0_i32 = arith.constant 0 : i32
    %c0_i32_0 = arith.constant 0 : i32
    %c0_i32_1 = arith.constant 0 : i32
    return %c0_i32, %c0_i32_0 : i32, i32
  }
  func.func @transform_3(%arg0: i32) -> (i32, i32) {
    %c0_i32 = arith.constant 0 : i32
    %c0_i32_0 = arith.constant 0 : i32
    %c0_i32_1 = arith.constant 0 : i32
    return %c0_i32, %c0_i32_0 : i32, i32
  }
  func.func @transform_4(%arg0: i32) -> (i32, i32) {
    %c0_i32 = arith.constant 0 : i32
    %c0_i32_0 = arith.constant 0 : i32
    %c0_i32_1 = arith.constant 0 : i32
    return %c0_i32, %c0_i32_0 : i32, i32
  }
  func.func @transform_5(%arg0: i32) -> (i32, i32) {
    %c0_i32 = arith.constant 0 : i32
    %c0_i32_0 = arith.constant 0 : i32
    %c0_i32_1 = arith.constant 0 : i32
    return %c0_i32, %c0_i32_0 : i32, i32
  }
  func.func @transform_6(%arg0: i32) -> (i32, i32) {
    %c0_i32 = arith.constant 0 : i32
    %c0_i32_0 = arith.constant 0 : i32
    %c0_i32_1 = arith.constant 0 : i32
    return %c0_i32, %c0_i32_0 : i32, i32
  }
  func.func @transform_7(%arg0: i32) -> (i32, i32, i32, i32) {
    %c0_i32 = arith.constant 0 : i32
    %c0_i32_0 = arith.constant 0 : i32
    %c0_i32_1 = arith.constant 0 : i32
    %c0_i32_2 = arith.constant 0 : i32
    return %arg0, %c0_i32, %c0_i32_0, %c0_i32_1 : i32, i32, i32, i32
  }
}

</mosaic_0001>

<bundles_post_ra>
// kernel: block_forward.1
= control target key start
LH: loop header
LB: loop body
LE: loop exit
PB: predicated region body
PF: predicated region fallthrough
CT: control target
= control target key end

     0   :  { %s5397_s24 = smov 0   ;;  %s8115_s0 = inlined_call_operand.vmem [shape: f32[2,16,16,128], index: 0, kind: input, shape index: {}]   ;;  %s8116_s1 = inlined_call_operand.vmem [shape: f32[1152,128], index: 1, kind: input, shape index: {}]   ;;  %s8117_s2 = inlined_call_operand.vmem [shape: f32[1,128], index: 2, kind: input, shape index: {}]   ;;  %s8118_s3 = inlined_call_operand.vmem [shape: f32[1,128], index: 3, kind: input, shape index: {}]   ;;  %s8119_s4 = inlined_call_operand.vmem [shape: f32[1152,128], index: 4, kind: input, shape index: {}]   ;;  %s8120_s5 = inlined_call_operand.vmem [shape: f32[1,128], index: 5, kind: input, shape index: {}]   ;;  %s8121_s6 = inlined_call_operand.vmem [shape: f32[1,128], index: 6, kind: input, shape index: {}]   ;;  %s8122_s7 = inlined_call_operand.vmem [shape: f32[2,16,16,128], index: 7, kind: output, shape index: {}]  }
   0x1 LB: > { %s5030_s25 = sadd.s32 4294967295, %s5354_s24   ;;  %p5034_p0 = scmp.ge.s32.totalorder %s5354_s24, 1  ;;  %s5354_s24 = sphi %s5397_s24, %s17_s24  }
   0x2   : > { %p237_p1 = scmp.lt.s32.totalorder %s5354_s24, 3 }
   0x4   : > { %p238_p2 = pnand %p5034_p0, %p237_p1 }
   0x6   : > { %241 = sbr.rel (%p238_p2) target bundleno = 1056 (0x420), region = 48 }
   0xb   : > { %v5408_v0 = vld [vmem:[%s8116_s1 + $0x78] sm:$0xff]  ;;  %v5356_v2 = vmov 0.0   ;;  %v1302_v3 = vld [vmem:[%s8116_s1 + $0x70] sm:$0xff]  ;;  %v1301_v5 = vld [vmem:[%s8116_s1 + $0x68] sm:$0xff]  ;;  %p269_p3 = scmp.lt.s32.totalorder %s5030_s25, 1 }
   0xc   : > { %v5413_v1 = vld [vmem:[%s8116_s1 + $0x178] sm:$0xff]  ;;  %1432 = vmatprep.subr.mxu0 %v5356_v2  ;;  %279 = vst [vmem:[#allocation2] sm:$0xff] %v5356_v2  ;;  %280 = vst [vmem:[#allocation2 + $0x8] sm:$0xff] %v5356_v2  ;;  %1657 = vmatprep.subr.mxu1 %v5356_v2  ;;  %v1334_v4 = vld [vmem:[%s8116_s1 + $0x170] sm:$0xff] }
   0xd   : > { %281 = vst [vmem:[#allocation2 + $0x10] sm:$0x3] %v5356_v2  ;;  %283 = vst [vmem:[#allocation2 + $0x198] sm:$0xff] %v5356_v2  ;;  %1433 = vmatpush1.msra.mxu0 %v5408_v0  ;;  %1658 = vmatpush1.msra.mxu1 %v5413_v1  ;;  %v1333_v6 = vld [vmem:[%s8116_s1 + $0x168] sm:$0xff]  ;;  %v1300_v7 = vld [vmem:[%s8116_s1 + $0x60] sm:$0xff]  ;;  %s8137_s25 = smov (!%p269_p3, %s5030_s25), 1 }
   0xe   : > { %284 = vst [vmem:[#allocation2 + $0x1a0] sm:$0xff] %v5356_v2  ;;  %285 = vst [vmem:[#allocation2 + $0x1a8] sm:$0x3] %v5356_v2  ;;  %1434 = vmatprep.subr.mxu0 %v5356_v2  ;;  %1659 = vmatprep.subr.mxu1 %v5356_v2  ;;  %v1332_v8 = vld [vmem:[%s8116_s1 + $0x160] sm:$0xff]  ;;  %v1299_v9 = vld [vmem:[%s8116_s1 + $0x58] sm:$0xff]  ;;  %s5045_s18 = sshll.u32 %s8137_s25, 8 }
   0xf   : > { %287 = vst [vmem:[#allocation2 + $0x18] sm:$0x1] %v5356_v2  ;;  %288 = vst [vmem:[#allocation2 + $0x30] sm:$0x1] %v5356_v2  ;;  %1435 = vmatpush1.msra.mxu0 %v1302_v3  ;;  %1660 = vmatpush1.msra.mxu1 %v1334_v4  ;;  %v1331_v10 = vld [vmem:[%s8116_s1 + $0x158] sm:$0xff]  ;;  %v1298_v11 = vld [vmem:[%s8116_s1 + $0x50] sm:$0xff]  ;;  %s5577_s27 = scalar_lea.vmem %s8115_s0, %s5045_s18  ;;  %s7982_s15 = scalar_lea.vmem %s8122_s7, %s5045_s18 }
  0x10   : > { %289 = vst [vmem:[#allocation2 + $0x48] sm:$0x1] %v5356_v2  ;;  %290 = vst [vmem:[#allocation2 + $0x60] sm:$0x1] %v5356_v2  ;;  %1436 = vmatprep.subr.mxu0 %v5356_v2  ;;  %1661 = vmatprep.subr.mxu1 %v5356_v2  ;;  %v1330_v12 = vld [vmem:[%s8116_s1 + $0x150] sm:$0xff]  ;;  %v1297_v13 = vld [vmem:[%s8116_s1 + $0x48] sm:$0xff] }
  0x11   : > { %291 = vst [vmem:[#allocation2 + $0x78] sm:$0x1] %v5356_v2  ;;  %292 = vst [vmem:[#allocation2 + $0x90] sm:$0x1] %v5356_v2  ;;  %1437 = vmatpush1.msra.mxu0 %v1301_v5  ;;  %1662 = vmatpush1.msra.mxu1 %v1333_v6  ;;  %v1329_v14 = vld [vmem:[%s8116_s1 + $0x148] sm:$0xff]  ;;  %v1296_v15 = vld [vmem:[%s8116_s1 + $0x40] sm:$0xff] }
  0x12   : > { %293 = vst [vmem:[#allocation2 + $0xa8] sm:$0x1] %v5356_v2  ;;  %294 = vst [vmem:[#allocation2 + $0xc0] sm:$0x1] %v5356_v2  ;;  %1438 = vmatprep.subr.mxu0 %v5356_v2  ;;  %1663 = vmatprep.subr.mxu1 %v5356_v2  ;;  %v1328_v16 = vld [vmem:[%s8116_s1 + $0x140] sm:$0xff]  ;;  %v1295_v17 = vld [vmem:[%s8116_s1 + $0x38] sm:$0xff] }
  0x13   : > { %295 = vst [vmem:[#allocation2 + $0xd8] sm:$0x1] %v5356_v2  ;;  %296 = vst [vmem:[#allocation2 + $0xf0] sm:$0x1] %v5356_v2  ;;  %1439 = vmatpush1.msra.mxu0 %v1300_v7  ;;  %1664 = vmatpush1.msra.mxu1 %v1332_v8  ;;  %v1327_v18 = vld [vmem:[%s8116_s1 + $0x138] sm:$0xff]  ;;  %v1294_v19 = vld [vmem:[%s8116_s1 + $0x30] sm:$0xff] }
  0x14   : > { %297 = vst [vmem:[#allocation2 + $0x108] sm:$0x1] %v5356_v2  ;;  %298 = vst [vmem:[#allocation2 + $0x120] sm:$0x1] %v5356_v2  ;;  %1440 = vmatprep.subr.mxu0 %v5356_v2  ;;  %1665 = vmatprep.subr.mxu1 %v5356_v2  ;;  %v1326_v20 = vld [vmem:[%s8116_s1 + $0x130] sm:$0xff]  ;;  %v1293_v21 = vld [vmem:[%s8116_s1 + $0x28] sm:$0xff] }
  0x15   : > { %299 = vst [vmem:[#allocation2 + $0x138] sm:$0x1] %v5356_v2  ;;  %300 = vst [vmem:[#allocation2 + $0x150] sm:$0x1] %v5356_v2  ;;  %1441 = vmatpush1.msra.mxu0 %v1299_v9  ;;  %1666 = vmatpush1.msra.mxu1 %v1331_v10  ;;  %v1325_v22 = vld [vmem:[%s8116_s1 + $0x128] sm:$0xff]  ;;  %v1292_v23 = vld [vmem:[%s8116_s1 + $0x20] sm:$0xff] }
  0x16   : > { %301 = vst [vmem:[#allocation2 + $0x168] sm:$0x1] %v5356_v2  ;;  %302 = vst [vmem:[#allocation2 + $0x180] sm:$0x1] %v5356_v2  ;;  %1442 = vmatprep.subr.mxu0 %v5356_v2  ;;  %1667 = vmatprep.subr.mxu1 %v5356_v2  ;;  %v1324_v24 = vld [vmem:[%s8116_s1 + $0x120] sm:$0xff]  ;;  %v1291_v26 = vld [vmem:[%s8116_s1 + $0x18] sm:$0xff] }
  0x17   : > { %303 = vst [vmem:[#allocation2 + $0x29] sm:$0x1] %v5356_v2  ;;  %304 = vst [vmem:[#allocation2 + $0x41] sm:$0x1] %v5356_v2  ;;  %1443 = vmatpush1.msra.mxu0 %v1298_v11  ;;  %1668 = vmatpush1.msra.mxu1 %v1330_v12  ;;  %v5596_v25 = vld [vmem:[%s5577_s27] sm:$0xff]  ;;  %v1323_v27 = vld [vmem:[%s8116_s1 + $0x118] sm:$0xff] }
  0x18   : > { %305 = vst [vmem:[#allocation2 + $0x59] sm:$0x1] %v5356_v2  ;;  %306 = vst [vmem:[#allocation2 + $0x71] sm:$0x1] %v5356_v2  ;;  %1444 = vmatprep.subr.mxu0 %v5356_v2  ;;  %1669 = vmatprep.subr.mxu1 %v5356_v2  ;;  %v5608_v28 = vld [vmem:[%s5577_s27 + $0x8] sm:$0xff]  ;;  %v5612_v29 = vld [vmem:[%s5577_s27 + $0x10] sm:$0xff] }
  0x19   : > { %307 = vst [vmem:[#allocation2 + $0x89] sm:$0x1] %v5356_v2  ;;  %308 = vst [vmem:[#allocation2 + $0xa1] sm:$0x1] %v5356_v2  ;;  %1445 = vmatpush1.msra.mxu0 %v1297_v13  ;;  %1670 = vmatpush1.msra.mxu1 %v1329_v14  ;;  %v5615_v30 = vld [vmem:[%s5577_s27 + $0x18] sm:$0xff]  ;;  %v1290_v31 = vld [vmem:[%s8116_s1 + $0x10] sm:$0xff] }
  0x1a   : > { %309 = vst [vmem:[#allocation2 + $0xb9] sm:$0x1] %v5356_v2  ;;  %310 = vst [vmem:[#allocation2 + $0xd1] sm:$0x1] %v5356_v2  ;;  %1446 = vmatprep.subr.mxu0 %v5356_v2  ;;  %1671 = vmatprep.subr.mxu1 %v5356_v2  ;;  %v1322_v32 = vld [vmem:[%s8116_s1 + $0x110] sm:$0xff]  ;;  %v5628_v33 = vld [vmem:[%s5577_s27 + $0x20] sm:$0xff] }
  0x1b   : > { %311 = vst [vmem:[#allocation2 + $0xe9] sm:$0x1] %v5356_v2  ;;  %312 = vst [vmem:[#allocation2 + $0x101] sm:$0x1] %v5356_v2  ;;  %1447 = vmatpush1.msra.mxu0 %v1296_v15  ;;  %1672 = vmatpush1.msra.mxu1 %v1328_v16  ;;  %v5632_v34 = vld [vmem:[%s5577_s27 + $0x28] sm:$0xff]  ;;  %v5635_v35 = vld [vmem:[%s5577_s27 + $0x30] sm:$0xff] }
  0x1c   : > { %313 = vst [vmem:[#allocation2 + $0x119] sm:$0x1] %v5356_v2  ;;  %314 = vst [vmem:[#allocation2 + $0x131] sm:$0x1] %v5356_v2  ;;  %1448 = vmatprep.subr.mxu0 %v5356_v2  ;;  %1673 = vmatprep.subr.mxu1 %v5356_v2  ;;  %v1289_v36 = vld [vmem:[%s8116_s1 + $0x8] sm:$0xff]  ;;  %v5648_v38 = vld [vmem:[%s5577_s27 + $0x38] sm:$0xff] }
  0x1d   : > { %315 = vst [vmem:[#allocation2 + $0x149] sm:$0x1] %v5356_v2  ;;  %316 = vst [vmem:[#allocation2 + $0x161] sm:$0x1] %v5356_v2  ;;  %1449 = vmatpush1.msra.mxu0 %v1295_v17  ;;  %1674 = vmatpush1.msra.mxu1 %v1327_v18  ;;  %v1321_v37 = vld [vmem:[%s8116_s1 + $0x108] sm:$0xff]  ;;  %v5652_v39 = vld [vmem:[%s5577_s27 + $0x40] sm:$0xff] }
  0x1e   : > { %317 = vst [vmem:[#allocation2 + $0x179] sm:$0x1] %v5356_v2  ;;  %318 = vst [vmem:[#allocation2 + $0x191] sm:$0x1] %v5356_v2  ;;  %1450 = vmatprep.subr.mxu0 %v5356_v2  ;;  %1675 = vmatprep.subr.mxu1 %v5356_v2  ;;  %v5655_v40 = vld [vmem:[%s5577_s27 + $0x48] sm:$0xff]  ;;  %v1288_v41 = vld [vmem:[%s8116_s1] sm:$0xff] }
  0x1f   : > { %319 = vst [vmem:[#allocation3] sm:$0xff] %v5356_v2  ;;  %320 = vst [vmem:[#allocation3 + $0x8] sm:$0xff] %v5356_v2  ;;  %1451 = vmatpush1.msra.mxu0 %v1294_v19  ;;  %1676 = vmatpush1.msra.mxu1 %v1326_v20  ;;  %v1320_v42 = vld [vmem:[%s8116_s1 + $0x100] sm:$0xff]  ;;  %v5668_v43 = vld [vmem:[%s5577_s27 + $0x50] sm:$0xff] }
  0x20   : > { %321 = vst [vmem:[#allocation3 + $0x10] sm:$0x3] %v5356_v2  ;;  %323 = vst [vmem:[#allocation3 + $0x198] sm:$0xff] %v5356_v2  ;;  %1452 = vmatprep.subr.mxu0 %v5356_v2  ;;  %1677 = vmatprep.subr.mxu1 %v5356_v2  ;;  %v5672_v44 = vld [vmem:[%s5577_s27 + $0x58] sm:$0xff]  ;;  %v1318_v47 = vld [vmem:[%s8116_s1 + $0xf0] sm:$0xff] }
  0x21   : > { %324 = vst [vmem:[#allocation3 + $0x1a0] sm:$0xff] %v5356_v2  ;;  %325 = vst [vmem:[#allocation3 + $0x1a8] sm:$0x3] %v5356_v2  ;;  %1453 = vmatpush1.msra.mxu0 %v1293_v21  ;;  %1678 = vmatpush1.msra.mxu1 %v1325_v22  ;;  %v1319_v45 = vld [vmem:[%s8116_s1 + $0xf8] sm:$0xff]  ;;  %v1350_v48 = vld [vmem:[%s8116_s1 + $0x1f0] sm:$0xff] }
  0x22   : > { %327 = vst [vmem:[#allocation3 + $0x18] sm:$0x1] %v5356_v2  ;;  %328 = vst [vmem:[#allocation3 + $0x30] sm:$0x1] %v5356_v2  ;;  %1454 = vmatprep.subr.mxu0 %v5356_v2  ;;  %1679 = vmatprep.subr.mxu1 %v5356_v2  ;;  %v1351_v46 = vld [vmem:[%s8116_s1 + $0x1f8] sm:$0xff]  ;;  %v5692_v49 = vld [vmem:[%s5577_s27 + $0x60] sm:$0xff] }
  0x23   : > { %329 = vst [vmem:[#allocation3 + $0x48] sm:$0x1] %v5356_v2  ;;  %330 = vst [vmem:[#allocation3 + $0x60] sm:$0x1] %v5356_v2  ;;  %1455 = vmatpush1.msra.mxu0 %v1292_v23  ;;  %1680 = vmatpush1.msra.mxu1 %v1324_v24  ;;  %v1317_v50 = vld [vmem:[%s8116_s1 + $0xe8] sm:$0xff]  ;;  %v1316_v52 = vld [vmem:[%s8116_s1 + $0xe0] sm:$0xff] }
  0x24   : > { %331 = vst [vmem:[#allocation3 + $0x78] sm:$0x1] %v5356_v2  ;;  %332 = vst [vmem:[#allocation3 + $0x90] sm:$0x1] %v5356_v2  ;;  %1456 = vmatprep.subr.mxu0 %v5356_v2  ;;  %1681 = vmatprep.subr.mxu1 %v5356_v2  ;;  %v1349_v51 = vld [vmem:[%s8116_s1 + $0x1e8] sm:$0xff]  ;;  %v1348_v53 = vld [vmem:[%s8116_s1 + $0x1e0] sm:$0xff] }
  0x25   : > { %333 = vst [vmem:[#allocation3 + $0xa8] sm:$0x1] %v5356_v2  ;;  %334 = vst [vmem:[#allocation3 + $0xc0] sm:$0x1] %v5356_v2  ;;  %1457 = vmatpush1.msra.mxu0 %v1291_v26  ;;  %1682 = vmatpush1.msra.mxu1 %v1323_v27  ;;  %v1315_v54 = vld [vmem:[%s8116_s1 + $0xd8] sm:$0xff]  ;;  %v5720_v56 = vld [vmem:[%s5577_s27 + $0x68] sm:$0xff] }
  0x26   : > { %335 = vst [vmem:[#allocation3 + $0xd8] sm:$0x1] %v5356_v2  ;;  %336 = vst [vmem:[#allocation3 + $0xf0] sm:$0x1] %v5356_v2  ;;  %1458 = vmatprep.subr.mxu0 %v5356_v2  ;;  %1683 = vmatprep.subr.mxu1 %v5356_v2  ;;  %v1347_v55 = vld [vmem:[%s8116_s1 + $0x1d8] sm:$0xff]  ;;  %v5724_v57 = vld [vmem:[%s5577_s27 + $0x70] sm:$0xff] }
  0x27   : > { %337 = vst [vmem:[#allocation3 + $0x108] sm:$0x1] %v5356_v2  ;;  %338 = vst [vmem:[#allocation3 + $0x120] sm:$0x1] %v5356_v2  ;;  %1459 = vmatpush1.msra.mxu0 %v1290_v31  ;;  %1684 = vmatpush1.msra.mxu1 %v1322_v32  ;;  %v5727_v58 = vld [vmem:[%s5577_s27 + $0x78] sm:$0xff]  ;;  %v1314_v59 = vld [vmem:[%s8116_s1 + $0xd0] sm:$0xff] }
  0x28   : > { %339 = vst [vmem:[#allocation3 + $0x138] sm:$0x1] %v5356_v2  ;;  %340 = vst [vmem:[#allocation3 + $0x150] sm:$0x1] %v5356_v2  ;;  %1460 = vmatprep.subr.mxu0 %v5356_v2  ;;  %1685 = vmatprep.subr.mxu1 %v5356_v2  ;;  %v1346_v60 = vld [vmem:[%s8116_s1 + $0x1d0] sm:$0xff]  ;;  %v5740_v61 = vld [vmem:[%s5577_s27 + $0x80] sm:$0xff] }
  0x29   : > { %341 = vst [vmem:[#allocation3 + $0x168] sm:$0x1] %v5356_v2  ;;  %342 = vst [vmem:[#allocation3 + $0x180] sm:$0x1] %v5356_v2  ;;  %1461 = vmatpush1.msra.mxu0 %v1289_v36  ;;  %1686 = vmatpush1.msra.mxu1 %v1321_v37  ;;  %v5744_v62 = vld [vmem:[%s5577_s27 + $0x88] sm:$0xff]  ;;  %v5756_v1 = vld [vmem:[%s5577_s27 + $0x90] sm:$0xff] }
  0x2a   : > { %343 = vst [vmem:[#allocation3 + $0x29] sm:$0x1] %v5356_v2  ;;  %344 = vst [vmem:[#allocation3 + $0x41] sm:$0x1] %v5356_v2  ;;  %1462 = vmatprep.subr.mxu0 %v5356_v2  ;;  %1687 = vmatprep.subr.mxu1 %v5356_v2  ;;  %v1313_v63 = vld [vmem:[%s8116_s1 + $0xc8] sm:$0xff]  ;;  %v1312_v3 = vld [vmem:[%s8116_s1 + $0xc0] sm:$0xff] }
  0x2b   : > { %345 = vst [vmem:[#allocation3 + $0x59] sm:$0x1] %v5356_v2  ;;  %346 = vst [vmem:[#allocation3 + $0x71] sm:$0x1] %v5356_v2  ;;  %1463 = vmatpush1.msra.mxu0 %v1288_v41  ;;  %1688 = vmatpush1.msra.mxu1 %v1320_v42  ;;  %v1345_v0 = vld [vmem:[%s8116_s1 + $0x1c8] sm:$0xff]  ;;  %v1344_v4 = vld [vmem:[%s8116_s1 + $0x1c0] sm:$0xff] }
  0x2c   : > { %347 = vst [vmem:[#allocation3 + $0x89] sm:$0x1] %v5356_v2  ;;  %348 = vst [vmem:[#allocation3 + $0xa1] sm:$0x1] %v5356_v2  ;;  %1464 = vmatprep.subr.mxu0 %v5356_v2  ;;  %1689 = vmatprep.subr.mxu1 %v5356_v2  ;;  %v5768_v5 = vld [vmem:[%s5577_s27 + $0x98] sm:$0xff]  ;;  %v5772_v6 = vld [vmem:[%s5577_s27 + $0xa0] sm:$0xff] }
  0x2d   : > { %349 = vst [vmem:[#allocation3 + $0xb9] sm:$0x1] %v5356_v2  ;;  %350 = vst [vmem:[#allocation3 + $0xd1] sm:$0x1] %v5356_v2  ;;  %1465 = vmatpush2.msra.mxu0 %v1319_v45  ;;  %1690 = vmatpush2.msra.mxu1 %v1351_v46  ;;  %v1311_v7 = vld [vmem:[%s8116_s1 + $0xb8] sm:$0xff]  ;;  %v1310_v9 = vld [vmem:[%s8116_s1 + $0xb0] sm:$0xff] }
  0x2e   : > { %351 = vst [vmem:[#allocation3 + $0xe9] sm:$0x1] %v5356_v2  ;;  %352 = vst [vmem:[#allocation3 + $0x101] sm:$0x1] %v5356_v2  ;;  %1466 = vmatprep.subr.mxu0 %v5356_v2  ;;  %1691 = vmatprep.subr.mxu1 %v5356_v2  ;;  %v1343_v8 = vld [vmem:[%s8116_s1 + $0x1b8] sm:$0xff]  ;;  %v1342_v10 = vld [vmem:[%s8116_s1 + $0x1b0] sm:$0xff] }
  0x2f   : > { %353 = vst [vmem:[#allocation3 + $0x119] sm:$0x1] %v5356_v2  ;;  %354 = vst [vmem:[#allocation3 + $0x131] sm:$0x1] %v5356_v2  ;;  %1467 = vmatpush2.msra.mxu0 %v1318_v47  ;;  %1692 = vmatpush2.msra.mxu1 %v1350_v48  ;;  %v1309_v11 = vld [vmem:[%s8116_s1 + $0xa8] sm:$0xff]  ;;  %v1308_v14 = vld [vmem:[%s8116_s1 + $0xa0] sm:$0xff] }
  0x30   : > { %355 = vst [vmem:[#allocation3 + $0x149] sm:$0x1] %v5356_v2  ;;  %356 = vst [vmem:[#allocation3 + $0x161] sm:$0x1] %v5356_v2  ;;  %1468 = vmatprep.subr.mxu0 %v5356_v2  ;;  %1693 = vmatprep.subr.mxu1 %v5356_v2  ;;  %v1341_v12 = vld [vmem:[%s8116_s1 + $0x1a8] sm:$0xff]  ;;  %v1340_v15 = vld [vmem:[%s8116_s1 + $0x1a0] sm:$0xff] }
  0x31   : > { %357 = vst [vmem:[#allocation3 + $0x179] sm:$0x1] %v5356_v2  ;;  %358 = vst [vmem:[#allocation3 + $0x191] sm:$0x1] %v5356_v2  ;;  %1469 = vmatpush2.msra.mxu0 %v1317_v50  ;;  %1694 = vmatpush2.msra.mxu1 %v1349_v51  ;;  %v5800_v13 = vld [vmem:[%s5577_s27 + $0xa8] sm:$0xff]  ;;  %v5812_v16 = vld [vmem:[%s5577_s27 + $0xb0] sm:$0xff] }
  0x32   : > { %391 = vst [vmem:[#allocation2 + $0x19] sm:$0xff] %v5596_v25  ;;  %392 = vst [vmem:[#allocation2 + $0x21] sm:$0xff] %v5608_v28  ;;  %1470 = vmatprep.subr.mxu0 %v5356_v2  ;;  %1695 = vmatprep.subr.mxu1 %v5356_v2  ;;  %v1307_v17 = vld [vmem:[%s8116_s1 + $0x98] sm:$0xff]  ;;  %v1306_v20 = vld [vmem:[%s8116_s1 + $0x90] sm:$0xff] }
  0x33   : > { %393 = vst [vmem:[#allocation2 + $0x31] sm:$0xff] %v5612_v29  ;;  %394 = vst [vmem:[#allocation2 + $0x39] sm:$0xff] %v5615_v30  ;;  %1471 = vmatpush2.msra.mxu0 %v1316_v52  ;;  %1696 = vmatpush2.msra.mxu1 %v1348_v53  ;;  %v1339_v18 = vld [vmem:[%s8116_s1 + $0x198] sm:$0xff]  ;;  %v1338_v21 = vld [vmem:[%s8116_s1 + $0x190] sm:$0xff] }
  0x34   : > { %395 = vst [vmem:[#allocation2 + $0x49] sm:$0xff] %v5628_v33  ;;  %396 = vst [vmem:[#allocation2 + $0x51] sm:$0xff] %v5632_v34  ;;  %1472 = vmatprep.subr.mxu0 %v5356_v2  ;;  %1697 = vmatprep.subr.mxu1 %v5356_v2  ;;  %v5824_v19 = vld [vmem:[%s5577_s27 + $0xb8] sm:$0xff]  ;;  %v5836_v22 = vld [vmem:[%s5577_s27 + $0xc0] sm:$0xff] }
  0x35   : > { %397 = vst [vmem:[#allocation2 + $0x61] sm:$0xff] %v5635_v35  ;;  %398 = vst [vmem:[#allocation2 + $0x69] sm:$0xff] %v5648_v38  ;;  %1473 = vmatpush2.msra.mxu0 %v1315_v54  ;;  %1698 = vmatpush2.msra.mxu1 %v1347_v55  ;;  %v5840_v23 = vld [vmem:[%s5577_s27 + $0xc8] sm:$0xff]  ;;  %v1304_v31 = vld [vmem:[%s8116_s1 + $0x80] sm:$0xff] }
  0x36   : > { %399 = vst [vmem:[#allocation2 + $0x79] sm:$0xff] %v5652_v39  ;;  %400 = vst [vmem:[#allocation2 + $0x81] sm:$0xff] %v5655_v40  ;;  %1474 = vmatprep.subr.mxu0 %v5356_v2  ;;  %1699 = vmatprep.subr.mxu1 %v5356_v2  ;;  %v1305_v24 = vld [vmem:[%s8116_s1 + $0x88] sm:$0xff]  ;;  %v5857_v32 = vld [vmem:[%s5577_s27 + $0xd0] sm:$0xff] }
  0x37   : > { %401 = vst [vmem:[#allocation2 + $0x91] sm:$0xff] %v5668_v43  ;;  %402 = vst [vmem:[#allocation2 + $0x99] sm:$0xff] %v5672_v44  ;;  %1475 = vmatpush2.msra.mxu0 %v1314_v59  ;;  %1700 = vmatpush2.msra.mxu1 %v1346_v60  ;;  %v1337_v26 = vld [vmem:[%s8116_s1 + $0x188] sm:$0xff]  ;;  %v1336_v36 = vld [vmem:[%s8116_s1 + $0x180] sm:$0xff] }
  0x38   : > { %403 = vst [vmem:[#allocation2 + $0xa9] sm:$0xff] %v5692_v49  ;;  %404 = vst [vmem:[#allocation2 + $0xb1] sm:$0xff] %v5720_v56  ;;  %1476 = vmatprep.subr.mxu0 %v5356_v2  ;;  %1701 = vmatprep.subr.mxu1 %v5356_v2  ;;  %v487_v27 = vld [vmem:[#allocation2 + $0x1] sm:$0xff]  ;;  %v5864_v37 = vld [vmem:[%s5577_s27 + $0xd8] sm:$0xff] }
  0x39   : > { %405 = vst [vmem:[#allocation2 + $0xc1] sm:$0xff] %v5724_v57  ;;  %406 = vst [vmem:[#allocation2 + $0xc9] sm:$0xff] %v5727_v58  ;;  %1477 = vmatpush2.msra.mxu0 %v1313_v63  ;;  %1702 = vmatpush2.msra.mxu1 %v1345_v0  ;;  %v615_v41 = vld [vmem:[#allocation2 + $0x18] sm:$0xff]  ;;  %v551_v42 = vld [vmem:[#allocation2 + $0x2] sm:$0xff] }
  0x3a   : > { %407 = vst [vmem:[#allocation2 + $0xd9] sm:$0xff] %v5740_v61  ;;  %408 = vst [vmem:[#allocation2 + $0xe1] sm:$0xff] %v5744_v62  ;;  %1478 = vmatprep.subr.mxu0 %v5356_v2  ;;  %1703 = vmatprep.subr.mxu1 %v5356_v2  ;;  %v1367_v45 = vld [vmem:[%s8116_s1 + $0x278] sm:$0xff]  ;;  %v488_v46 = vld [vmem:[#allocation2 + $0x9] sm:$0xff] }
  0x3b   : > { %409 = vst [vmem:[#allocation2 + $0xf1] sm:$0xff] %v5756_v1  ;;  %410 = vst [vmem:[#allocation2 + $0xf9] sm:$0xff] %v5768_v5  ;;  %1479 = vmatpush2.msra.mxu0 %v1312_v3  ;;  %1704 = vmatpush2.msra.mxu1 %v1344_v4  ;;  %v616_v47 = vld [vmem:[#allocation2 + $0x20] sm:$0xff]  ;;  %v1366_v50 = vld [vmem:[%s8116_s1 + $0x270] sm:$0xff] }
  0x3c   : > { %411 = vst [vmem:[#allocation2 + $0x109] sm:$0xff] %v5772_v6  ;;  %1480 = vmatprep.subr.mxu0 %v5356_v2  ;;  %1705 = vmatprep.subr.mxu1 %v5356_v2  ;;  %412 = vst [vmem:[#allocation2 + $0x111] sm:$0xff] %v5800_v13  ;;  %v5874_v48 = vld [vmem:[%s5577_s27 + $0xe0] sm:$0xff]  ;;  %v5882_v51 = vld [vmem:[%s5577_s27 + $0xe8] sm:$0xff] }
  0x3d   : > { %1481 = vmatpush2.msra.mxu0 %v1311_v7  ;;  %1706 = vmatpush2.msra.mxu1 %v1343_v8  ;;  %413 = vst [vmem:[#allocation2 + $0x121] sm:$0xff] %v5812_v16  ;;  %414 = vst [vmem:[#allocation2 + $0x129] sm:$0xff] %v5824_v19  ;;  %v552_v52 = vld [vmem:[#allocation2 + $0xa] sm:$0xff]  ;;  %v1364_v59 = vld [vmem:[%s8116_s1 + $0x260] sm:$0xff] }
  0x3e   : > { %1482 = vmatprep.subr.mxu0 %v5356_v2  ;;  %1707 = vmatprep.subr.mxu1 %v5356_v2  ;;  %415 = vst [vmem:[#allocation2 + $0x139] sm:$0xff] %v5836_v22  ;;  %416 = vst [vmem:[#allocation2 + $0x141] sm:$0xff] %v5840_v23  ;;  %v5887_v53 = vld [vmem:[#allocation2 + $0x30] sm:$0xff]  ;;  %v1365_v54 = vld [vmem:[%s8116_s1 + $0x268] sm:$0xff] }
  0x3f   : > { %1483 = vmatpush2.msra.mxu0 %v1310_v9  ;;  %1708 = vmatpush2.msra.mxu1 %v1342_v10  ;;  %417 = vst [vmem:[#allocation2 + $0x151] sm:$0xff] %v5857_v32  ;;  %418 = vst [vmem:[#allocation2 + $0x159] sm:$0xff] %v5864_v37  ;;  %v389_v55 = vld [vmem:[%s5577_s27 + $0xf0] sm:$0xff]  ;;  %v390_v60 = vld [vmem:[%s5577_s27 + $0xf8] sm:$0xff] }
  0x40   : > { %1484 = vmatprep.subr.mxu0 %v5356_v2  ;;  %1709 = vmatprep.subr.mxu1 %v5356_v2  ;;  %419 = vst [vmem:[#allocation2 + $0x169] sm:$0xff] %v5874_v48  ;;  %420 = vst [vmem:[#allocation2 + $0x171] sm:$0xff] %v5882_v51  ;;  %v5900_v63 = vld [vmem:[#allocation2 + $0x1a] sm:$0xff]  ;;  %v1362_v3 = vld [vmem:[%s8116_s1 + $0x250] sm:$0xff] }
  0x41   : > { %1485 = vmatpush2.msra.mxu0 %v1309_v11  ;;  %1710 = vmatpush2.msra.mxu1 %v1341_v12  ;;  %421 = vst [vmem:[#allocation2 + $0x181] sm:$0xff] %v389_v55  ;;  %422 = vst [vmem:[#allocation2 + $0x189] sm:$0xff] %v390_v60  ;;  %v5902_v0 = vld [vmem:[#allocation2 + $0x38] sm:$0xff]  ;;  %v5915_v4 = vld [vmem:[#allocation2 + $0x22] sm:$0xff] }
  0x42   : > { %1486 = vmatprep.subr.mxu0 %v5356_v2  ;;  %1711 = vmatprep.subr.mxu1 %v5356_v2  ;;  %v5917_v7 = vld [vmem:[#allocation2 + $0x48] sm:$0xff]  ;;  %v1360_v8 = vld [vmem:[%s8116_s1 + $0x240] sm:$0xff]  ;;  %v5930_v9 = vld [vmem:[#allocation2 + $0x32] sm:$0xff] }
  0x43   : > { %1487 = vmatpush2.msra.mxu0 %v1308_v14  ;;  %1712 = vmatpush2.msra.mxu1 %v1340_v15  ;;  %v5933_v10 = vld [vmem:[#allocation2 + $0x50] sm:$0xff]  ;;  %v5946_v12 = vld [vmem:[#allocation2 + $0x3a] sm:$0xff] }
  0x44   : > { %1488 = vmatprep.subr.mxu0 %v5356_v2  ;;  %1713 = vmatprep.subr.mxu1 %v5356_v2  ;;  %v1358_v11 = vld [vmem:[%s8116_s1 + $0x230] sm:$0xff]  ;;  %v5949_v14 = vld [vmem:[#allocation2 + $0x60] sm:$0xff]  ;;  %v1395_v55 = vld [vmem:[%s8116_s1 + $0x358] sm:$0xff] }
  0x45   : > { %1489 = vmatpush2.msra.mxu0 %v1307_v17  ;;  %1714 = vmatpush2.msra.mxu1 %v1339_v18  ;;  %v1356_v15 = vld [vmem:[%s8116_s1 + $0x220] sm:$0xff]  ;;  %v5962_v17 = vld [vmem:[#allocation2 + $0x4a] sm:$0xff] }
  0x46   : > { %1490 = vmatprep.subr.mxu0 %v5356_v2  ;;  %1715 = vmatprep.subr.mxu1 %v5356_v2  ;;  %v5965_v18 = vld [vmem:[#allocation2 + $0x68] sm:$0xff]  ;;  %v6061_v60 = vld [vmem:[#allocation2 + $0xb0] sm:$0xff] }
  0x47   : > { %1491 = vmatpush2.msra.mxu0 %v1306_v20  ;;  %1716 = vmatpush2.msra.mxu1 %v1338_v21  ;;  %v1354_v20 = vld [vmem:[%s8116_s1 + $0x210] sm:$0xff] }
  0x48   : > { %1492 = vmatprep.subr.mxu0 %v5356_v2  ;;  %1717 = vmatprep.subr.mxu1 %v5356_v2  ;;  %v5978_v21 = vld [vmem:[#allocation2 + $0x52] sm:$0xff] }
  0x49   : > { %1493 = vmatpush2.msra.mxu0 %v1305_v24  ;;  %1718 = vmatpush2.msra.mxu1 %v1337_v26  ;;  %v5981_v24 = vld [vmem:[#allocation2 + $0x78] sm:$0xff]  ;;  %v1352_v26 = vld [vmem:[%s8116_s1 + $0x200] sm:$0xff] }
  0x4a   : > { %1494 = vmatprep.subr.mxu0 %v5356_v2  ;;  %1496 = vmatprep.mubr.f32.mxu0 %v487_v27  ;;  %v5994_v27 = vld [vmem:[#allocation2 + $0x62] sm:$0xff] }
  0x4b   : > { %1495 = vmatpush2.msra.mxu0 %v1304_v31  ;;  %1719 = vmatprep.subr.mxu1 %v5356_v2  ;;  %v5997_v31 = vld [vmem:[#allocation2 + $0x80] sm:$0xff] }
  0x4c   : > { %1497 = vmatmul.mubr.f32.vlgmr.msra.gmra.mxu0 %v5356_v2  ;;  %1720 = vmatpush2.msra.mxu1 %v1336_v36  ;;  %v1399_v36 = vld [vmem:[%s8116_s1 + $0x378] sm:$0xff] }
  0x4d   : > { %1721 = vmatprep.mubr.f32.mxu1 %v615_v41  ;;  %1882 = vmatprep.subr.mxu0 %v5356_v2 }
  0x4e   : > { %1722 = vmatmul.mubr.f32.vlgmr.msra.gmra.mxu1 %v551_v42  ;;  %1883 = vmatpush1.msra.mxu0 %v1367_v45  ;;  %v6013_v42 = vld [vmem:[#allocation2 + $0x90] sm:$0xff] }
  0x4f   : > { %1501 = vmatprep.mubr.f32.mxu0 %v488_v46  ;;  %1726 = vmatprep.mubr.f32.mxu1 %v616_v47  ;;  %v1382_v45 = vld [vmem:[%s8116_s1 + $0x2f0] sm:$0xff]  ;;  %v6026_v46 = vld [vmem:[#allocation2 + $0x7a] sm:$0xff] }
  0x50   : > { %1502 = vmatmul.mubr.f32.gmra.mxu0 %v5356_v2  ;;  %1884 = vmatprep.subr.mxu0 %v5356_v2 }
  0x51   : > { %1885 = vmatpush1.msra.mxu0 %v1366_v50  ;;  %1506 = vmatprep.mubr.f32.mxu0 %v5596_v25  ;;  %v1363_v25 = vld [vmem:[%s8116_s1 + $0x258] sm:$0xff]  ;;  %v6039_v50 = vld [vmem:[#allocation2 + $0x82] sm:$0xff] }
  0x52   : > { %1727 = vmatmul.mubr.f32.gmra.mxu1 %v552_v52  ;;  %1886 = vmatprep.subr.mxu0 %v5356_v2  ;;  %v1381_v52 = vld [vmem:[%s8116_s1 + $0x2e8] sm:$0xff] }
  0x53   : > { %1731 = vmatprep.mubr.f32.mxu1 %v5887_v53  ;;  %1887 = vmatpush1.msra.mxu0 %v1365_v54  ;;  %v6045_v54 = vld [vmem:[#allocation2 + $0xa8] sm:$0xff] }
  0x54   : > { %1507 = vmatmul.mubr.f32.gmra.mxu0 %v615_v41  ;;  %1888 = vmatprep.subr.mxu0 %v5356_v2  ;;  %v6010_v41 = vld [vmem:[#allocation2 + $0x6a] sm:$0xff] }
  0x55   : > { %1511 = vmatprep.mubr.f32.mxu0 %v5608_v28  ;;  %1889 = vmatpush1.msra.mxu0 %v1364_v59  ;;  %v1361_v28 = vld [vmem:[%s8116_s1 + $0x248] sm:$0xff]  ;;  %v6058_v59 = vld [vmem:[#allocation2 + $0x92] sm:$0xff] }
  0x56   : > { %1732 = vmatmul.mubr.f32.gmra.mxu1 %v5900_v63  ;;  %1890 = vmatprep.subr.mxu0 %v5356_v2 }
  0x57   : > { %1736 = vmatprep.mubr.f32.mxu1 %v5902_v0  ;;  %1891 = vmatpush1.msra.mxu0 %v1363_v25  ;;  %v1380_v25 = vld [vmem:[%s8116_s1 + $0x2e0] sm:$0xff] }
  0x58   : > { %1512 = vmatmul.mubr.f32.gmra.mxu0 %v616_v47  ;;  %1892 = vmatprep.subr.mxu0 %v5356_v2  ;;  %v1397_v47 = vld [vmem:[%s8116_s1 + $0x368] sm:$0xff] }
  0x59   : > { %1516 = vmatprep.mubr.f32.mxu0 %v5612_v29  ;;  %1893 = vmatpush1.msra.mxu0 %v1362_v3  ;;  %v1359_v29 = vld [vmem:[%s8116_s1 + $0x238] sm:$0xff] }
  0x5a   : > { %1737 = vmatmul.mubr.f32.gmra.mxu1 %v5915_v4  ;;  %1894 = vmatprep.subr.mxu0 %v5356_v2  ;;  %v6074_v3 = vld [vmem:[#allocation2 + $0x9a] sm:$0xff] }
  0x5b   : > { %1741 = vmatprep.mubr.f32.mxu1 %v5917_v7  ;;  %1895 = vmatpush1.msra.mxu0 %v1361_v28  ;;  %v1393_v28 = vld [vmem:[%s8116_s1 + $0x348] sm:$0xff] }
  0x5c   : > { %1517 = vmatmul.mubr.f32.gmra.mxu0 %v5887_v53  ;;  %1896 = vmatprep.subr.mxu0 %v5356_v2 }
  0x5d   : > { %1521 = vmatprep.mubr.f32.mxu0 %v5615_v30  ;;  %1897 = vmatpush1.msra.mxu0 %v1360_v8  ;;  %v1357_v30 = vld [vmem:[%s8116_s1 + $0x228] sm:$0xff] }
  0x5e   : > { %1742 = vmatmul.mubr.f32.gmra.mxu1 %v5930_v9  ;;  %1898 = vmatprep.subr.mxu0 %v5356_v2  ;;  %v6087_v8 = vld [vmem:[#allocation2 + $0xaa] sm:$0xff] }
  0x5f   : > { %1746 = vmatprep.mubr.f32.mxu1 %v5933_v10  ;;  %1899 = vmatpush1.msra.mxu0 %v1359_v29  ;;  %v1379_v29 = vld [vmem:[%s8116_s1 + $0x2d8] sm:$0xff] }
  0x60   : > { %1522 = vmatmul.mubr.f32.gmra.mxu0 %v5902_v0  ;;  %1900 = vmatprep.subr.mxu0 %v5356_v2 }
  0x61   : > { %1526 = vmatprep.mubr.f32.mxu0 %v5628_v33  ;;  %1901 = vmatpush1.msra.mxu0 %v1358_v11  ;;  %v1355_v33 = vld [vmem:[%s8116_s1 + $0x218] sm:$0xff]  ;;  %v6093_v11 = vld [vmem:[#allocation2 + $0xc8] sm:$0xff] }
  0x62   : > { %1747 = vmatmul.mubr.f32.gmra.mxu1 %v5946_v12  ;;  %1902 = vmatprep.subr.mxu0 %v5356_v2 }
  0x63   : > { %1751 = vmatprep.mubr.f32.mxu1 %v5949_v14  ;;  %1903 = vmatpush1.msra.mxu0 %v1357_v30  ;;  %v1391_v30 = vld [vmem:[%s8116_s1 + $0x338] sm:$0xff] }
  0x64   : > { %1527 = vmatmul.mubr.f32.gmra.mxu0 %v5917_v7  ;;  %1904 = vmatprep.subr.mxu0 %v5356_v2 }
  0x65   : > { %1531 = vmatprep.mubr.f32.mxu0 %v5632_v34  ;;  %1905 = vmatpush1.msra.mxu0 %v1356_v15  ;;  %v1353_v34 = vld [vmem:[%s8116_s1 + $0x208] sm:$0xff]  ;;  %v6106_v15 = vld [vmem:[#allocation2 + $0xb2] sm:$0xff] }
  0x66   : > { %1752 = vmatmul.mubr.f32.gmra.mxu1 %v5962_v17  ;;  %1906 = vmatprep.subr.mxu0 %v5356_v2 }
  0x67   : > { %1756 = vmatprep.mubr.f32.mxu1 %v5965_v18  ;;  %1907 = vmatpush1.msra.mxu0 %v1355_v33  ;;  %v6109_v33 = vld [vmem:[#allocation2 + $0xd8] sm:$0xff] }
  0x68   : > { %1532 = vmatmul.mubr.f32.gmra.mxu0 %v5933_v10  ;;  %1908 = vmatprep.subr.mxu0 %v5356_v2 }
  0x69   : > { %1536 = vmatprep.mubr.f32.mxu0 %v5635_v35  ;;  %1909 = vmatpush1.msra.mxu0 %v1354_v20  ;;  %v1383_v35 = vld [vmem:[%s8116_s1 + $0x2f8] sm:$0xff]  ;;  %v6111_v20 = vld [vmem:[#allocation2] sm:$0xff] }
  0x6a   : > { %1757 = vmatmul.mubr.f32.gmra.mxu1 %v5978_v21  ;;  %1910 = vmatprep.subr.mxu0 %v5356_v2 }
  0x6b   : > { %1761 = vmatprep.mubr.f32.mxu1 %v5981_v24  ;;  %1911 = vmatpush1.msra.mxu0 %v1353_v34  ;;  %v6124_v34 = vld [vmem:[#allocation2 + $0xc2] sm:$0xff] }
  0x6c   : > { %1537 = vmatmul.mubr.f32.gmra.mxu0 %v5949_v14  ;;  %1912 = vmatprep.subr.mxu0 %v5356_v2 }
  0x6d   : > { %1541 = vmatprep.mubr.f32.mxu0 %v5648_v38  ;;  %1913 = vmatpush1.msra.mxu0 %v1352_v26  ;;  %v1398_v38 = vld [vmem:[%s8116_s1 + $0x370] sm:$0xff]  ;;  %v1389_v26 = vld [vmem:[%s8116_s1 + $0x328] sm:$0xff] }
  0x6e   : > { %1762 = vmatmul.mubr.f32.gmra.mxu1 %v5994_v27  ;;  %1914 = vmatprep.subr.mxu0 %v5356_v2 }
  0x6f   : > { %1766 = vmatprep.mubr.f32.mxu1 %v5997_v31  ;;  %1915 = vmatpush2.msra.mxu0 %v1383_v35  ;;  %v6137_v35 = vld [vmem:[#allocation2 + $0xca] sm:$0xff] }
  0x70   : > { %1542 = vmatmul.mubr.f32.gmra.mxu0 %v5965_v18  ;;  %2107 = vmatprep.subr.mxu1 %v5356_v2 }
  0x71   : > { %1546 = vmatprep.mubr.f32.mxu0 %v5652_v39  ;;  %2108 = vmatpush1.msra.mxu1 %v1399_v36  ;;  %v6030_v39 = vld [vmem:[#allocation2 + $0x98] sm:$0xff]  ;;  %v1377_v36 = vld [vmem:[%s8116_s1 + $0x2c8] sm:$0xff] }
  0x72   : > { %1767 = vmatmul.mubr.f32.gmra.mxu1 %v6010_v41  ;;  %1916 = vmatprep.subr.mxu0 %v5356_v2 }
  0x73   : > { %1771 = vmatprep.mubr.f32.mxu1 %v6013_v42  ;;  %2109 = vmatprep.subr.mxu1 %v5356_v2 }
  0x74   : > { %1547 = vmatmul.mubr.f32.gmra.mxu0 %v5981_v24  ;;  %2110 = vmatpush1.msra.mxu1 %v1398_v38  ;;  %v6143_v38 = vld [vmem:[#allocation2 + $0xf0] sm:$0xff] }
  0x75   : > { %1551 = vmatprep.mubr.f32.mxu0 %v5655_v40  ;;  %1917 = vmatpush2.msra.mxu0 %v1382_v45  ;;  %v1396_v40 = vld [vmem:[%s8116_s1 + $0x360] sm:$0xff]  ;;  %v1387_v45 = vld [vmem:[%s8116_s1 + $0x318] sm:$0xff] }
  0x76   : > { %1772 = vmatmul.mubr.f32.gmra.mxu1 %v6026_v46  ;;  %2111 = vmatprep.subr.mxu1 %v5356_v2 }
  0x77   : > { %1776 = vmatprep.mubr.f32.mxu1 %v6030_v39  ;;  %2112 = vmatpush1.msra.mxu1 %v1397_v47  ;;  %v6156_v47 = vld [vmem:[#allocation2 + $0xda] sm:$0xff] }
  0x78   : > { %1552 = vmatmul.mubr.f32.gmra.mxu0 %v5997_v31  ;;  %1918 = vmatprep.subr.mxu0 %v5356_v2 }
  0x79   : > { %1556 = vmatprep.mubr.f32.mxu0 %v5668_v43  ;;  %2113 = vmatprep.subr.mxu1 %v5356_v2  ;;  %v1394_v43 = vld [vmem:[%s8116_s1 + $0x350] sm:$0xff] }
  0x7a   : > { %1777 = vmatmul.mubr.f32.gmra.mxu1 %v6039_v50  ;;  %1919 = vmatpush2.msra.mxu0 %v1381_v52  ;;  %v6159_v52 = vld [vmem:[#allocation2 + $0xf8] sm:$0xff] }
  0x7b   : > { %1781 = vmatprep.mubr.f32.mxu1 %v6045_v54  ;;  %2114 = vmatpush1.msra.mxu1 %v1396_v40  ;;  %v1376_v40 = vld [vmem:[%s8116_s1 + $0x2c0] sm:$0xff] }
  0x7c   : > { %1557 = vmatmul.mubr.f32.gmra.mxu0 %v6013_v42  ;;  %2115 = vmatprep.subr.mxu1 %v5356_v2 }
  0x7d   : > { %1561 = vmatprep.mubr.f32.mxu0 %v5672_v44  ;;  %2116 = vmatpush1.msra.mxu1 %v1395_v55  ;;  %v6078_v44 = vld [vmem:[#allocation2 + $0xc0] sm:$0xff] }
  0x7e   : > { %1782 = vmatmul.mubr.f32.gmra.mxu1 %v6058_v59  ;;  %1920 = vmatprep.subr.mxu0 %v5356_v2  ;;  %v6172_v55 = vld [vmem:[#allocation2 + $0xe2] sm:$0xff] }
  0x7f   : > { %1786 = vmatprep.mubr.f32.mxu1 %v6061_v60  ;;  %2117 = vmatprep.subr.mxu1 %v5356_v2 }
  0x80   : > { %1562 = vmatmul.mubr.f32.gmra.mxu0 %v6030_v39  ;;  %2118 = vmatpush1.msra.mxu1 %v1394_v43  ;;  %v1385_v43 = vld [vmem:[%s8116_s1 + $0x308] sm:$0xff] }
  0x81   : > { %1566 = vmatprep.mubr.f32.mxu0 %v5692_v49  ;;  %1921 = vmatpush2.msra.mxu0 %v1380_v25  ;;  %v1392_v49 = vld [vmem:[%s8116_s1 + $0x340] sm:$0xff]  ;;  %v6185_v25 = vld [vmem:[#allocation2 + $0xf2] sm:$0xff] }
  0x82   : > { %1787 = vmatmul.mubr.f32.gmra.mxu1 %v6074_v3  ;;  %2119 = vmatprep.subr.mxu1 %v5356_v2 }
  0x83   : > { %1791 = vmatprep.mubr.f32.mxu1 %v6078_v44  ;;  %2120 = vmatpush1.msra.mxu1 %v1393_v28  ;;  %v1375_v28 = vld [vmem:[%s8116_s1 + $0x2b8] sm:$0xff] }
  0x84   : > { %1567 = vmatmul.mubr.f32.gmra.mxu0 %v6045_v54  ;;  %1922 = vmatprep.subr.mxu0 %v5356_v2 }
  0x85   : > { %1571 = vmatprep.mubr.f32.mxu0 %v5720_v56  ;;  %2121 = vmatprep.subr.mxu1 %v5356_v2  ;;  %v1390_v2 = vld [vmem:[%s8116_s1 + $0x330] sm:$0xff] }
  0x86   : > { %1792 = vmatmul.mubr.f32.gmra.mxu1 %v6087_v8  ;;  %1923 = vmatpush2.msra.mxu0 %v1379_v29  ;;  %v1378_v56 = vld [vmem:[%s8116_s1 + $0x2d0] sm:$0xff] }
  0x87   : > { %1796 = vmatprep.mubr.f32.mxu1 %v6093_v11  ;;  %2122 = vmatpush1.msra.mxu1 %v1392_v49  ;;  %v6191_v29 = vld [vmem:[#allocation2 + $0x110] sm:$0xff]  ;;  %v1415_v49 = vld [vmem:[%s8116_s1 + $0x3f8] sm:$0xff] }
  0x88   : > { %1572 = vmatmul.mubr.f32.gmra.mxu0 %v6061_v60  ;;  %2123 = vmatprep.subr.mxu1 %v6111_v20 }
  0x89   : > { %1576 = vmatprep.mubr.f32.mxu0 %v5724_v57  ;;  %2124 = vmatpush1.msra.mxu1 %v1391_v30  ;;  %v6128_v57 = vld [vmem:[#allocation2 + $0xe0] sm:$0xff] }
  0x8a   : > { %1797 = vmatmul.mubr.f32.gmra.mxu1 %v6106_v15  ;;  %1924 = vmatprep.subr.mxu0 %v6111_v20  ;;  %v6204_v30 = vld [vmem:[#allocation2 + $0xfa] sm:$0xff] }
  0x8b   : > { %1801 = vmatprep.mubr.f32.mxu1 %v6109_v33  ;;  %2125 = vmatprep.subr.mxu1 %v6111_v20 }
  0x8c   : > { %1577 = vmatmul.mubr.f32.gmra.mxu0 %v6078_v44  ;;  %2126 = vmatpush1.msra.mxu1 %v1390_v2  ;;  %v6207_v2 = vld [vmem:[#allocation2 + $0x120] sm:$0xff] }
  0x8d   : > { %1581 = vmatprep.mubr.f32.mxu0 %v5727_v58  ;;  %1925 = vmatpush2.msra.mxu0 %v1378_v56  ;;  %v1388_v58 = vld [vmem:[%s8116_s1 + $0x320] sm:$0xff]  ;;  %v1374_v56 = vld [vmem:[%s8116_s1 + $0x2b0] sm:$0xff] }
  0x8e   : > { %1802 = vmatmul.mubr.f32.gmra.mxu1 %v6124_v34  ;;  %2127 = vmatprep.subr.mxu1 %v6111_v20 }
  0x8f   : > { %1806 = vmatprep.mubr.f32.mxu1 %v6128_v57  ;;  %2128 = vmatpush1.msra.mxu1 %v1389_v26  ;;  %v6220_v26 = vld [vmem:[#allocation2 + $0x10a] sm:$0xff] }
  0x90   : > { %1582 = vmatmul.mubr.f32.gmra.mxu0 %v6093_v11  ;;  %1926 = vmatprep.subr.mxu0 %v6111_v20 }
  0x91   : > { %1586 = vmatprep.mubr.f32.mxu0 %v5740_v61  ;;  %2129 = vmatprep.subr.mxu1 %v6111_v20  ;;  %v1386_v61 = vld [vmem:[%s8116_s1 + $0x310] sm:$0xff] }
  0x92   : > { %1807 = vmatmul.mubr.f32.gmra.mxu1 %v6137_v35  ;;  %1927 = vmatpush2.msra.mxu0 %v1377_v36  ;;  %v1413_v36 = vld [vmem:[%s8116_s1 + $0x3e8] sm:$0xff] }
  0x93   : > { %1811 = vmatprep.mubr.f32.mxu1 %v6143_v38  ;;  %2130 = vmatpush1.msra.mxu1 %v1388_v58  ;;  %v6233_v58 = vld [vmem:[#allocation2 + $0x112] sm:$0xff] }
  0x94   : > { %1587 = vmatmul.mubr.f32.gmra.mxu0 %v6109_v33  ;;  %2131 = vmatprep.subr.mxu1 %v6111_v20 }
  0x95   : > { %1591 = vmatprep.mubr.f32.mxu0 %v5744_v62  ;;  %2132 = vmatpush1.msra.mxu1 %v1387_v45  ;;  %v6176_v62 = vld [vmem:[#allocation2 + $0x108] sm:$0xff] }
  0x96   : > { %1812 = vmatmul.mubr.f32.gmra.mxu1 %v6156_v47  ;;  %1928 = vmatprep.subr.mxu0 %v6111_v20  ;;  %v1373_v45 = vld [vmem:[%s8116_s1 + $0x2a8] sm:$0xff] }
  0x97   : > { %1816 = vmatprep.mubr.f32.mxu1 %v6159_v52  ;;  %2133 = vmatprep.subr.mxu1 %v6111_v20 }
  0x98   : > { %1592 = vmatmul.mubr.f32.gmra.mxu0 %v6128_v57  ;;  %2134 = vmatpush1.msra.mxu1 %v1386_v61  ;;  %v6239_v61 = vld [vmem:[#allocation2 + $0x138] sm:$0xff] }
  0x99   : > { %1596 = vmatprep.mubr.f32.mxu0 %v5756_v1  ;;  %1929 = vmatpush2.msra.mxu0 %v1376_v40  ;;  %v1384_v1 = vld [vmem:[%s8116_s1 + $0x300] sm:$0xff]  ;;  %v1411_v40 = vld [vmem:[%s8116_s1 + $0x3d8] sm:$0xff] }
  0x9a   : > { %1817 = vmatmul.mubr.f32.gmra.mxu1 %v6172_v55  ;;  %2135 = vmatprep.subr.mxu1 %v6111_v20 }
  0x9b   : > { %1821 = vmatprep.mubr.f32.mxu1 %v6176_v62  ;;  %2136 = vmatpush1.msra.mxu1 %v1385_v43  ;;  %v6252_v43 = vld [vmem:[#allocation2 + $0x122] sm:$0xff] }
  0x9c   : > { %1597 = vmatmul.mubr.f32.gmra.mxu0 %v6143_v38  ;;  %1930 = vmatprep.subr.mxu0 %v6111_v20 }
  0x9d   : > { %1601 = vmatprep.mubr.f32.mxu0 %v5768_v5  ;;  %2137 = vmatprep.subr.mxu1 %v6111_v20  ;;  %v1414_v5 = vld [vmem:[%s8116_s1 + $0x3f0] sm:$0xff] }
  0x9e   : > { %1822 = vmatmul.mubr.f32.gmra.mxu1 %v6185_v25  ;;  %1931 = vmatpush2.msra.mxu0 %v1375_v28  ;;  %v6255_v28 = vld [vmem:[#allocation2 + $0x140] sm:$0xff] }
  0x9f   : > { %1826 = vmatprep.mubr.f32.mxu1 %v6191_v29  ;;  %2138 = vmatpush1.msra.mxu1 %v1384_v1  ;;  %v1372_v1 = vld [vmem:[%s8116_s1 + $0x2a0] sm:$0xff] }
  0xa0   : > { %1602 = vmatmul.mubr.f32.gmra.mxu0 %v6159_v52  ;;  %2139 = vmatprep.subr.mxu1 %v6111_v20 }
  0xa1   : > { %1606 = vmatprep.mubr.f32.mxu0 %v5772_v6  ;;  %2140 = vmatpush2.msra.mxu1 %v1415_v49  ;;  %v6224_v6 = vld [vmem:[#allocation2 + $0x128] sm:$0xff] }
  0xa2   : > { %1827 = vmatmul.mubr.f32.gmra.mxu1 %v6204_v30  ;;  %1932 = vmatprep.subr.mxu0 %v6111_v20  ;;  %v6268_v49 = vld [vmem:[#allocation2 + $0x12a] sm:$0xff] }
  0xa3   : > { %1831 = vmatprep.mubr.f32.mxu1 %v6207_v2  ;;  %2141 = vmatprep.subr.mxu1 %v6111_v20 }
  0xa4   : > { %1607 = vmatmul.mubr.f32.gmra.mxu0 %v6176_v62  ;;  %2142 = vmatpush2.msra.mxu1 %v1414_v5  ;;  %v1409_v5 = vld [vmem:[%s8116_s1 + $0x3c8] sm:$0xff] }
  0xa5   : > { %1611 = vmatprep.mubr.f32.mxu0 %v5800_v13  ;;  %1933 = vmatpush2.msra.mxu0 %v1374_v56  ;;  %v1412_v13 = vld [vmem:[%s8116_s1 + $0x3e0] sm:$0xff] }
  0xa6   : > { %1832 = vmatmul.mubr.f32.gmra.mxu1 %v6220_v26  ;;  %2143 = vmatprep.subr.mxu1 %v6111_v20  ;;  %v6281_v56 = vld [vmem:[#allocation2 + $0x13a] sm:$0xff] }
  0xa7   : > { %1836 = vmatprep.mubr.f32.mxu1 %v6224_v6  ;;  %2144 = vmatpush2.msra.mxu1 %v1413_v36  ;;  %v1371_v36 = vld [vmem:[%s8116_s1 + $0x298] sm:$0xff] }
  0xa8   : > { %1612 = vmatmul.mubr.f32.gmra.mxu0 %v6191_v29  ;;  %1934 = vmatprep.subr.mxu0 %v6111_v20 }
  0xa9   : > { %1616 = vmatprep.mubr.f32.mxu0 %v5812_v16  ;;  %2145 = vmatprep.subr.mxu1 %v6111_v20  ;;  %v1410_v16 = vld [vmem:[%s8116_s1 + $0x3d0] sm:$0xff] }
  0xaa   : > { %1837 = vmatmul.mubr.f32.gmra.mxu1 %v6233_v58  ;;  %1935 = vmatpush2.msra.mxu0 %v1373_v45  ;;  %v6287_v45 = vld [vmem:[#allocation2 + $0x158] sm:$0xff] }
  0xab   : > { %1841 = vmatprep.mubr.f32.mxu1 %v6239_v61  ;;  %2146 = vmatpush2.msra.mxu1 %v1412_v13  ;;  %8128 = vst [vmem:[#allocation5_spill] sm:$0xff] %v6287_v45  ;;  %v1407_v13 = vld [vmem:[%s8116_s1 + $0x3b8] sm:$0xff] }
  0xac   : > { %1617 = vmatmul.mubr.f32.gmra.mxu0 %v6207_v2  ;;  %2147 = vmatprep.subr.mxu1 %v6111_v20 }
  0xad   : > { %1621 = vmatprep.mubr.f32.mxu0 %v5824_v19  ;;  %2148 = vmatpush2.msra.mxu1 %v1411_v40  ;;  %v6272_v19 = vld [vmem:[#allocation2 + $0x150] sm:$0xff]  ;;  %v6300_v40 = vld [vmem:[#allocation2 + $0x142] sm:$0xff] }
  0xae   : > { %1842 = vmatmul.mubr.f32.gmra.mxu1 %v6252_v43  ;;  %1936 = vmatprep.subr.mxu0 %v6111_v20 }
  0xaf   : > { %1846 = vmatprep.mubr.f32.mxu1 %v6255_v28  ;;  %2149 = vmatprep.subr.mxu1 %v6111_v20 }
  0xb0   : > { %1622 = vmatmul.mubr.f32.gmra.mxu0 %v6224_v6  ;;  %2150 = vmatpush2.msra.mxu1 %v1410_v16  ;;  %v6303_v16 = vld [vmem:[#allocation2 + $0x168] sm:$0xff] }
  0xb1   : > { %1626 = vmatprep.mubr.f32.mxu0 %v5836_v22  ;;  %1937 = vmatpush2.msra.mxu0 %v1372_v1  ;;  %v1408_v22 = vld [vmem:[%s8116_s1 + $0x3c0] sm:$0xff]  ;;  %v1370_v1 = vld [vmem:[%s8116_s1 + $0x290] sm:$0xff] }
  0xb2   : > { %1847 = vmatmul.mubr.f32.gmra.mxu1 %v6268_v49  ;;  %2151 = vmatprep.subr.mxu1 %v6111_v20 }
  0xb3   : > { %1851 = vmatprep.mubr.f32.mxu1 %v6272_v19  ;;  %2152 = vmatpush2.msra.mxu1 %v1409_v5  ;;  %v6316_v5 = vld [vmem:[#allocation2 + $0x152] sm:$0xff] }
  0xb4   : > { %1627 = vmatmul.mubr.f32.gmra.mxu0 %v6239_v61  ;;  %1938 = vmatprep.subr.mxu0 %v6111_v20 }
  0xb5   : > { %1631 = vmatprep.mubr.f32.mxu0 %v5840_v23  ;;  %2153 = vmatprep.subr.mxu1 %v6111_v20  ;;  %v1406_v23 = vld [vmem:[%s8116_s1 + $0x3b0] sm:$0xff] }
  0xb6   : > { %1852 = vmatmul.mubr.f32.gmra.mxu1 %v6281_v56  ;;  %1939 = vmatpush2.msra.mxu0 %v1371_v36  ;;  %v1405_v36 = vld [vmem:[%s8116_s1 + $0x3a8] sm:$0xff] }
  0xb7   : > { %1856 = vmatprep.mubr.f32.mxu1 %v6287_v45  ;;  %2154 = vmatpush2.msra.mxu1 %v1408_v22  ;;  %v6329_v22 = vld [vmem:[#allocation2 + $0x15a] sm:$0xff] }
  0xb8   : > { %1632 = vmatmul.mubr.f32.gmra.mxu0 %v6255_v28  ;;  %2155 = vmatprep.subr.mxu1 %v6111_v20 }
  0xb9   : > { %1636 = vmatprep.mubr.f32.mxu0 %v5857_v32  ;;  %2156 = vmatpush2.msra.mxu1 %v1407_v13  ;;  %v6320_v32 = vld [vmem:[#allocation2 + $0x170] sm:$0xff]  ;;  %v1369_v13 = vld [vmem:[%s8116_s1 + $0x288] sm:$0xff] }
  0xba   : > { %1857 = vmatmul.mubr.f32.gmra.mxu1 %v6300_v40  ;;  %1940 = vmatprep.subr.mxu0 %v6111_v20 }
  0xbb   : > { %1861 = vmatprep.mubr.f32.mxu1 %v6303_v16  ;;  %2157 = vmatprep.subr.mxu1 %v6111_v20 }
  0xbc   : > { %1637 = vmatmul.mubr.f32.gmra.mxu0 %v6272_v19  ;;  %2158 = vmatpush2.msra.mxu1 %v1406_v23  ;;  %v6335_v23 = vld [vmem:[#allocation2 + $0x180] sm:$0xff] }
  0xbd   : > { %1641 = vmatprep.mubr.f32.mxu0 %v5864_v37  ;;  %1941 = vmatpush2.msra.mxu0 %v1370_v1  ;;  %8129 = vst [vmem:[#allocation6_spill] sm:$0xff] %v6335_v23  ;;  %v1404_v37 = vld [vmem:[%s8116_s1 + $0x3a0] sm:$0xff]  ;;  %v1403_v1 = vld [vmem:[%s8116_s1 + $0x398] sm:$0xff] }
  0xbe   : > { %1862 = vmatmul.mubr.f32.gmra.mxu1 %v6316_v5  ;;  %2159 = vmatprep.subr.mxu1 %v6111_v20 }
  0xbf   : > { %1866 = vmatprep.mubr.f32.mxu1 %v6320_v32  ;;  %2160 = vmatpush2.msra.mxu1 %v1405_v36  ;;  %v6348_v36 = vld [vmem:[#allocation2 + $0x16a] sm:$0xff] }
  0xc0   : > { %1642 = vmatmul.mubr.f32.gmra.mxu0 %v6287_v45  ;;  %1942 = vmatprep.subr.mxu0 %v6111_v20  ;;  %v6352_v45 = vld [vmem:[#allocation2 + $0x188] sm:$0xff] }
  0xc1   : > { %1646 = vmatprep.mubr.f32.mxu0 %v5874_v48  ;;  %2161 = vmatprep.subr.mxu1 %v6111_v20  ;;  %8130 = vst [vmem:[#allocation7_spill] sm:$0xff] %v6352_v45  ;;  %v1402_v48 = vld [vmem:[%s8116_s1 + $0x390] sm:$0xff] }
  0xc2   : > { %1867 = vmatmul.mubr.f32.gmra.mxu1 %v6329_v22  ;;  %1943 = vmatpush2.msra.mxu0 %v1369_v13  ;;  %v1368_v13 = vld [vmem:[%s8116_s1 + $0x280] sm:$0xff] }
  0xc3   : > { %1871 = vmatprep.mubr.f32.mxu1 %v6335_v23  ;;  %2162 = vmatpush2.msra.mxu1 %v1404_v37  ;;  %v6365_v37 = vld [vmem:[#allocation2 + $0x172] sm:$0xff] }
  0xc4   : > { %1647 = vmatmul.mubr.f32.gmra.mxu0 %v6303_v16  ;;  %2163 = vmatprep.subr.mxu1 %v6111_v20  ;;  %v5314_v23 = vld [vmem:[#allocation2 + $0x31] sm:$0xff] }
  0xc5   : > { %1651 = vmatprep.mubr.f32.mxu0 %v5882_v51  ;;  %2164 = vmatpush2.msra.mxu1 %v1403_v1  ;;  %v1401_v51 = vld [vmem:[%s8116_s1 + $0x388] sm:$0xff]  ;;  %v1431_v1 = vld [vmem:[%s8116_s1 + $0x478] sm:$0xff] }
  0xc6   : > { %1872 = vmatmul.mubr.f32.gmra.mxu1 %v6348_v36  ;;  %1944 = vmatprep.subr.mxu0 %v6111_v20 }
  0xc7   : > { %1876 = vmatprep.mubr.f32.mxu1 %v6352_v45  ;;  %2165 = vmatprep.subr.mxu1 %v6111_v20  ;;  %v1400_v45 = vld [vmem:[%s8116_s1 + $0x380] sm:$0xff] }
  0xc8   : > { %1652 = vmatmul.mubr.f32.gmra.mxu0 %v6320_v32  ;;  %2166 = vmatpush2.msra.mxu1 %v1402_v48  ;;  %v5313_v48 = vld [vmem:[#allocation2 + $0x19] sm:$0xff] }
  0xc9   : > { %1945 = vmatpush2.msra.mxu0 %v1368_v13  ;;  %2167 = vmatprep.subr.mxu1 %v6111_v20  ;;  %v1430_v13 = vld [vmem:[%s8116_s1 + $0x470] sm:$0xff] }
  0xca   : > { %1877 = vmatmul.mubr.f32.gmra.mxu1 %v6365_v37  ;;  %1946 = vmatprep.mubr.f32.mxu0 %v5900_v63  ;;  %v5315_v63 = vld [vmem:[#allocation2 + $0x39] sm:$0xff] }
  0xcb   : > { %2168 = vmatpush2.msra.mxu1 %v1401_v51  ;;  %5143 = vmatprep.subr.mxu0 %v1431_v1  ;;  %v1429_v51 = vld [vmem:[%s8116_s1 + $0x468] sm:$0xff] }
  0xcc   : > { %1947 = vmatmul.mubr.f32.vlgmr.msra.gmra.mxu0 %v5313_v48  ;;  %2169 = vmatprep.subr.mxu1 %v6111_v20  ;;  %v5316_v48 = vld [vmem:[#allocation2 + $0x21] sm:$0xff] }
  0xcd   : > { %2170 = vmatpush2.msra.mxu1 %v1400_v45  ;;  %2171 = vmatprep.mubr.f32.mxu1 %v5314_v23  ;;  %v1428_v45 = vld [vmem:[%s8116_s1 + $0x460] sm:$0xff] }
  0xce   : > { %5144 = vmatpush3.msra.mxu0 %v1431_v1  ;;  %2172 = vmatmul.mubr.f32.vlgmr.msra.gmra.mxu1 %v5887_v53  ;;  %v5317_v53 = vld [vmem:[#allocation2 + $0x49] sm:$0xff] }
  0xcf   : > { %1951 = vmatprep.mubr.f32.mxu0 %v5915_v4  ;;  %2176 = vmatprep.mubr.f32.mxu1 %v5315_v63  ;;  %v1427_v4 = vld [vmem:[%s8116_s1 + $0x458] sm:$0xff]  ;;  %v1425_v1 = vld [vmem:[%s8116_s1 + $0x448] sm:$0xff] }
  0xd0   : > { %1952 = vmatmul.mubr.f32.gmra.mxu0 %v5316_v48  ;;  %5145 = vmatprep.subr.mxu0 %v1430_v13 }
  0xd1   : > { %1956 = vmatprep.mubr.f32.mxu0 %v5930_v9  ;;  %5146 = vmatpush3.msra.mxu0 %v1430_v13  ;;  %v1426_v9 = vld [vmem:[%s8116_s1 + $0x450] sm:$0xff]  ;;  %v1421_v13 = vld [vmem:[%s8116_s1 + $0x428] sm:$0xff] }
  0xd2   : > { %2177 = vmatmul.mubr.f32.gmra.mxu1 %v5902_v0  ;;  %5147 = vmatprep.subr.mxu0 %v1429_v51  ;;  %v5318_v0 = vld [vmem:[#allocation2 + $0x51] sm:$0xff] }
  0xd3   : > { %2181 = vmatprep.mubr.f32.mxu1 %v5317_v53  ;;  %5148 = vmatpush3.msra.mxu0 %v1429_v51  ;;  %v1417_v51 = vld [vmem:[%s8116_s1 + $0x408] sm:$0xff] }
  0xd4   : > { %1957 = vmatmul.mubr.f32.gmra.mxu0 %v5314_v23  ;;  %5149 = vmatprep.subr.mxu0 %v1428_v45  ;;  %v1423_v23 = vld [vmem:[%s8116_s1 + $0x438] sm:$0xff] }
  0xd5   : > { %1961 = vmatprep.mubr.f32.mxu0 %v5946_v12  ;;  %5150 = vmatpush3.msra.mxu0 %v1428_v45  ;;  %v1424_v12 = vld [vmem:[%s8116_s1 + $0x440] sm:$0xff] }
  0xd6   : > { %2182 = vmatmul.mubr.f32.gmra.mxu1 %v5917_v7  ;;  %5151 = vmatprep.subr.mxu0 %v1427_v4  ;;  %v5319_v7 = vld [vmem:[#allocation2 + $0x61] sm:$0xff] }
  0xd7   : > { %2186 = vmatprep.mubr.f32.mxu1 %v5318_v0  ;;  %5152 = vmatpush3.msra.mxu0 %v1427_v4 }
  0xd8   : > { %1962 = vmatmul.mubr.f32.gmra.mxu0 %v5315_v63  ;;  %5153 = vmatprep.subr.mxu0 %v1426_v9  ;;  %v1419_v63 = vld [vmem:[%s8116_s1 + $0x418] sm:$0xff] }
  0xd9   : > { %1966 = vmatprep.mubr.f32.mxu0 %v5962_v17  ;;  %5154 = vmatpush3.msra.mxu0 %v1426_v9  ;;  %v1422_v17 = vld [vmem:[%s8116_s1 + $0x430] sm:$0xff] }
  0xda   : > { %2187 = vmatmul.mubr.f32.gmra.mxu1 %v5933_v10  ;;  %5155 = vmatprep.subr.mxu0 %v1425_v1  ;;  %v5320_v10 = vld [vmem:[#allocation2 + $0x69] sm:$0xff] }
  0xdb   : > { %2191 = vmatprep.mubr.f32.mxu1 %v5319_v7  ;;  %5156 = vmatpush3.msra.mxu0 %v1425_v1 }
  0xdc   : > { %1967 = vmatmul.mubr.f32.gmra.mxu0 %v5317_v53  ;;  %5157 = vmatprep.subr.mxu0 %v1424_v12 }
  0xdd   : > { %1971 = vmatprep.mubr.f32.mxu0 %v5978_v21  ;;  %5158 = vmatpush3.msra.mxu0 %v1424_v12  ;;  %v1420_v21 = vld [vmem:[%s8116_s1 + $0x420] sm:$0xff] }
  0xde   : > { %2192 = vmatmul.mubr.f32.gmra.mxu1 %v5949_v14  ;;  %5159 = vmatprep.subr.mxu0 %v1423_v23  ;;  %v5321_v14 = vld [vmem:[#allocation2 + $0x79] sm:$0xff] }
  0xdf   : > { %2196 = vmatprep.mubr.f32.mxu1 %v5320_v10  ;;  %5160 = vmatpush3.msra.mxu0 %v1423_v23 }
  0xe0   : > { %1972 = vmatmul.mubr.f32.gmra.mxu0 %v5318_v0  ;;  %5161 = vmatprep.subr.mxu0 %v1422_v17 }
  0xe1   : > { %1976 = vmatprep.mubr.f32.mxu0 %v5994_v27  ;;  %5162 = vmatpush3.msra.mxu0 %v1422_v17  ;;  %v1418_v27 = vld [vmem:[%s8116_s1 + $0x410] sm:$0xff] }
  0xe2   : > { %2197 = vmatmul.mubr.f32.gmra.mxu1 %v5965_v18  ;;  %5163 = vmatprep.subr.mxu0 %v1421_v13  ;;  %v5322_v18 = vld [vmem:[#allocation2 + $0x81] sm:$0xff] }
  0xe3   : > { %2201 = vmatprep.mubr.f32.mxu1 %v5321_v14  ;;  %5164 = vmatpush3.msra.mxu0 %v1421_v13  ;;  %v5336_v13 = vld [vmem:[#allocation2 + $0x129] sm:$0xff] }
  0xe4   : > { %1977 = vmatmul.mubr.f32.gmra.mxu0 %v5319_v7  ;;  %5165 = vmatprep.subr.mxu0 %v1420_v21 }
  0xe5   : > { %1981 = vmatprep.mubr.f32.mxu0 %v6010_v41  ;;  %5166 = vmatpush3.msra.mxu0 %v1420_v21  ;;  %v1416_v41 = vld [vmem:[%s8116_s1 + $0x400] sm:$0xff] }
  0xe6   : > { %2202 = vmatmul.mubr.f32.gmra.mxu1 %v5981_v24  ;;  %5167 = vmatprep.subr.mxu0 %v1419_v63  ;;  %v5323_v24 = vld [vmem:[#allocation2 + $0x91] sm:$0xff] }
  0xe7   : > { %2206 = vmatprep.mubr.f32.mxu1 %v5322_v18  ;;  %5168 = vmatpush3.msra.mxu0 %v1419_v63 }
  0xe8   : > { %1982 = vmatmul.mubr.f32.gmra.mxu0 %v5320_v10  ;;  %5169 = vmatprep.subr.mxu0 %v1418_v27 }
  0xe9   : > { %1986 = vmatprep.mubr.f32.mxu0 %v6026_v46  ;;  %5170 = vmatpush3.msra.mxu0 %v1418_v27  ;;  %v5324_v46 = vld [vmem:[#allocation2 + $0x99] sm:$0xff] }
  0xea   : > { %2207 = vmatmul.mubr.f32.gmra.mxu1 %v5997_v31  ;;  %5171 = vmatprep.subr.mxu0 %v1417_v51  ;;  %v5325_v31 = vld [vmem:[#allocation2 + $0xa9] sm:$0xff] }
  0xeb   : > { %2211 = vmatprep.mubr.f32.mxu1 %v5323_v24  ;;  %5172 = vmatpush3.msra.mxu0 %v1417_v51 }
  0xec   : > { %1987 = vmatmul.mubr.f32.gmra.mxu0 %v5321_v14  ;;  %5173 = vmatprep.subr.mxu0 %v1416_v41 }
  0xed   : > { %1991 = vmatprep.mubr.f32.mxu0 %v6039_v50  ;;  %5174 = vmatpush3.msra.mxu0 %v1416_v41  ;;  %v5326_v50 = vld [vmem:[#allocation2 + $0xb1] sm:$0xff] }
  0xee   : > { %2212 = vmatmul.mubr.f32.gmra.mxu1 %v6013_v42  ;;  %3708 = vmatprep.subr.mxu1 %v6111_v20  ;;  %v5327_v42 = vld [vmem:[#allocation2 + $0xc1] sm:$0xff] }
  0xef   : > { %2216 = vmatprep.mubr.f32.mxu1 %v5324_v46  ;;  %3933 = vmatprep.subr.mxu0 %v6111_v20 }
  0xf0   : > { %1992 = vmatmul.mubr.f32.gmra.mxu0 %v5322_v18  ;;  %v5337_v18 = vld [vmem:[#allocation2 + $0x139] sm:$0xff] }
  0xf1   : > { %1996 = vmatprep.mubr.f32.mxu0 %v6058_v59  ;;  %v5330_v59 = vld [vmem:[#allocation2 + $0xe1] sm:$0xff] }
  0xf2   : > { %2217 = vmatmul.mubr.f32.gmra.mxu1 %v6030_v39  ;;  %v5328_v39 = vld [vmem:[#allocation2 + $0xc9] sm:$0xff] }
  0xf3   : > { %2221 = vmatprep.mubr.f32.mxu1 %v5325_v31 }
  0xf4   : > { %1997 = vmatmul.mubr.f32.gmra.mxu0 %v5323_v24 }
  0xf5   : > { %2001 = vmatprep.mubr.f32.mxu0 %v6074_v3 }
  0xf6   : > { %2222 = vmatmul.mubr.f32.gmra.mxu1 %v6045_v54  ;;  %v5329_v54 = vld [vmem:[#allocation2 + $0xd9] sm:$0xff] }
  0xf7   : > { %2226 = vmatprep.mubr.f32.mxu1 %v5326_v50 }
  0xf8   : > { %2002 = vmatmul.mubr.f32.gmra.mxu0 %v5324_v46 }
  0xf9   : > { %2006 = vmatprep.mubr.f32.mxu0 %v6087_v8 }
  0xfa   : > { %2227 = vmatmul.mubr.f32.gmra.mxu1 %v6061_v60  ;;  %v5331_v60 = vld [vmem:[#allocation2 + $0xf1] sm:$0xff] }
  0xfb   : > { %2231 = vmatprep.mubr.f32.mxu1 %v5327_v42 }
  0xfc   : > { %2007 = vmatmul.mubr.f32.gmra.mxu0 %v5325_v31  ;;  %v5338_v31 = vld [vmem:[#allocation2 + $0x141] sm:$0xff] }
  0xfd   : > { %2011 = vmatprep.mubr.f32.mxu0 %v6106_v15  ;;  %v5332_v15 = vld [vmem:[#allocation2 + $0xf9] sm:$0xff] }
  0xfe   : > { %2232 = vmatmul.mubr.f32.gmra.mxu1 %v6078_v44 }
  0xff   : > { %2236 = vmatprep.mubr.f32.mxu1 %v5328_v39 }
 0x100   : > { %2012 = vmatmul.mubr.f32.gmra.mxu0 %v5326_v50 }
 0x101   : > { %2016 = vmatprep.mubr.f32.mxu0 %v6124_v34 }
 0x102   : > { %2237 = vmatmul.mubr.f32.gmra.mxu1 %v6093_v11 }
 0x103   : > { %2241 = vmatprep.mubr.f32.mxu1 %v5329_v54 }
 0x104   : > { %2017 = vmatmul.mubr.f32.gmra.mxu0 %v5327_v42 }
 0x105   : > { %2021 = vmatprep.mubr.f32.mxu0 %v6137_v35 }
 0x106   : > { %2242 = vmatmul.mubr.f32.gmra.mxu1 %v6109_v33 }
 0x107   : > { %2246 = vmatprep.mubr.f32.mxu1 %v5330_v59 }
 0x108   : > { %2022 = vmatmul.mubr.f32.gmra.mxu0 %v5328_v39 }
 0x109   : > { %2026 = vmatprep.mubr.f32.mxu0 %v6156_v47 }
 0x10a   : > { %2247 = vmatmul.mubr.f32.gmra.mxu1 %v6128_v57 }
 0x10b   : > { %2251 = vmatprep.mubr.f32.mxu1 %v5331_v60 }
 0x10c   : > { %v1498_v3 = vpop.f32.mrf.mxu0  ;;  %2027 = vmatmul.mubr.f32.gmra.mxu0 %v5329_v54 }
 0x10d   : > { %2031 = vmatprep.mubr.f32.mxu0 %v6172_v55  ;;  %v5333_v55 = vld [vmem:[#allocation2 + $0x109] sm:$0xff] }
 0x10e   : > { %v1723_v44 = vpop.f32.mrf.mxu1  ;;  %v1500_v8 = vpop.f32.mrf.mxu0  ;;  %2252 = vmatmul.mubr.f32.gmra.mxu1 %v6143_v38 }
 0x10f   : > { %v6462_v11 = vadd.f32 %v1723_v44, %v1498_v3  ;;  %2256 = vmatprep.mubr.f32.mxu1 %v5332_v15 }
 0x110   : > { %v1725_v33 = vpop.f32.mrf.mxu1  ;;  %v1503_v34 = vpop.f32.mrf.mxu0  ;;  %2032 = vmatmul.mubr.f32.gmra.mxu0 %v5330_v59  ;;  %v5339_v59 = vld [vmem:[#allocation2 + $0x151] sm:$0xff] }
 0x111   : > { %2036 = vmatprep.mubr.f32.mxu0 %v6185_v25  ;;  %v5334_v25 = vld [vmem:[#allocation2 + $0x111] sm:$0xff] }
 0x112   : > { %v1728_v57 = vpop.f32.mrf.mxu1  ;;  %v1505_v35 = vpop.f32.mrf.mxu0  ;;  %2257 = vmatmul.mubr.f32.gmra.mxu1 %v6159_v52  ;;  %v3579_v52 = vld [vmem:[%s8119_s4 + $0x78] sm:$0xff] }
 0x113   : > { %v6466_v47 = vadd.f32 %v1728_v57, %v1503_v34  ;;  %2261 = vmatprep.mubr.f32.mxu1 %v5333_v55  ;;  %3709 = vmatpush1.msra.mxu1 %v3579_v52 }
 0x114   : > { %v1730_v48 = vpop.f32.mrf.mxu1  ;;  %v1508_v45 = vpop.f32.mrf.mxu0  ;;  %2037 = vmatmul.mubr.f32.gmra.mxu0 %v5331_v60  ;;  %3710 = vmatprep.subr.mxu1 %v6111_v20 }
 0x115   : > { %2041 = vmatprep.mubr.f32.mxu0 %v6204_v30  ;;  %v5341_v48 = vld [vmem:[#allocation2 + $0x169] sm:$0xff] }
 0x116   : > { %v1733_v38 = vpop.f32.mrf.mxu1  ;;  %v1510_v53 = vpop.f32.mrf.mxu0  ;;  %2262 = vmatmul.mubr.f32.gmra.mxu1 %v6176_v62  ;;  %v5335_v62 = vld [vmem:[#allocation2 + $0x121] sm:$0xff] }
 0x117   : > { %v6470_v4 = vadd.f32 %v1733_v38, %v1508_v45  ;;  %2266 = vmatprep.mubr.f32.mxu1 %v5334_v25 }
 0x118   : > { %v1735_v9 = vpop.f32.mrf.mxu1  ;;  %v1513_v0 = vpop.f32.mrf.mxu0  ;;  %2042 = vmatmul.mubr.f32.gmra.mxu0 %v5332_v15  ;;  %v5340_v15 = vld [vmem:[#allocation2 + $0x159] sm:$0xff] }
 0x119   : > { %2046 = vmatprep.mubr.f32.mxu0 %v6220_v26  ;;  %v3578_v26 = vld [vmem:[%s8119_s4 + $0x70] sm:$0xff] }
 0x11a   : > { %v1738_v1 = vpop.f32.mrf.mxu1  ;;  %v1515_v12 = vpop.f32.mrf.mxu0  ;;  %2267 = vmatmul.mubr.f32.gmra.mxu1 %v6191_v29 }
 0x11b   : > { %v6477_v30 = vadd.f32 %v1738_v1, %v1513_v0  ;;  %2271 = vmatprep.mubr.f32.mxu1 %v5335_v62  ;;  %3711 = vmatpush1.msra.mxu1 %v3578_v26  ;;  %v5342_v0 = vld [vmem:[#allocation2 + $0x171] sm:$0xff] }
 0x11c   : > { %v1740_v7 = vpop.f32.mrf.mxu1  ;;  %v1518_v23 = vpop.f32.mrf.mxu0  ;;  %2047 = vmatmul.mubr.f32.gmra.mxu0 %v5333_v55  ;;  %3712 = vmatprep.subr.mxu1 %v6111_v20  ;;  %v8131_v55 = vld [vmem:[#allocation5_spill] sm:$0xff] }
 0x11d   : > { %2051 = vmatprep.mubr.f32.mxu0 %v6233_v58  ;;  %v3577_v58 = vld [vmem:[%s8119_s4 + $0x68] sm:$0xff] }
 0x11e   : > { %v1743_v17 = vpop.f32.mrf.mxu1  ;;  %v1520_v10 = vpop.f32.mrf.mxu0  ;;  %2272 = vmatmul.mubr.f32.gmra.mxu1 %v6207_v2  ;;  %v5343_v7 = vld [vmem:[#allocation2 + $0x181] sm:$0xff] }
 0x11f   : > { %v6485_v29 = vadd.f32 %v1743_v17, %v1518_v23  ;;  %2276 = vmatprep.mubr.f32.mxu1 %v5336_v13  ;;  %3713 = vmatpush1.msra.mxu1 %v3577_v58 }
 0x120   : > { %v1745_v21 = vpop.f32.mrf.mxu1  ;;  %v1523_v14 = vpop.f32.mrf.mxu0  ;;  %2052 = vmatmul.mubr.f32.gmra.mxu0 %v5334_v25  ;;  %3714 = vmatprep.subr.mxu1 %v6111_v20 }
 0x121   : > { %2056 = vmatprep.mubr.f32.mxu0 %v6252_v43  ;;  %v3576_v43 = vld [vmem:[%s8119_s4 + $0x60] sm:$0xff] }
 0x122   : > { %v1748_v63 = vpop.f32.mrf.mxu1  ;;  %v1525_v27 = vpop.f32.mrf.mxu0  ;;  %2277 = vmatmul.mubr.f32.gmra.mxu1 %v6224_v6 }
 0x123   : > { %v6493_v2 = vadd.f32 %v1748_v63, %v1523_v14  ;;  %2281 = vmatprep.mubr.f32.mxu1 %v5337_v18  ;;  %3715 = vmatpush1.msra.mxu1 %v3576_v43  ;;  %v5344_v14 = vld [vmem:[#allocation2 + $0x189] sm:$0xff]  ;;  %v902_v27 = vld [vmem:[#allocation2 + $0x199] sm:$0xff] }
 0x124   : > { %v1750_v51 = vpop.f32.mrf.mxu1  ;;  %v1528_v41 = vpop.f32.mrf.mxu0  ;;  %2057 = vmatmul.mubr.f32.gmra.mxu0 %v5335_v62  ;;  %3716 = vmatprep.subr.mxu1 %v6111_v20  ;;  %v6559_v43 = vld [vmem:[#allocation2 + $0x18a] sm:$0xff] }
 0x125   : > { %2061 = vmatprep.mubr.f32.mxu0 %v6268_v49  ;;  %v3575_v49 = vld [vmem:[%s8119_s4 + $0x58] sm:$0xff] }
 0x126   : > { %v1753_v24 = vpop.f32.mrf.mxu1  ;;  %v1530_v46 = vpop.f32.mrf.mxu0  ;;  %2282 = vmatmul.mubr.f32.gmra.mxu1 %v6239_v61 }
 0x127   : > { %v6501_v6 = vadd.f32 %v1753_v24, %v1528_v41  ;;  %2286 = vmatprep.mubr.f32.mxu1 %v5338_v31  ;;  %3717 = vmatpush1.msra.mxu1 %v3575_v49  ;;  %v8133_v41 = vld [vmem:[#allocation7_spill] sm:$0xff] }
 0x128   : > { %v1755_v50 = vpop.f32.mrf.mxu1  ;;  %v1533_v42 = vpop.f32.mrf.mxu0  ;;  %2062 = vmatmul.mubr.f32.gmra.mxu0 %v5336_v13  ;;  %3718 = vmatprep.subr.mxu1 %v6111_v20  ;;  %v8132_v13 = vld [vmem:[#allocation6_spill] sm:$0xff] }
 0x129   : > { %2066 = vmatprep.mubr.f32.mxu0 %v6281_v56  ;;  %v3574_v56 = vld [vmem:[%s8119_s4 + $0x50] sm:$0xff]  ;;  %v903_v50 = vld [vmem:[#allocation2 + $0x1a1] sm:$0xff] }
 0x12a   : > { %v1758_v39 = vpop.f32.mrf.mxu1  ;;  %v1535_v54 = vpop.f32.mrf.mxu0  ;;  %2287 = vmatmul.mubr.f32.gmra.mxu1 %v6255_v28 }
 0x12b   : > { %v6509_v61 = vadd.f32 %v1758_v39, %v1533_v42  ;;  %2291 = vmatprep.mubr.f32.mxu1 %v5339_v59  ;;  %3719 = vmatpush1.msra.mxu1 %v3574_v56  ;;  %v3568_v42 = vld [vmem:[%s8119_s4 + $0x20] sm:$0xff]  ;;  %v936_v54 = vld [vmem:[#allocation2 + $0x32] sm:$0xff] }
 0x12c   : > { %v1760_v60 = vpop.f32.mrf.mxu1  ;;  %v1538_v3 = vpop.f32.mrf.mxu0  ;;  %2067 = vmatmul.mubr.f32.gmra.mxu0 %v5337_v18  ;;  %3720 = vmatprep.subr.mxu1 %v6111_v20  ;;  %v937_v56 = vld [vmem:[#allocation2 + $0x3a] sm:$0xff] }
 0x12d   : > { %2071 = vmatprep.mubr.f32.mxu0 %v6300_v40  ;;  %v3573_v40 = vld [vmem:[%s8119_s4 + $0x48] sm:$0xff] }
 0x12e   : > { %v1763_v44 = vpop.f32.mrf.mxu1  ;;  %v1540_v8 = vpop.f32.mrf.mxu0  ;;  %2292 = vmatmul.mubr.f32.gmra.mxu1 %v6272_v19 }
 0x12f   : > { %v6517_v28 = vadd.f32 %v1763_v44, %v1538_v3  ;;  %2296 = vmatprep.mubr.f32.mxu1 %v5340_v15  ;;  %3721 = vmatpush1.msra.mxu1 %v3573_v40  ;;  %v3567_v44 = vld [vmem:[%s8119_s4 + $0x18] sm:$0xff] }
 0x130   : > { %v1765_v33 = vpop.f32.mrf.mxu1  ;;  %v1543_v34 = vpop.f32.mrf.mxu0  ;;  %2072 = vmatmul.mubr.f32.gmra.mxu0 %v5338_v31  ;;  %3722 = vmatprep.subr.mxu1 %v6111_v20 }
 0x131   : > { %2076 = vmatprep.mubr.f32.mxu0 %v6316_v5  ;;  %v3572_v5 = vld [vmem:[%s8119_s4 + $0x40] sm:$0xff]  ;;  %v938_v33 = vld [vmem:[#allocation2 + $0x4a] sm:$0xff] }
 0x132   : > { %v1768_v57 = vpop.f32.mrf.mxu1  ;;  %v1545_v35 = vpop.f32.mrf.mxu0  ;;  %2297 = vmatmul.mubr.f32.gmra.mxu1 %v8131_v55  ;;  %v3566_v55 = vld [vmem:[%s8119_s4 + $0x10] sm:$0xff] }
 0x133   : > { %v6525_v19 = vadd.f32 %v1768_v57, %v1543_v34  ;;  %2301 = vmatprep.mubr.f32.mxu1 %v5341_v48  ;;  %3723 = vmatpush1.msra.mxu1 %v3572_v5  ;;  %v939_v35 = vld [vmem:[#allocation2 + $0x52] sm:$0xff] }
 0x134   : > { %v1770_v45 = vpop.f32.mrf.mxu1  ;;  %v1548_v38 = vpop.f32.mrf.mxu0  ;;  %2077 = vmatmul.mubr.f32.gmra.mxu0 %v5339_v59  ;;  %3724 = vmatprep.subr.mxu1 %v6111_v20 }
 0x135   : > { %2081 = vmatprep.mubr.f32.mxu0 %v6329_v22  ;;  %v3571_v22 = vld [vmem:[%s8119_s4 + $0x38] sm:$0xff] }
 0x136   : > { %v1773_v53 = vpop.f32.mrf.mxu1  ;;  %v1550_v25 = vpop.f32.mrf.mxu0  ;;  %2302 = vmatmul.mubr.f32.gmra.mxu1 %v6303_v16 }
 0x137   : > { %v6533_v9 = vadd.f32 %v1773_v53, %v1548_v38  ;;  %2306 = vmatprep.mubr.f32.mxu1 %v5342_v0  ;;  %3725 = vmatpush1.msra.mxu1 %v3571_v22  ;;  %v940_v38 = vld [vmem:[#allocation2 + $0x62] sm:$0xff] }
 0x138   : > { %v1775_v52 = vpop.f32.mrf.mxu1  ;;  %v1553_v1 = vpop.f32.mrf.mxu0  ;;  %2082 = vmatmul.mubr.f32.gmra.mxu0 %v5340_v15  ;;  %3726 = vmatprep.subr.mxu1 %v6111_v20  ;;  %v6584_v53 = vld [vmem:[#allocation2] sm:$0xff] }
 0x139   : > { %2086 = vmatprep.mubr.f32.mxu0 %v6348_v36  ;;  %v3570_v36 = vld [vmem:[%s8119_s4 + $0x30] sm:$0xff]  ;;  %v3565_v52 = vld [vmem:[%s8119_s4 + $0x8] sm:$0xff] }
 0x13a   : > { %v1778_v12 = vpop.f32.mrf.mxu1  ;;  %v1555_v62 = vpop.f32.mrf.mxu0  ;;  %2307 = vmatmul.mubr.f32.gmra.mxu1 %v6320_v32  ;;  %v6549_v32 = vld [vmem:[#allocation2 + $0x182] sm:$0xff] }
 0x13b   : > { %v6541_v16 = vadd.f32 %v1778_v12, %v1553_v1  ;;  %2311 = vmatprep.mubr.f32.mxu1 %v5343_v7  ;;  %3727 = vmatpush1.msra.mxu1 %v3570_v36  ;;  %v942_v12 = vld [vmem:[#allocation2 + $0x7a] sm:$0xff] }
 0x13c   : > { %v1780_v23 = vpop.f32.mrf.mxu1  ;;  %v1558_v26 = vpop.f32.mrf.mxu0  ;;  %2087 = vmatmul.mubr.f32.gmra.mxu0 %v5341_v48  ;;  %3728 = vmatprep.subr.mxu1 %v6111_v20  ;;  %v3564_v36 = vld [vmem:[%s8119_s4] sm:$0xff] }
 0x13d   : > { %2091 = vmatprep.mubr.f32.mxu0 %v6365_v37  ;;  %v3569_v37 = vld [vmem:[%s8119_s4 + $0x28] sm:$0xff] }
 0x13e   : > { %v1783_v17 = vpop.f32.mrf.mxu1  ;;  %v1560_v10 = vpop.f32.mrf.mxu0  ;;  %2312 = vmatmul.mubr.f32.gmra.mxu1 %v8132_v13  ;;  %v944_v13 = vld [vmem:[#allocation2 + $0x92] sm:$0xff] }
 0x13f   : > { %v6551_v21 = vadd.f32 %v1783_v17, %v1558_v26  ;;  %2316 = vmatprep.mubr.f32.mxu1 %v5344_v14  ;;  %3729 = vmatpush1.msra.mxu1 %v3569_v37  ;;  %v943_v26 = vld [vmem:[#allocation2 + $0x82] sm:$0xff]  ;;  %v3595_v37 = vld [vmem:[%s8119_s4 + $0xf8] sm:$0xff] }
 0x140   : > { %v1785_v58 = vpop.f32.mrf.mxu1  ;;  %v1563_v63 = vpop.f32.mrf.mxu0  ;;  %2092 = vmatmul.mubr.f32.gmra.mxu0 %v5342_v0  ;;  %3730 = vmatprep.subr.mxu1 %v6111_v20 }
 0x141   : > { %2096 = vmatprep.mubr.f32.mxu0 %v6549_v32  ;;  %3731 = vmatpush1.msra.mxu1 %v3568_v42  ;;  %v947_v42 = vld [vmem:[#allocation2 + $0xb2] sm:$0xff] }
 0x142   : > { %v1788_v18 = vpop.f32.mrf.mxu1  ;;  %v1565_v51 = vpop.f32.mrf.mxu0  ;;  %2317 = vmatmul.mubr.f32.gmra.mxu1 %v8133_v41  ;;  %3732 = vmatprep.subr.mxu1 %v6111_v20  ;;  %v946_v41 = vld [vmem:[#allocation2 + $0xaa] sm:$0xff] }
 0x143   : > { %v6561_v24 = vadd.f32 %v1788_v18, %v1563_v63  ;;  %2321 = vmatprep.mubr.f32.mxu1 %v902_v27  ;;  %3733 = vmatpush1.msra.mxu1 %v3567_v44  ;;  %v945_v27 = vld [vmem:[#allocation2 + $0x9a] sm:$0xff] }
 0x144   : > { %v1790_v46 = vpop.f32.mrf.mxu1  ;;  %v1568_v31 = vpop.f32.mrf.mxu0  ;;  %2097 = vmatmul.mubr.f32.gmra.mxu0 %v5343_v7  ;;  %3734 = vmatprep.subr.mxu1 %v6111_v20 }
 0x145   : > { %2101 = vmatprep.mubr.f32.mxu0 %v6559_v43  ;;  %3735 = vmatpush1.msra.mxu1 %v3566_v55 }
 0x146   : > { %v1793_v49 = vpop.f32.mrf.mxu1  ;;  %v1570_v39 = vpop.f32.mrf.mxu0  ;;  %2322 = vmatmul.mubr.f32.gmra.mxu1 %v6111_v20  ;;  %3736 = vmatprep.subr.mxu1 %v6584_v53 }
 0x147   : > { %v6569_v59 = vadd.f32 %v1793_v49, %v1568_v31  ;;  %2326 = vmatprep.mubr.f32.mxu1 %v903_v50  ;;  %3737 = vmatpush1.msra.mxu1 %v3565_v52  ;;  %v3594_v49 = vld [vmem:[%s8119_s4 + $0xf0] sm:$0xff] }
 0x148   : > { %v1795_v60 = vpop.f32.mrf.mxu1  ;;  %v1573_v3 = vpop.f32.mrf.mxu0  ;;  %2102 = vmatmul.mubr.f32.gmra.mxu0 %v5344_v14  ;;  %3738 = vmatprep.subr.mxu1 %v6584_v53 }
 0x149   : > { %5175 = vmatprep.mubr.f32.mxu0 %v936_v54  ;;  %3739 = vmatpush1.msra.mxu1 %v3564_v36  ;;  %v948_v60 = vld [vmem:[#allocation2 + $0xc2] sm:$0xff]  ;;  %v953_v36 = vld [vmem:[#allocation2 + $0xfa] sm:$0xff] }
 0x14a   : > { %v1798_v8 = vpop.f32.mrf.mxu1  ;;  %v1575_v15 = vpop.f32.mrf.mxu0  ;;  %2327 = vmatmul.mubr.f32.gmra.mxu1 %v6111_v20  ;;  %v941_v20 = vld [vmem:[#allocation2 + $0x6a] sm:$0xff]  ;;  %3740 = vmatprep.subr.mxu1 %v6584_v53 }
 0x14b   : > { %v6576_v34 = vadd.f32 %v1798_v8, %v1573_v3  ;;  %3741 = vmatpush2.msra.mxu1 %v3595_v37  ;;  %v949_v8 = vld [vmem:[#allocation2 + $0xca] sm:$0xff] }
 0x14c   : > { %v1800_v40 = vpop.f32.mrf.mxu1  ;;  %v1578_v57 = vpop.f32.mrf.mxu0  ;;  %5176 = vmatmul.mubr.f32.vlgmr.msra.gmra.mxu0 %v937_v56  ;;  %3742 = vmatprep.subr.mxu1 %v6584_v53  ;;  %v3593_v15 = vld [vmem:[%s8119_s4 + $0xe8] sm:$0xff]  ;;  %v3606_v37 = vld [vmem:[%s8119_s4 + $0x150] sm:$0xff] }
 0x14d   : > { %5178 = vmatprep.mubr.f32.mxu0 %v938_v33  ;;  %3743 = vmatpush2.msra.mxu1 %v3594_v49  ;;  %v3611_v33 = vld [vmem:[%s8119_s4 + $0x178] sm:$0xff] }
 0x14e   : > { %v1803_v48 = vpop.f32.mrf.mxu1  ;;  %v1580_v45 = vpop.f32.mrf.mxu0  ;;  %3744 = vmatprep.subr.mxu1 %v6584_v53  ;;  %3934 = vmatpush1.msra.mxu0 %v3611_v33  ;;  %v3603_v33 = vld [vmem:[%s8119_s4 + $0x138] sm:$0xff] }
 0x14f   : > { %v6582_v5 = vadd.f32 %v1803_v48, %v1578_v57  ;;  %3745 = vmatpush2.msra.mxu1 %v3593_v15  ;;  %3935 = vmatprep.subr.mxu0 %v6584_v53  ;;  %v3610_v48 = vld [vmem:[%s8119_s4 + $0x170] sm:$0xff]  ;;  %v3589_v15 = vld [vmem:[%s8119_s4 + $0xc8] sm:$0xff] }
 0x150   : > { %v1805_v25 = vpop.f32.mrf.mxu1  ;;  %v1583_v0 = vpop.f32.mrf.mxu0  ;;  %5179 = vmatmul.mubr.f32.gmra.mxu0 %v939_v35  ;;  %v950_v35 = vld [vmem:[#allocation2 + $0xda] sm:$0xff]  ;;  %3746 = vmatprep.subr.mxu1 %v6584_v53 }
 0x151   : > { %5181 = vmatprep.mubr.f32.mxu0 %v940_v38  ;;  %v951_v25 = vld [vmem:[#allocation2 + $0xe2] sm:$0xff]  ;;  %3936 = vmatpush1.msra.mxu0 %v3610_v48 }
 0x152   : > { %v1808_v1 = vpop.f32.mrf.mxu1  ;;  %v1585_v22 = vpop.f32.mrf.mxu0  ;;  %3937 = vmatprep.subr.mxu0 %v6584_v53 }
 0x153   : > { %v6590_v62 = vadd.f32 %v1808_v1, %v1583_v0  ;;  %v3592_v0 = vld [vmem:[%s8119_s4 + $0xe0] sm:$0xff]  ;;  %v952_v22 = vld [vmem:[#allocation2 + $0xf2] sm:$0xff] }
 0x154   : > { %v1810_v7 = vpop.f32.mrf.mxu1  ;;  %v1588_v23 = vpop.f32.mrf.mxu0  ;;  %5182 = vmatmul.mubr.f32.gmra.mxu0 %v941_v20  ;;  %v3609_v20 = vld [vmem:[%s8119_s4 + $0x168] sm:$0xff]  ;;  %3747 = vmatpush2.msra.mxu1 %v3592_v0 }
 0x155   : > { %5184 = vmatprep.mubr.f32.mxu0 %v942_v12  ;;  %3938 = vmatpush1.msra.mxu0 %v3609_v20  ;;  %v3608_v7 = vld [vmem:[%s8119_s4 + $0x160] sm:$0xff] }
 0x156   : > { %v1813_v17 = vpop.f32.mrf.mxu1  ;;  %v1590_v10 = vpop.f32.mrf.mxu0  ;;  %3748 = vmatprep.subr.mxu1 %v6584_v53  ;;  %3939 = vmatprep.subr.mxu0 %v6584_v53  ;;  %v959_v0 = vld [vmem:[#allocation2 + $0x142] sm:$0xff] }
 0x157   : > { %v6596_v14 = vadd.f32 %v1813_v17, %v1588_v23  ;;  %3940 = vmatpush1.msra.mxu0 %v3608_v7  ;;  %v3591_v17 = vld [vmem:[%s8119_s4 + $0xd8] sm:$0xff]  ;;  %v3588_v20 = vld [vmem:[%s8119_s4 + $0xc0] sm:$0xff] }
 0x158   : > { %v1815_v58 = vpop.f32.mrf.mxu1  ;;  %v1593_v63 = vpop.f32.mrf.mxu0  ;;  %5185 = vmatmul.mubr.f32.gmra.mxu0 %v943_v26  ;;  %v3607_v10 = vld [vmem:[%s8119_s4 + $0x158] sm:$0xff]  ;;  %3941 = vmatprep.subr.mxu0 %v6584_v53 }
 0x159   : > { %5187 = vmatprep.mubr.f32.mxu0 %v944_v13  ;;  %3749 = vmatpush2.msra.mxu1 %v3591_v17  ;;  %v960_v7 = vld [vmem:[#allocation2 + $0x152] sm:$0xff] }
 0x15a   : > { %v1818_v18 = vpop.f32.mrf.mxu1  ;;  %v1595_v51 = vpop.f32.mrf.mxu0  ;;  %3942 = vmatpush1.msra.mxu0 %v3607_v10  ;;  %3750 = vmatprep.subr.mxu1 %v6584_v53  ;;  %v961_v10 = vld [vmem:[#allocation2 + $0x15a] sm:$0xff] }
 0x15b   : > { %v6602_v46 = vadd.f32 %v1818_v18, %v1593_v63  ;;  %v954_v63 = vld [vmem:[#allocation2 + $0x10a] sm:$0xff]  ;;  %3943 = vmatprep.subr.mxu0 %v6584_v53 }
 0x15c   : > { %v1820_v31 = vpop.f32.mrf.mxu1  ;;  %v1598_v50 = vpop.f32.mrf.mxu0  ;;  %5188 = vmatmul.mubr.f32.gmra.mxu0 %v945_v27 }
 0x15d   : > { %5190 = vmatprep.mubr.f32.mxu0 %v946_v41  ;;  %v955_v41 = vld [vmem:[#allocation2 + $0x112] sm:$0xff]  ;;  %3944 = vmatpush1.msra.mxu0 %v3606_v37 }
 0x15e   : > { %v1823_v39 = vpop.f32.mrf.mxu1  ;;  %v1600_v54 = vpop.f32.mrf.mxu0  ;;  %v3590_v31 = vld [vmem:[%s8119_s4 + $0xd0] sm:$0xff]  ;;  %3945 = vmatprep.subr.mxu0 %v6584_v53 }
 0x15f   : > { %v6608_v3 = vadd.f32 %v1823_v39, %v1598_v50  ;;  %v3605_v50 = vld [vmem:[%s8119_s4 + $0x148] sm:$0xff]  ;;  %3751 = vmatpush2.msra.mxu1 %v3590_v31 }
 0x160   : > { %v1825_v56 = vpop.f32.mrf.mxu1  ;;  %v1603_v44 = vpop.f32.mrf.mxu0  ;;  %5191 = vmatmul.mubr.f32.gmra.mxu0 %v947_v42  ;;  %v956_v39 = vld [vmem:[#allocation2 + $0x122] sm:$0xff]  ;;  %3752 = vmatprep.subr.mxu1 %v6584_v53 }
 0x161   : > { %5193 = vmatprep.mubr.f32.mxu0 %v948_v60  ;;  %3946 = vmatpush1.msra.mxu0 %v3605_v50  ;;  %v3604_v60 = vld [vmem:[%s8119_s4 + $0x140] sm:$0xff] }
 0x162   : > { %v1828_v40 = vpop.f32.mrf.mxu1  ;;  %v1605_v57 = vpop.f32.mrf.mxu0  ;;  %3947 = vmatprep.subr.mxu0 %v6584_v53  ;;  %3753 = vmatpush2.msra.mxu1 %v3589_v15 }
 0x163   : > { %v6617_v55 = vadd.f32 %v1828_v40, %v1603_v44  ;;  %3948 = vmatpush1.msra.mxu0 %v3604_v60  ;;  %3754 = vmatprep.subr.mxu1 %v6584_v53 }
 0x164   : > { %v1830_v45 = vpop.f32.mrf.mxu1  ;;  %v1608_v38 = vpop.f32.mrf.mxu0  ;;  %5194 = vmatmul.mubr.f32.gmra.mxu0 %v949_v8  ;;  %v957_v8 = vld [vmem:[#allocation2 + $0x12a] sm:$0xff]  ;;  %3949 = vmatprep.subr.mxu0 %v6584_v53 }
 0x165   : > { %5196 = vmatprep.mubr.f32.mxu0 %v950_v35  ;;  %v958_v35 = vld [vmem:[#allocation2 + $0x13a] sm:$0xff]  ;;  %3950 = vmatpush1.msra.mxu0 %v3603_v33  ;;  %v3602_v45 = vld [vmem:[%s8119_s4 + $0x130] sm:$0xff] }
 0x166   : > { %v1833_v52 = vpop.f32.mrf.mxu1  ;;  %v1610_v1 = vpop.f32.mrf.mxu0  ;;  %3951 = vmatprep.subr.mxu0 %v6584_v53  ;;  %3755 = vmatpush2.msra.mxu1 %v3588_v20 }
 0x167   : > { %v6631_v12 = vadd.f32 %v1833_v52, %v1608_v38  ;;  %3952 = vmatpush1.msra.mxu0 %v3602_v45  ;;  %v3601_v52 = vld [vmem:[%s8119_s4 + $0x128] sm:$0xff]  ;;  %3756 = vmatprep.subr.mxu1 %v6584_v53 }
 0x168   : > { %v1835_v23 = vpop.f32.mrf.mxu1  ;;  %v1613_v26 = vpop.f32.mrf.mxu0  ;;  %5197 = vmatmul.mubr.f32.gmra.mxu0 %v951_v25  ;;  %3953 = vmatprep.subr.mxu0 %v6584_v53 }
 0x169   : > { %5199 = vmatprep.mubr.f32.mxu0 %v952_v22  ;;  %3954 = vmatpush1.msra.mxu0 %v3601_v52  ;;  %v967_v52 = vld [vmem:[#allocation2 + $0x1a2] sm:$0xff] }
 0x16a   : > { %v1838_v13 = vpop.f32.mrf.mxu1  ;;  %v1615_v58 = vpop.f32.mrf.mxu0  ;;  %3955 = vmatprep.subr.mxu0 %v6584_v53 }
 0x16b   : > { %v6645_v27 = vadd.f32 %v1838_v13, %v1613_v26  ;;  %v3600_v26 = vld [vmem:[%s8119_s4 + $0x120] sm:$0xff]  ;;  %v3587_v13 = vld [vmem:[%s8119_s4 + $0xb8] sm:$0xff] }
 0x16c   : > { %v1840_v18 = vpop.f32.mrf.mxu1  ;;  %v1618_v51 = vpop.f32.mrf.mxu0  ;;  %5200 = vmatmul.mubr.f32.gmra.mxu0 %v953_v36  ;;  %v3599_v58 = vld [vmem:[%s8119_s4 + $0x118] sm:$0xff]  ;;  %3757 = vmatpush2.msra.mxu1 %v3587_v13 }
 0x16d   : > { %5202 = vmatprep.mubr.f32.mxu0 %v954_v63  ;;  %3956 = vmatpush1.msra.mxu0 %v3600_v26  ;;  %v962_v18 = vld [vmem:[#allocation2 + $0x16a] sm:$0xff]  ;;  %v3583_v13 = vld [vmem:[%s8119_s4 + $0x98] sm:$0xff] }
 0x16e   : > { %v1843_v42 = vpop.f32.mrf.mxu1  ;;  %v1620_v49 = vpop.f32.mrf.mxu0  ;;  %3957 = vmatprep.subr.mxu0 %v6584_v53  ;;  %3758 = vmatprep.subr.mxu1 %v6584_v53 }
 0x16f   : > { %v6659_v54 = vadd.f32 %v1843_v42, %v1618_v51  ;;  %3958 = vmatpush1.msra.mxu0 %v3599_v58  ;;  %v963_v42 = vld [vmem:[#allocation2 + $0x172] sm:$0xff] }
 0x170   : > { %v1845_v56 = vpop.f32.mrf.mxu1  ;;  %v1623_v44 = vpop.f32.mrf.mxu0  ;;  %5203 = vmatmul.mubr.f32.gmra.mxu0 %v955_v41  ;;  %v3598_v41 = vld [vmem:[%s8119_s4 + $0x110] sm:$0xff]  ;;  %3959 = vmatprep.subr.mxu0 %v6584_v53  ;;  %v3623_v58 = vld [vmem:[%s8119_s4 + $0x1d8] sm:$0xff] }
 0x171   : > { %5205 = vmatprep.mubr.f32.mxu0 %v956_v39  ;;  %3960 = vmatpush1.msra.mxu0 %v3598_v41  ;;  %v3586_v49 = vld [vmem:[%s8119_s4 + $0xb0] sm:$0xff]  ;;  %v3597_v39 = vld [vmem:[%s8119_s4 + $0x108] sm:$0xff] }
 0x172   : > { %v1848_v40 = vpop.f32.mrf.mxu1  ;;  %v1625_v57 = vpop.f32.mrf.mxu0  ;;  %3961 = vmatprep.subr.mxu0 %v6584_v53  ;;  %3759 = vmatpush2.msra.mxu1 %v3586_v49  ;;  %v3622_v41 = vld [vmem:[%s8119_s4 + $0x1d0] sm:$0xff] }
 0x173   : > { %v6673_v48 = vadd.f32 %v1848_v40, %v1623_v44  ;;  %3962 = vmatpush1.msra.mxu0 %v3597_v39  ;;  %3760 = vmatprep.subr.mxu1 %v6584_v53  ;;  %v3585_v40 = vld [vmem:[%s8119_s4 + $0xa8] sm:$0xff]  ;;  %v3627_v57 = vld [vmem:[%s8119_s4 + $0x1f8] sm:$0xff] }
 0x174   : > { %v1850_v38 = vpop.f32.mrf.mxu1  ;;  %v1628_v25 = vpop.f32.mrf.mxu0  ;;  %5206 = vmatmul.mubr.f32.gmra.mxu0 %v957_v8  ;;  %v3596_v8 = vld [vmem:[%s8119_s4 + $0x100] sm:$0xff]  ;;  %3963 = vmatprep.subr.mxu0 %v6584_v53 }
 0x175   : > { %5208 = vmatprep.mubr.f32.mxu0 %v958_v35  ;;  %3964 = vmatpush1.msra.mxu0 %v3596_v8  ;;  %v966_v38 = vld [vmem:[#allocation2 + $0x19a] sm:$0xff] }
 0x176   : > { %v1853_v1 = vpop.f32.mrf.mxu1  ;;  %v1630_v22 = vpop.f32.mrf.mxu0  ;;  %3965 = vmatprep.subr.mxu0 %v6584_v53  ;;  %3761 = vmatpush2.msra.mxu1 %v3585_v40  ;;  %v3581_v40 = vld [vmem:[%s8119_s4 + $0x88] sm:$0xff] }
 0x177   : > { %v6687_v23 = vadd.f32 %v1853_v1, %v1628_v25  ;;  %3966 = vmatpush2.msra.mxu0 %v3627_v57  ;;  %3762 = vmatprep.subr.mxu1 %v6584_v53  ;;  %v3584_v1 = vld [vmem:[%s8119_s4 + $0xa0] sm:$0xff]  ;;  %v3625_v22 = vld [vmem:[%s8119_s4 + $0x1e8] sm:$0xff] }
 0x178   : > { %v1855_v36 = vpop.f32.mrf.mxu1  ;;  %v1633_v17 = vpop.f32.mrf.mxu0  ;;  %5209 = vmatmul.mubr.f32.gmra.mxu0 %v959_v0  ;;  %3967 = vmatprep.subr.mxu0 %v6584_v53 }
 0x179   : > { %5211 = vmatprep.mubr.f32.mxu0 %v960_v7  ;;  %3763 = vmatpush2.msra.mxu1 %v3584_v1  ;;  %v3618_v1 = vld [vmem:[%s8119_s4 + $0x1b0] sm:$0xff] }
 0x17a   : > { %v1858_v63 = vpop.f32.mrf.mxu1  ;;  %v1635_v37 = vpop.f32.mrf.mxu0  ;;  %3764 = vmatprep.subr.mxu1 %v6584_v53 }
 0x17b   : > { %v6701_v51 = vadd.f32 %v1858_v63, %v1633_v17  ;;  %3765 = vmatpush2.msra.mxu1 %v3583_v13 }
 0x17c   : > { %v1860_v31 = vpop.f32.mrf.mxu1  ;;  %v1638_v50 = vpop.f32.mrf.mxu0  ;;  %5212 = vmatmul.mubr.f32.gmra.mxu0 %v961_v10  ;;  %3766 = vmatprep.subr.mxu1 %v6584_v53 }
 0x17d   : > { %5214 = vmatprep.mubr.f32.mxu0 %v962_v18 }
 0x17e   : > { %v1863_v60 = vpop.f32.mrf.mxu1  ;;  %v1640_v56 = vpop.f32.mrf.mxu0 }
 0x17f   : > { %v6715_v44 = vadd.f32 %v1863_v60, %v1638_v50  ;;  %v3582_v60 = vld [vmem:[%s8119_s4 + $0x90] sm:$0xff]  ;;  %v3621_v56 = vld [vmem:[%s8119_s4 + $0x1c8] sm:$0xff] }
 0x180   : > { %v1865_v15 = vpop.f32.mrf.mxu1  ;;  %v1643_v33 = vpop.f32.mrf.mxu0  ;;  %5215 = vmatmul.mubr.f32.gmra.mxu0 %v963_v42  ;;  %3767 = vmatpush2.msra.mxu1 %v3582_v60 }
 0x181   : > { %5217 = vmatprep.mubr.f32.mxu0 %v6549_v32  ;;  %v3626_v32 = vld [vmem:[%s8119_s4 + $0x1f0] sm:$0xff]  ;;  %3768 = vmatprep.subr.mxu1 %v6584_v53 }
 0x182   : > { %v1868_v35 = vpop.f32.mrf.mxu1  ;;  %v1645_v45 = vpop.f32.mrf.mxu0  ;;  %3968 = vmatpush2.msra.mxu0 %v3626_v32  ;;  %3769 = vmatpush2.msra.mxu1 %v3581_v40  ;;  %v3580_v32 = vld [vmem:[%s8119_s4 + $0x80] sm:$0xff] }
 0x183   : > { %v6730_v25 = vadd.f32 %v1868_v35, %v1643_v33  ;;  %3969 = vmatprep.subr.mxu0 %v6584_v53  ;;  %3770 = vmatprep.subr.mxu1 %v6584_v53 }
 0x184   : > { %v1870_v0 = vpop.f32.mrf.mxu1  ;;  %v1648_v20 = vpop.f32.mrf.mxu0  ;;  %5218 = vmatmul.mubr.f32.gmra.mxu0 %v6559_v43  ;;  %v3624_v43 = vld [vmem:[%s8119_s4 + $0x1e0] sm:$0xff]  ;;  %3771 = vmatpush2.msra.mxu1 %v3580_v32 }
 0x185   : > { %5220 = vmatprep.mubr.f32.mxu0 %v966_v38  ;;  %3970 = vmatpush2.msra.mxu0 %v3625_v22  ;;  %v3619_v38 = vld [vmem:[%s8119_s4 + $0x1b8] sm:$0xff] }
 0x186   : > { %v1873_v7 = vpop.f32.mrf.mxu1  ;;  %v1650_v26 = vpop.f32.mrf.mxu0  ;;  %3971 = vmatprep.subr.mxu0 %v6584_v53  ;;  %v2763_v0 = vld [vmem:[#allocation3 + $0x1] sm:$0xff]  ;;  %4158 = vmatprep.subr.mxu1 %v6584_v53 }
 0x187   : > { %v6745_v36 = vadd.f32 %v1873_v7, %v1648_v20  ;;  %3972 = vmatpush2.msra.mxu0 %v3624_v43  ;;  %3772 = vmatprep.mubr.f32.mxu1 %v2763_v0  ;;  %v3617_v43 = vld [vmem:[%s8119_s4 + $0x1a8] sm:$0xff] }
 0x188   : > { %v1875_v17 = vpop.f32.mrf.mxu1  ;;  %v1653_v10 = vpop.f32.mrf.mxu0  ;;  %5221 = vmatmul.mubr.f32.gmra.mxu0 %v967_v52  ;;  %3973 = vmatprep.subr.mxu0 %v6584_v53 }
 0x189   : > { %3974 = vmatpush2.msra.mxu0 %v3623_v58  ;;  %3773 = vmatmul.mubr.f32.vlgmr.msra.gmra.mxu1 %v6584_v53  ;;  %v2764_v17 = vld [vmem:[#allocation3 + $0x9] sm:$0xff] }
 0x18a   : > { %v1878_v63 = vpop.f32.mrf.mxu1  ;;  %v1655_v37 = vpop.f32.mrf.mxu0  ;;  %3975 = vmatprep.subr.mxu0 %v6584_v53  ;;  %3777 = vmatprep.mubr.f32.mxu1 %v2764_v17  ;;  %v3616_v58 = vld [vmem:[%s8119_s4 + $0x1a0] sm:$0xff] }
 0x18b   : > { %v6759_v18 = vadd.f32 %v1878_v63, %v1653_v10  ;;  %3976 = vmatpush2.msra.mxu0 %v3622_v41 }
 0x18c   : > { %v1880_v31 = vpop.f32.mrf.mxu1  ;;  %v1948_v50 = vpop.f32.mrf.mxu0  ;;  %3977 = vmatprep.subr.mxu0 %v6584_v53 }
 0x18d   : > { %v1949_v42 = vadd.f32 %v1948_v50, %v6462_v11  ;;  %3978 = vmatpush2.msra.mxu0 %v3621_v56  ;;  %v3620_v11 = vld [vmem:[%s8119_s4 + $0x1c0] sm:$0xff]  ;;  %3778 = vmatmul.mubr.f32.gmra.mxu1 %v6584_v53  ;;  %v3615_v31 = vld [vmem:[%s8119_s4 + $0x198] sm:$0xff] }
 0x18e   : > { %v1950_v49 = vpop.f32.mrf.mxu0  ;;  %v2173_v39 = vpop.f32.mrf.mxu1  ;;  %3979 = vmatprep.subr.mxu0 %v6584_v53 }
 0x18f   : > { %v6774_v8 = vadd.f32 %v2173_v39, %v1949_v42  ;;  %3980 = vmatpush2.msra.mxu0 %v3620_v11 }
 0x190   : > { %v1953_v15 = vpop.f32.mrf.mxu0  ;;  %v2175_v33 = vpop.f32.mrf.mxu1  ;;  %3981 = vmatprep.subr.mxu0 %v6584_v53 }
 0x191   : > { %v1954_v57 = vadd.f32 %v1953_v15, %v6466_v47  ;;  %3982 = vmatpush2.msra.mxu0 %v3619_v38  ;;  %v3613_v15 = vld [vmem:[%s8119_s4 + $0x188] sm:$0xff] }
 0x192   : > { %v1955_v35 = vpop.f32.mrf.mxu0  ;;  %v2178_v45 = vpop.f32.mrf.mxu1  ;;  %3983 = vmatprep.subr.mxu0 %v6584_v53 }
 0x193   : > { %v6793_v20 = vadd.f32 %v2178_v45, %v1954_v57  ;;  %3984 = vmatpush2.msra.mxu0 %v3618_v1  ;;  %v3643_v35 = vld [vmem:[%s8119_s4 + $0x278] sm:$0xff] }
 0x194   : > { %v1958_v47 = vpop.f32.mrf.mxu0  ;;  %v2180_v52 = vpop.f32.mrf.mxu1  ;;  %3985 = vmatprep.subr.mxu0 %v6584_v53  ;;  %4159 = vmatpush1.msra.mxu1 %v3643_v35  ;;  %v3638_v35 = vld [vmem:[%s8119_s4 + $0x250] sm:$0xff] }
 0x195   : > { %v1959_v22 = vadd.f32 %v1958_v47, %v6470_v4  ;;  %3986 = vmatpush2.msra.mxu0 %v3617_v43  ;;  %4160 = vmatprep.subr.mxu1 %v6584_v53 }
 0x196   : > { %v1960_v7 = vpop.f32.mrf.mxu0  ;;  %v2183_v26 = vpop.f32.mrf.mxu1  ;;  %3987 = vmatprep.subr.mxu0 %v6584_v53 }
 0x197   : > { %v6806_v10 = vadd.f32 %v2183_v26, %v1959_v22  ;;  %3988 = vmatpush2.msra.mxu0 %v3616_v58 }
 0x198   : > { %v1963_v13 = vpop.f32.mrf.mxu0  ;;  %v2185_v4 = vpop.f32.mrf.mxu1  ;;  %3989 = vmatprep.subr.mxu0 %v6584_v53 }
 0x199   : > { %v1964_v63 = vadd.f32 %v1963_v13, %v6477_v30  ;;  %3990 = vmatpush2.msra.mxu0 %v3615_v31  ;;  %v3614_v30 = vld [vmem:[%s8119_s4 + $0x190] sm:$0xff]  ;;  %v3641_v13 = vld [vmem:[%s8119_s4 + $0x268] sm:$0xff]  ;;  %v3640_v31 = vld [vmem:[%s8119_s4 + $0x260] sm:$0xff] }
 0x19a   : > { %v1965_v37 = vpop.f32.mrf.mxu0  ;;  %v2188_v41 = vpop.f32.mrf.mxu1  ;;  %3991 = vmatprep.subr.mxu0 %v6584_v53 }
 0x19b   : > { %v6818_v50 = vadd.f32 %v2188_v41, %v1964_v63  ;;  %3992 = vmatpush2.msra.mxu0 %v3614_v30 }
 0x19c   : > { %v1968_v42 = vpop.f32.mrf.mxu0  ;;  %v2190_v49 = vpop.f32.mrf.mxu1  ;;  %3993 = vmatprep.subr.mxu0 %v6584_v53 }
 0x19d   : > { %v1969_v39 = vadd.f32 %v1968_v42, %v6485_v29  ;;  %3994 = vmatpush2.msra.mxu0 %v3613_v15  ;;  %v3612_v29 = vld [vmem:[%s8119_s4 + $0x180] sm:$0xff] }
 0x19e   : > { %v1970_v60 = vpop.f32.mrf.mxu0  ;;  %v2193_v56 = vpop.f32.mrf.mxu1  ;;  %3995 = vmatprep.subr.mxu0 %v6584_v53 }
 0x19f   : > { %v6829_v33 = vadd.f32 %v2193_v56, %v1969_v39  ;;  %3996 = vmatpush2.msra.mxu0 %v3612_v29  ;;  %v3639_v56 = vld [vmem:[%s8119_s4 + $0x258] sm:$0xff] }
 0x1a0   : > { %v1973_v11 = vpop.f32.mrf.mxu0  ;;  %v2195_v40 = vpop.f32.mrf.mxu1  ;;  %4383 = vmatprep.subr.mxu0 %v6584_v53 }
 0x1a1   : > { %v1974_v57 = vadd.f32 %v1973_v11, %v6493_v2  ;;  %v3642_v2 = vld [vmem:[%s8119_s4 + $0x270] sm:$0xff] }
 0x1a2   : > { %v1975_v45 = vpop.f32.mrf.mxu0  ;;  %v2198_v38 = vpop.f32.mrf.mxu1  ;;  %4161 = vmatpush1.msra.mxu1 %v3642_v2  ;;  %v3637_v2 = vld [vmem:[%s8119_s4 + $0x248] sm:$0xff] }
 0x1a3   : > { %v6840_v32 = vadd.f32 %v2198_v38, %v1974_v57  ;;  %4162 = vmatprep.subr.mxu1 %v6584_v53 }
 0x1a4   : > { %v1978_v0 = vpop.f32.mrf.mxu0  ;;  %v2200_v47 = vpop.f32.mrf.mxu1  ;;  %4163 = vmatpush1.msra.mxu1 %v3641_v13  ;;  %v3636_v13 = vld [vmem:[%s8119_s4 + $0x240] sm:$0xff] }
 0x1a5   : > { %v1979_v52 = vadd.f32 %v1978_v0, %v6501_v6  ;;  %4164 = vmatprep.subr.mxu1 %v6584_v53 }
 0x1a6   : > { %v1980_v1 = vpop.f32.mrf.mxu0  ;;  %v2203_v22 = vpop.f32.mrf.mxu1  ;;  %4165 = vmatpush1.msra.mxu1 %v3640_v31  ;;  %v3635_v31 = vld [vmem:[%s8119_s4 + $0x238] sm:$0xff] }
 0x1a7   : > { %v6847_v7 = vadd.f32 %v2203_v22, %v1979_v52  ;;  %4166 = vmatprep.subr.mxu1 %v6584_v53 }
 0x1a8   : > { %v1983_v26 = vpop.f32.mrf.mxu0  ;;  %v2205_v43 = vpop.f32.mrf.mxu1  ;;  %4167 = vmatpush1.msra.mxu1 %v3639_v56  ;;  %v3634_v56 = vld [vmem:[%s8119_s4 + $0x230] sm:$0xff] }
 0x1a9   : > { %v1984_v17 = vadd.f32 %v1983_v26, %v6509_v61  ;;  %4168 = vmatprep.subr.mxu1 %v6584_v53 }
 0x1aa   : > { %v1985_v6 = vpop.f32.mrf.mxu0  ;;  %v2208_v4 = vpop.f32.mrf.mxu1  ;;  %4169 = vmatpush1.msra.mxu1 %v3638_v35  ;;  %v3633_v35 = vld [vmem:[%s8119_s4 + $0x228] sm:$0xff] }
 0x1ab   : > { %v6854_v58 = vadd.f32 %v2208_v4, %v1984_v17  ;;  %4170 = vmatprep.subr.mxu1 %v6584_v53 }
 0x1ac   : > { %v1988_v63 = vpop.f32.mrf.mxu0  ;;  %v2210_v37 = vpop.f32.mrf.mxu1  ;;  %4171 = vmatpush1.msra.mxu1 %v3637_v2  ;;  %v3632_v2 = vld [vmem:[%s8119_s4 + $0x220] sm:$0xff] }
 0x1ad   : > { %v1989_v41 = vadd.f32 %v1988_v63, %v6517_v28  ;;  %4172 = vmatprep.subr.mxu1 %v6584_v53 }
 0x1ae   : > { %v1990_v61 = vpop.f32.mrf.mxu0  ;;  %v2213_v42 = vpop.f32.mrf.mxu1  ;;  %4173 = vmatpush1.msra.mxu1 %v3636_v13  ;;  %v3631_v13 = vld [vmem:[%s8119_s4 + $0x218] sm:$0xff] }
 0x1af   : > { %v6861_v49 = vadd.f32 %v2213_v42, %v1989_v41  ;;  %4174 = vmatprep.subr.mxu1 %v6584_v53 }
 0x1b0   : > { %v1993_v30 = vpop.f32.mrf.mxu0  ;;  %v2215_v39 = vpop.f32.mrf.mxu1  ;;  %4175 = vmatpush1.msra.mxu1 %v3635_v31 }
 0x1b1   : > { %v1994_v60 = vadd.f32 %v1993_v30, %v6525_v19  ;;  %4176 = vmatprep.subr.mxu1 %v6584_v53 }
 0x1b2   : > { %v1995_v28 = vpop.f32.mrf.mxu0  ;;  %v2218_v15 = vpop.f32.mrf.mxu1  ;;  %4177 = vmatpush1.msra.mxu1 %v3634_v56 }
 0x1b3   : > { %v6868_v11 = vadd.f32 %v2218_v15, %v1994_v60  ;;  %4178 = vmatprep.subr.mxu1 %v6584_v53 }
 0x1b4   : > { %v1998_v40 = vpop.f32.mrf.mxu0  ;;  %v2220_v29 = vpop.f32.mrf.mxu1  ;;  %4179 = vmatpush1.msra.mxu1 %v3633_v35 }
 0x1b5   : > { %v1999_v57 = vadd.f32 %v1998_v40, %v6533_v9  ;;  %4180 = vmatprep.subr.mxu1 %v6584_v53 }
 0x1b6   : > { %v2000_v19 = vpop.f32.mrf.mxu0  ;;  %v2223_v45 = vpop.f32.mrf.mxu1  ;;  %4181 = vmatpush1.msra.mxu1 %v3632_v2 }
 0x1b7   : > { %v6875_v38 = vadd.f32 %v2223_v45, %v1999_v57  ;;  %4182 = vmatprep.subr.mxu1 %v6584_v53 }
 0x1b8   : > { %v2003_v0 = vpop.f32.mrf.mxu0  ;;  %v2225_v47 = vpop.f32.mrf.mxu1  ;;  %4183 = vmatpush1.msra.mxu1 %v3631_v13 }
 0x1b9   : > { %v2004_v52 = vadd.f32 %v2003_v0, %v6541_v16  ;;  %4184 = vmatprep.subr.mxu1 %v6584_v53 }
 0x1ba   : > { %v2005_v9 = vpop.f32.mrf.mxu0  ;;  %v2228_v1 = vpop.f32.mrf.mxu1 }
 0x1bb   : > { %v6882_v22 = vadd.f32 %v2228_v1, %v2004_v52 }
 0x1bc   : > { %v2008_v26 = vpop.f32.mrf.mxu0  ;;  %v2230_v43 = vpop.f32.mrf.mxu1 }
 0x1bd   : > { %v2009_v17 = vadd.f32 %v2008_v26, %v6551_v21 }
 0x1be   : > { %v2010_v16 = vpop.f32.mrf.mxu0  ;;  %v2233_v6 = vpop.f32.mrf.mxu1 }
 0x1bf   : > { %v6889_v4 = vadd.f32 %v2233_v6, %v2009_v17 }
 0x1c0   : > { %v2013_v63 = vpop.f32.mrf.mxu0  ;;  %v2235_v37 = vpop.f32.mrf.mxu1 }
 0x1c1   : > { %v2014_v41 = vadd.f32 %v2013_v63, %v6561_v24  ;;  %v3630_v63 = vld [vmem:[%s8119_s4 + $0x210] sm:$0xff]  ;;  %v3629_v37 = vld [vmem:[%s8119_s4 + $0x208] sm:$0xff] }
 0x1c2   : > { %v2015_v21 = vpop.f32.mrf.mxu0  ;;  %v2238_v61 = vpop.f32.mrf.mxu1  ;;  %4185 = vmatpush1.msra.mxu1 %v3630_v63 }
 0x1c3   : > { %v6896_v42 = vadd.f32 %v2238_v61, %v2014_v41  ;;  %4186 = vmatprep.subr.mxu1 %v6584_v53  ;;  %v3628_v21 = vld [vmem:[%s8119_s4 + $0x200] sm:$0xff] }
 0x1c4   : > { %v2018_v30 = vpop.f32.mrf.mxu0  ;;  %v2240_v39 = vpop.f32.mrf.mxu1  ;;  %4187 = vmatpush1.msra.mxu1 %v3629_v37 }
 0x1c5   : > { %v2019_v60 = vadd.f32 %v2018_v30, %v6569_v59  ;;  %4188 = vmatprep.subr.mxu1 %v6584_v53 }
 0x1c6   : > { %v2020_v24 = vpop.f32.mrf.mxu0  ;;  %v2243_v28 = vpop.f32.mrf.mxu1  ;;  %4189 = vmatpush1.msra.mxu1 %v3628_v21  ;;  %v3655_v21 = vld [vmem:[%s8119_s4 + $0x2d8] sm:$0xff] }
 0x1c7   : > { %v6903_v15 = vadd.f32 %v2243_v28, %v2019_v60  ;;  %4190 = vmatprep.subr.mxu1 %v6584_v53 }
 0x1c8   : > { %v2023_v40 = vpop.f32.mrf.mxu0  ;;  %v2245_v29 = vpop.f32.mrf.mxu1 }
 0x1c9   : > { %v2024_v57 = vadd.f32 %v2023_v40, %v6576_v34 }
 0x1ca   : > { %v2025_v59 = vpop.f32.mrf.mxu0  ;;  %v2248_v19 = vpop.f32.mrf.mxu1 }
 0x1cb   : > { %v6910_v45 = vadd.f32 %v2248_v19, %v2024_v57 }
 0x1cc   : > { %v2028_v0 = vpop.f32.mrf.mxu0  ;;  %v2250_v47 = vpop.f32.mrf.mxu1 }
 0x1cd   : > { %v2029_v52 = vadd.f32 %v2028_v0, %v6582_v5 }
 0x1ce   : > { %v2030_v34 = vpop.f32.mrf.mxu0  ;;  %v2253_v9 = vpop.f32.mrf.mxu1 }
 0x1cf   : > { %v6917_v1 = vadd.f32 %v2253_v9, %v2029_v52  ;;  %v3657_v9 = vld [vmem:[%s8119_s4 + $0x2e8] sm:$0xff] }
 0x1d0   : > { %v2033_v26 = vpop.f32.mrf.mxu0  ;;  %v2255_v43 = vpop.f32.mrf.mxu1 }
 0x1d1   : > { %v2034_v17 = vadd.f32 %v2033_v26, %v6590_v62 }
 0x1d2   : > { %v2035_v5 = vpop.f32.mrf.mxu0  ;;  %v2258_v16 = vpop.f32.mrf.mxu1 }
 0x1d3   : > { %v6924_v6 = vadd.f32 %v2258_v16, %v2034_v17  ;;  %v3656_v16 = vld [vmem:[%s8119_s4 + $0x2e0] sm:$0xff] }
 0x1d4   : > { %v2038_v62 = vpop.f32.mrf.mxu0  ;;  %v2260_v41 = vpop.f32.mrf.mxu1 }
 0x1d5   : > { %v2039_v31 = vadd.f32 %v2038_v62, %v6596_v14  ;;  %v3659_v14 = vld [vmem:[%s8119_s4 + $0x2f8] sm:$0xff] }
 0x1d6   : > { %v2040_v61 = vpop.f32.mrf.mxu0  ;;  %v2263_v30 = vpop.f32.mrf.mxu1  ;;  %4191 = vmatpush2.msra.mxu1 %v3659_v14  ;;  %v3654_v14 = vld [vmem:[%s8119_s4 + $0x2d0] sm:$0xff] }
 0x1d7   : > { %v6938_v39 = vadd.f32 %v2263_v30, %v2039_v31  ;;  %4192 = vmatprep.subr.mxu1 %v6584_v53 }
 0x1d8   : > { %v2043_v60 = vpop.f32.mrf.mxu0  ;;  %v2265_v56 = vpop.f32.mrf.mxu1 }
 0x1d9   : > { %v2044_v24 = vadd.f32 %v2043_v60, %v6602_v46  ;;  %v3658_v46 = vld [vmem:[%s8119_s4 + $0x2f0] sm:$0xff] }
 0x1da   : > { %v2045_v28 = vpop.f32.mrf.mxu0  ;;  %v2268_v40 = vpop.f32.mrf.mxu1  ;;  %4193 = vmatpush2.msra.mxu1 %v3658_v46  ;;  %v3653_v46 = vld [vmem:[%s8119_s4 + $0x2c8] sm:$0xff] }
 0x1db   : > { %v6946_v29 = vadd.f32 %v2268_v40, %v2044_v24  ;;  %4194 = vmatprep.subr.mxu1 %v6584_v53 }
 0x1dc   : > { %v2048_v57 = vpop.f32.mrf.mxu0  ;;  %v2270_v35 = vpop.f32.mrf.mxu1  ;;  %4195 = vmatpush2.msra.mxu1 %v3657_v9  ;;  %v3652_v9 = vld [vmem:[%s8119_s4 + $0x2c0] sm:$0xff] }
 0x1dd   : > { %v2049_v59 = vadd.f32 %v2048_v57, %v6608_v3  ;;  %4196 = vmatprep.subr.mxu1 %v6584_v53 }
 0x1de   : > { %v2050_v19 = vpop.f32.mrf.mxu0  ;;  %v2273_v0 = vpop.f32.mrf.mxu1  ;;  %4197 = vmatpush2.msra.mxu1 %v3656_v16 }
 0x1df   : > { %v6953_v47 = vadd.f32 %v2273_v0, %v2049_v59  ;;  %4198 = vmatprep.subr.mxu1 %v6584_v53 }
 0x1e0   : > { %v2053_v52 = vpop.f32.mrf.mxu0  ;;  %v2275_v2 = vpop.f32.mrf.mxu1  ;;  %4199 = vmatpush2.msra.mxu1 %v3655_v21  ;;  %v3650_v21 = vld [vmem:[%s8119_s4 + $0x2b0] sm:$0xff] }
 0x1e1   : > { %v2054_v34 = vadd.f32 %v2053_v52, %v6617_v55  ;;  %4200 = vmatprep.subr.mxu1 %v6584_v53 }
 0x1e2   : > { %v2055_v3 = vpop.f32.mrf.mxu0  ;;  %v2278_v26 = vpop.f32.mrf.mxu1  ;;  %4201 = vmatpush2.msra.mxu1 %v3654_v14  ;;  %v3649_v14 = vld [vmem:[%s8119_s4 + $0x2a8] sm:$0xff] }
 0x1e3   : > { %v6960_v43 = vadd.f32 %v2278_v26, %v2054_v34  ;;  %4202 = vmatprep.subr.mxu1 %v6584_v53 }
 0x1e4   : > { %v2058_v17 = vpop.f32.mrf.mxu0  ;;  %v2280_v13 = vpop.f32.mrf.mxu1  ;;  %4203 = vmatpush2.msra.mxu1 %v3653_v46  ;;  %v3648_v46 = vld [vmem:[%s8119_s4 + $0x2a0] sm:$0xff] }
 0x1e5   : > { %v2059_v5 = vadd.f32 %v2058_v17, %v6631_v12  ;;  %4204 = vmatprep.subr.mxu1 %v6584_v53  ;;  %v6997_v17 = vld [vmem:[#allocation2] sm:$0xff] }
 0x1e6   : > { %v2060_v55 = vpop.f32.mrf.mxu0  ;;  %v2283_v63 = vpop.f32.mrf.mxu1  ;;  %4205 = vmatpush2.msra.mxu1 %v3652_v9 }
 0x1e7   : > { %v6967_v37 = vadd.f32 %v2283_v63, %v2059_v5  ;;  %4206 = vmatprep.subr.mxu1 %v6997_v17 }
 0x1e8   : > { %v2063_v62 = vpop.f32.mrf.mxu0  ;;  %v2285_v41 = vpop.f32.mrf.mxu1 }
 0x1e9   : > { %v2064_v31 = vadd.f32 %v2063_v62, %v6645_v27 }
 0x1ea   : > { %v2065_v12 = vpop.f32.mrf.mxu0  ;;  %v2288_v61 = vpop.f32.mrf.mxu1 }
 0x1eb   : > { %v6974_v30 = vadd.f32 %v2288_v61, %v2064_v31 }
 0x1ec   : > { %v2068_v60 = vpop.f32.mrf.mxu0  ;;  %v2290_v56 = vpop.f32.mrf.mxu1 }
 0x1ed   : > { %v2069_v24 = vadd.f32 %v2068_v60, %v6659_v54 }
 0x1ee   : > { %v2070_v27 = vpop.f32.mrf.mxu0  ;;  %v2293_v28 = vpop.f32.mrf.mxu1 }
 0x1ef   : > { %v6981_v40 = vadd.f32 %v2293_v28, %v2069_v24 }
 0x1f0   : > { %v2073_v57 = vpop.f32.mrf.mxu0  ;;  %v2295_v35 = vpop.f32.mrf.mxu1 }
 0x1f1   : > { %v2074_v59 = vadd.f32 %v2073_v57, %v6673_v48 }
 0x1f2   : > { %v2075_v54 = vpop.f32.mrf.mxu0  ;;  %v2298_v19 = vpop.f32.mrf.mxu1 }
 0x1f3   : > { %v6988_v0 = vadd.f32 %v2298_v19, %v2074_v59 }
 0x1f4   : > { %v2078_v52 = vpop.f32.mrf.mxu0  ;;  %v2300_v2 = vpop.f32.mrf.mxu1 }
 0x1f5   : > { %v2079_v34 = vadd.f32 %v2078_v52, %v6687_v23  ;;  %v3651_v23 = vld [vmem:[%s8119_s4 + $0x2b8] sm:$0xff] }
 0x1f6   : > { %v2080_v48 = vpop.f32.mrf.mxu0  ;;  %v2303_v3 = vpop.f32.mrf.mxu1  ;;  %4207 = vmatpush2.msra.mxu1 %v3651_v23  ;;  %v7048_v23 = vld [vmem:[%s8118_s3] ss:$0 sm:$0xff] }
 0x1f7   : > { %v6995_v26 = vadd.f32 %v2303_v3, %v2079_v34  ;;  %4208 = vmatprep.subr.mxu1 %v6997_v17  ;;  %v3647_v34 = vld [vmem:[%s8119_s4 + $0x298] sm:$0xff]  ;;  %v7039_v3 = vld [vmem:[%s8117_s2] ss:$0 sm:$0xff] }
 0x1f8   : > { %v2083_v13 = vpop.f32.mrf.mxu0  ;;  %v2305_v5 = vpop.f32.mrf.mxu1  ;;  %4209 = vmatpush2.msra.mxu1 %v3650_v21 }
 0x1f9   : > { %v2084_v53 = vadd.f32 %v2083_v13, %v6701_v51  ;;  %4210 = vmatprep.subr.mxu1 %v6997_v17 }
 0x1fa   : > { %v2085_v16 = vpop.f32.mrf.mxu0  ;;  %v2308_v55 = vpop.f32.mrf.mxu1  ;;  %4211 = vmatpush2.msra.mxu1 %v3649_v14 }
 0x1fb   : > { %v7004_v63 = vadd.f32 %v2308_v55, %v2084_v53  ;;  %4212 = vmatprep.subr.mxu1 %v6997_v17  ;;  %v3646_v53 = vld [vmem:[%s8119_s4 + $0x290] sm:$0xff] }
 0x1fc   : > { %v2088_v62 = vpop.f32.mrf.mxu0  ;;  %v2310_v41 = vpop.f32.mrf.mxu1  ;;  %4213 = vmatpush2.msra.mxu1 %v3648_v46 }
 0x1fd   : > { %v2089_v31 = vadd.f32 %v2088_v62, %v6715_v44  ;;  %4214 = vmatprep.subr.mxu1 %v6997_v17 }
 0x1fe   : > { %v2090_v51 = vpop.f32.mrf.mxu0  ;;  %v2313_v12 = vpop.f32.mrf.mxu1  ;;  %4215 = vmatpush2.msra.mxu1 %v3647_v34 }
 0x1ff   : > { %v7011_v61 = vadd.f32 %v2313_v12, %v2089_v31  ;;  %4216 = vmatprep.subr.mxu1 %v6997_v17  ;;  %v3645_v51 = vld [vmem:[%s8119_s4 + $0x288] sm:$0xff] }
 0x200   : > { %v2093_v60 = vpop.f32.mrf.mxu0  ;;  %v2315_v56 = vpop.f32.mrf.mxu1  ;;  %4217 = vmatpush2.msra.mxu1 %v3646_v53 }
 0x201   : > { %v2094_v24 = vadd.f32 %v2093_v60, %v6730_v25  ;;  %4218 = vmatprep.subr.mxu1 %v6997_v17 }
 0x202   : > { %v2095_v44 = vpop.f32.mrf.mxu0  ;;  %v2318_v27 = vpop.f32.mrf.mxu1  ;;  %4219 = vmatpush2.msra.mxu1 %v3645_v51 }
 0x203   : > { %v7018_v28 = vadd.f32 %v2318_v27, %v2094_v24  ;;  %4220 = vmatprep.subr.mxu1 %v6997_v17 }
 0x204   : > { %v2098_v57 = vpop.f32.mrf.mxu0  ;;  %v2320_v35 = vpop.f32.mrf.mxu1 }
 0x205   : > { %v2099_v59 = vadd.f32 %v2098_v57, %v6745_v36  ;;  %v3644_v35 = vld [vmem:[%s8119_s4 + $0x280] sm:$0xff] }
 0x206   : > { %v2100_v25 = vpop.f32.mrf.mxu0  ;;  %v2323_v54 = vpop.f32.mrf.mxu1  ;;  %4221 = vmatpush2.msra.mxu1 %v3644_v35 }
 0x207   : > { %v7025_v19 = vadd.f32 %v2323_v54, %v2099_v59 }
 0x208   : > { %v7028_v52 = vpop.f32.mrf.mxu0  ;;  %v2325_v2 = vpop.f32.mrf.mxu1 }
 0x20a   : > { %v2105_v9 = vpop.f32.mrf.mxu0  ;;  %v7033_v36 = vpop.f32.mrf.mxu1 }
 0x20c   : > { %v5177_v48 = vpop.f32.mrf.mxu0  ;;  %v2330_v13 = vpop.f32.mrf.mxu1 }
 0x20d   : > { %v2404_v5 = vadd.f32 %v5177_v48, %v6793_v20 }
 0x20e   : > { %v2398_v16 = vpop.f32.mrf.mxu0 }
 0x20f   : > { %v2565_v55 = vmul.f32 %v7039_v3, %v2404_v5  ;;  %v2399_v62 = vadd.f32 %v2398_v16, %v6774_v8 }
 0x210   : > { %v5180_v41 = vpop.f32.mrf.mxu0 }
 0x211   : > { %v2604_v20 = vadd.f32 %v7048_v23, %v2565_v55  ;;  %v2564_v31 = vmul.f32 %v7039_v3, %v2399_v62  ;;  %v2414_v21 = vadd.f32 %v5180_v41, %v6818_v50 }
 0x212   : > { %v2408_v12 = vpop.f32.mrf.mxu0 }
 0x213   : > { %v2636_v60 = vmax.f32 %v2604_v20, 0.0  ;;  %v2603_v56 = vadd.f32 %v7048_v23, %v2564_v31  ;;  %v2567_v8 = vmul.f32 %v7039_v3, %v2414_v21  ;;  %v2409_v24 = vadd.f32 %v2408_v12, %v6806_v10  ;;  %v2827_v21 = vld [vmem:[#allocation3 + $0x2] sm:$0xff] }
 0x214   : > { %v5183_v14 = vpop.f32.mrf.mxu0 }
 0x215   : > { %2668 = vst [vmem:[#allocation3 + $0x21] sm:$0xff] %v2636_v60  ;;  %v2635_v44 = vmax.f32 %v2603_v56, 0.0  ;;  %v7064_v50 = vadd.f32 %v7048_v23, %v2567_v8  ;;  %v2566_v27 = vmul.f32 %v7039_v3, %v2409_v24  ;;  %v2424_v57 = vadd.f32 %v5183_v14, %v6840_v32  ;;  %v7078_v32 = vld [vmem:[%s8119_s4 + $0x478] sm:$0xff] }
 0x216   : > { %v2418_v59 = vpop.f32.mrf.mxu0  ;;  %5223 = vmatprep.subr.mxu1 %v7078_v32 }
 0x217   : > { %2667 = vst [vmem:[#allocation3 + $0x19] sm:$0xff] %v2635_v44  ;;  %v2638_v10 = vmax.f32 %v7064_v50, 0.0  ;;  %v2605_v46 = vadd.f32 %v7048_v23, %v2566_v27  ;;  %v2569_v25 = vmul.f32 %v7039_v3, %v2424_v57  ;;  %v2419_v54 = vadd.f32 %v2418_v59, %v6829_v33  ;;  %3782 = vmatprep.mubr.f32.mxu1 %v2635_v44  ;;  %v3674_v27 = vld [vmem:[%s8119_s4 + $0x370] sm:$0xff] }
 0x218   : > { %v5186_v2 = vpop.f32.mrf.mxu0 }
 0x219   : > { %2670 = vst [vmem:[#allocation3 + $0x39] sm:$0xff] %v2638_v10  ;;  %v2637_v34 = vmax.f32 %v2605_v46, 0.0  ;;  %v7083_v9 = vadd.f32 %v7048_v23, %v2569_v25  ;;  %v2568_v48 = vmul.f32 %v7039_v3, %v2419_v54  ;;  %v2434_v13 = vadd.f32 %v5186_v2, %v6854_v58  ;;  %v2828_v46 = vld [vmem:[#allocation3 + $0xa] sm:$0xff] }
 0x21a   : > { %v2428_v33 = vpop.f32.mrf.mxu0 }
 0x21b   : > { %2669 = vst [vmem:[#allocation3 + $0x31] sm:$0xff] %v2637_v34  ;;  %v2640_v5 = vmax.f32 %v7083_v9, 0.0  ;;  %v7090_v53 = vadd.f32 %v7048_v23, %v2568_v48  ;;  %v2571_v16 = vmul.f32 %v7039_v3, %v2434_v13  ;;  %v2429_v55 = vadd.f32 %v2428_v33, %v6847_v7  ;;  %v3675_v7 = vld [vmem:[%s8119_s4 + $0x378] sm:$0xff] }
 0x21c   : > { %v5189_v62 = vpop.f32.mrf.mxu0 }
 0x21d   : > { %2672 = vst [vmem:[#allocation3 + $0x51] sm:$0xff] %v2640_v5  ;;  %v2639_v41 = vmax.f32 %v7090_v53, 0.0  ;;  %v7098_v58 = vadd.f32 %v7048_v23, %v2571_v16  ;;  %v2570_v20 = vmul.f32 %v7039_v3, %v2429_v55  ;;  %v2444_v31 = vadd.f32 %v5189_v62, %v6868_v11  ;;  %v3669_v53 = vld [vmem:[%s8119_s4 + $0x348] sm:$0xff] }
 0x21e   : > { %v2438_v51 = vpop.f32.mrf.mxu0  ;;  %v2891_v12 = vld [vmem:[#allocation3 + $0x18] sm:$0xff]  ;;  %v2892_v44 = vld [vmem:[#allocation3 + $0x20] sm:$0xff] }
 0x21f   : > { %2671 = vst [vmem:[#allocation3 + $0x49] sm:$0xff] %v2639_v41  ;;  %v2642_v56 = vmax.f32 %v7098_v58, 0.0  ;;  %v7109_v8 = vadd.f32 %v7048_v23, %v2570_v20  ;;  %v2573_v24 = vmul.f32 %v7039_v3, %v2444_v31  ;;  %v2439_v14 = vadd.f32 %v2438_v51, %v6861_v49  ;;  %3997 = vmatprep.mubr.f32.mxu0 %v2891_v12 }
 0x220   : > { %3783 = vmatmul.mubr.f32.gmra.mxu1 %v2891_v12  ;;  %v5192_v11 = vpop.f32.mrf.mxu0  ;;  %3998 = vmatmul.mubr.f32.vlgmr.msra.gmra.mxu0 %v2827_v21  ;;  %v7156_v12 = vld [vmem:[#allocation3 + $0x1a] sm:$0xff] }
 0x221   : > { %3787 = vmatprep.mubr.f32.mxu1 %v2636_v60  ;;  %2674 = vst [vmem:[#allocation3 + $0x69] sm:$0xff] %v2642_v56  ;;  %v2641_v57 = vmax.f32 %v7109_v8, 0.0  ;;  %v7120_v35 = vadd.f32 %v7048_v23, %v2573_v24  ;;  %v2572_v49 = vmul.f32 %v7039_v3, %v2439_v14  ;;  %v2454_v59 = vadd.f32 %v5192_v11, %v6882_v22  ;;  %v3673_v22 = vld [vmem:[%s8119_s4 + $0x368] sm:$0xff]  ;;  %v3671_v14 = vld [vmem:[%s8119_s4 + $0x358] sm:$0xff] }
 0x222   : > { %4002 = vmatprep.mubr.f32.mxu0 %v2892_v44  ;;  %4384 = vmatpush1.msra.mxu0 %v3675_v7  ;;  %v2448_v60 = vpop.f32.mrf.mxu0  ;;  %v2893_v33 = vld [vmem:[#allocation3 + $0x30] sm:$0xff]  ;;  %v2894_v24 = vld [vmem:[#allocation3 + $0x38] sm:$0xff] }
 0x223   : > { %4385 = vmatprep.subr.mxu0 %v6997_v17  ;;  %2673 = vst [vmem:[#allocation3 + $0x61] sm:$0xff] %v2641_v57  ;;  %v2644_v25 = vmax.f32 %v7120_v35, 0.0  ;;  %v7129_v54 = vadd.f32 %v7048_v23, %v2572_v49  ;;  %v2575_v2 = vmul.f32 %v7039_v3, %v2454_v59  ;;  %v2449_v48 = vadd.f32 %v2448_v60, %v6875_v38  ;;  %v7182_v60 = vld [vmem:[#allocation3 + $0x22] sm:$0xff] }
 0x224   : > { %3788 = vmatmul.mubr.f32.gmra.mxu1 %v2892_v44  ;;  %4386 = vmatpush1.msra.mxu0 %v3674_v27  ;;  %v5195_v13 = vpop.f32.mrf.mxu0  ;;  %v2104_v35 = vadd.f32 %v7028_v52, %v6759_v18  ;;  %v3661_v18 = vld [vmem:[%s8119_s4 + $0x308] sm:$0xff] }
 0x225   : > { %4003 = vmatmul.mubr.f32.gmra.mxu0 %v2828_v46  ;;  %3792 = vmatprep.mubr.f32.mxu1 %v2637_v34  ;;  %2676 = vst [vmem:[#allocation3 + $0x81] sm:$0xff] %v2644_v25  ;;  %v2643_v16 = vmax.f32 %v7129_v54, 0.0  ;;  %v7140_v55 = vadd.f32 %v7048_v23, %v2575_v2  ;;  %v2574_v38 = vmul.f32 %v7039_v3, %v2449_v48  ;;  %v3672_v34 = vld [vmem:[%s8119_s4 + $0x360] sm:$0xff] }
 0x226   : > { %v2464_v62 = vadd.f32 %v5195_v13, %v6896_v42  ;;  %4007 = vmatprep.mubr.f32.mxu0 %v2893_v33  ;;  %4387 = vmatprep.subr.mxu0 %v6997_v17  ;;  %v2458_v20 = vpop.f32.mrf.mxu0  ;;  %v2895_v48 = vld [vmem:[#allocation3 + $0x48] sm:$0xff] }
 0x227   : > { %4388 = vmatpush1.msra.mxu0 %v3673_v22  ;;  %2675 = vst [vmem:[#allocation3 + $0x79] sm:$0xff] %v2643_v16  ;;  %v2646_v31 = vmax.f32 %v7140_v55, 0.0  ;;  %v7152_v21 = vadd.f32 %v7048_v23, %v2574_v38  ;;  %v2459_v42 = vadd.f32 %v2458_v20, %v6889_v4 }
 0x228   : > { %v2577_v51 = vmul.f32 %v7039_v3, %v2464_v62  ;;  %3793 = vmatmul.mubr.f32.gmra.mxu1 %v2893_v33  ;;  %4389 = vmatprep.subr.mxu0 %v6997_v17  ;;  %v5198_v7 = vpop.f32.mrf.mxu0 }
 0x229   : > { %4008 = vmatmul.mubr.f32.gmra.mxu0 %v7156_v12  ;;  %3797 = vmatprep.mubr.f32.mxu1 %v2638_v10  ;;  %2678 = vst [vmem:[#allocation3 + $0x99] sm:$0xff] %v2646_v31  ;;  %v2645_v4 = vmax.f32 %v7152_v21, 0.0  ;;  %v2576_v44 = vmul.f32 %v7039_v3, %v2459_v42  ;;  %v2474_v27 = vadd.f32 %v5198_v7, %v6910_v45  ;;  %v3670_v45 = vld [vmem:[%s8119_s4 + $0x350] sm:$0xff]  ;;  %v7216_v42 = vld [vmem:[#allocation3 + $0x50] sm:$0xff] }
 0x22a   : > { %v7169_v11 = vadd.f32 %v7048_v23, %v2577_v51  ;;  %4012 = vmatprep.mubr.f32.mxu0 %v2894_v24  ;;  %4390 = vmatpush1.msra.mxu0 %v3672_v34  ;;  %v2468_v50 = vpop.f32.mrf.mxu0  ;;  %v7210_v34 = vld [vmem:[#allocation3 + $0x32] sm:$0xff]  ;;  %v2329_v21 = vadd.f32 %v7033_v36, %v2104_v35 }
 0x22b   : > { %4391 = vmatprep.subr.mxu0 %v6997_v17  ;;  %2677 = vst [vmem:[#allocation3 + $0x91] sm:$0xff] %v2645_v4  ;;  %v7178_v49 = vadd.f32 %v7048_v23, %v2576_v44  ;;  %v2579_v59 = vmul.f32 %v7039_v3, %v2474_v27  ;;  %v2469_v46 = vadd.f32 %v2468_v50, %v6903_v15  ;;  %v3668_v7 = vld [vmem:[%s8119_s4 + $0x340] sm:$0xff] }
 0x22c   : > { %v2648_v10 = vmax.f32 %v7169_v11, 0.0  ;;  %3798 = vmatmul.mubr.f32.gmra.mxu1 %v2894_v24  ;;  %4392 = vmatpush1.msra.mxu0 %v3671_v14  ;;  %v5201_v2 = vpop.f32.mrf.mxu0  ;;  %v3687_v11 = vld [vmem:[%s8119_s4 + $0x3d8] sm:$0xff] }
 0x22d   : > { %4013 = vmatmul.mubr.f32.gmra.mxu0 %v7182_v60  ;;  %3802 = vmatprep.mubr.f32.mxu1 %v2639_v41  ;;  %v2647_v15 = vmax.f32 %v7178_v49, 0.0  ;;  %v7194_v22 = vadd.f32 %v7048_v23, %v2579_v59  ;;  %v2578_v13 = vmul.f32 %v7039_v3, %v2469_v46  ;;  %v2484_v33 = vadd.f32 %v5201_v2, %v6924_v6  ;;  %v3667_v46 = vld [vmem:[%s8119_s4 + $0x338] sm:$0xff]  ;;  %v7248_v2 = vld [vmem:[#allocation3 + $0x60] sm:$0xff]  ;;  %v3689_v49 = vld [vmem:[%s8119_s4 + $0x3e8] sm:$0xff] }
 0x22e   : > { %2680 = vst [vmem:[#allocation3 + $0xb1] sm:$0xff] %v2648_v10  ;;  %4017 = vmatprep.mubr.f32.mxu0 %v2895_v48  ;;  %4393 = vmatprep.subr.mxu0 %v6997_v17  ;;  %v2478_v38 = vpop.f32.mrf.mxu0  ;;  %v7399_v36 = vld [vmem:[#allocation3 + $0x7a] sm:$0xff] }
 0x22f   : > { %4394 = vmatpush1.msra.mxu0 %v3670_v45  ;;  %2679 = vst [vmem:[#allocation3 + $0xa9] sm:$0xff] %v2647_v15  ;;  %v2650_v41 = vmax.f32 %v7194_v22, 0.0  ;;  %v7206_v62 = vadd.f32 %v7048_v23, %v2578_v13  ;;  %v2581_v20 = vmul.f32 %v7039_v3, %v2484_v33  ;;  %v2479_v6 = vadd.f32 %v2478_v38, %v6917_v1  ;;  %v3684_v22 = vld [vmem:[%s8119_s4 + $0x3c0] sm:$0xff] }
 0x230   : > { %3803 = vmatmul.mubr.f32.gmra.mxu1 %v2895_v48  ;;  %4395 = vmatprep.subr.mxu0 %v6997_v17  ;;  %v5204_v51 = vpop.f32.mrf.mxu0 }
 0x231   : > { %4018 = vmatmul.mubr.f32.gmra.mxu0 %v7210_v34  ;;  %3807 = vmatprep.mubr.f32.mxu1 %v2640_v5  ;;  %2682 = vst [vmem:[#allocation3 + $0xc9] sm:$0xff] %v2650_v41  ;;  %v2649_v1 = vmax.f32 %v7206_v62, 0.0  ;;  %v7225_v24 = vadd.f32 %v7048_v23, %v2581_v20  ;;  %v2580_v14 = vmul.f32 %v7039_v3, %v2479_v6  ;;  %v7272_v6 = vld [vmem:[#allocation3 + $0x4a] sm:$0xff] }
 0x232   : > { %v2494_v44 = vadd.f32 %v5204_v51, %v6946_v29  ;;  %4022 = vmatprep.mubr.f32.mxu0 %v7216_v42  ;;  %4396 = vmatpush1.msra.mxu0 %v3669_v53  ;;  %v2488_v9 = vpop.f32.mrf.mxu0  ;;  %v7240_v29 = vld [vmem:[#allocation3 + $0x3a] sm:$0xff] }
 0x233   : > { %4397 = vmatprep.subr.mxu0 %v6997_v17  ;;  %2681 = vst [vmem:[#allocation3 + $0xc1] sm:$0xff] %v2649_v1  ;;  %v2652_v5 = vmax.f32 %v7225_v24, 0.0  ;;  %v7235_v27 = vadd.f32 %v7048_v23, %v2580_v14  ;;  %v2489_v59 = vadd.f32 %v2488_v9, %v6938_v39  ;;  %v3665_v14 = vld [vmem:[%s8119_s4 + $0x328] sm:$0xff] }
 0x234   : > { %v2583_v50 = vmul.f32 %v7039_v3, %v2494_v44  ;;  %3808 = vmatmul.mubr.f32.gmra.mxu1 %v7216_v42  ;;  %4398 = vmatpush1.msra.mxu0 %v3668_v7  ;;  %v5207_v45 = vpop.f32.mrf.mxu0  ;;  %v7278_v7 = vld [vmem:[#allocation3 + $0x68] sm:$0xff]  ;;  %v3681_v24 = vld [vmem:[%s8119_s4 + $0x3a8] sm:$0xff] }
 0x235   : > { %4023 = vmatmul.mubr.f32.gmra.mxu0 %v7240_v29  ;;  %3812 = vmatprep.mubr.f32.mxu1 %v2641_v57  ;;  %2684 = vst [vmem:[#allocation3 + $0xe1] sm:$0xff] %v2652_v5  ;;  %v2651_v39 = vmax.f32 %v7235_v27, 0.0  ;;  %v2582_v13 = vmul.f32 %v7039_v3, %v2489_v59  ;;  %v2504_v33 = vadd.f32 %v5207_v45, %v6960_v43  ;;  %v3666_v57 = vld [vmem:[%s8119_s4 + $0x330] sm:$0xff] }
 0x236   : > { %v7254_v48 = vadd.f32 %v7048_v23, %v2583_v50  ;;  %4027 = vmatprep.mubr.f32.mxu0 %v7248_v2  ;;  %4399 = vmatprep.subr.mxu0 %v6997_v17  ;;  %v2498_v8 = vpop.f32.mrf.mxu0 }
 0x237   : > { %4400 = vmatpush1.msra.mxu0 %v3667_v46  ;;  %2683 = vst [vmem:[#allocation3 + $0xd9] sm:$0xff] %v2651_v39  ;;  %v7267_v53 = vadd.f32 %v7048_v23, %v2582_v13  ;;  %v2585_v43 = vmul.f32 %v7039_v3, %v2504_v33  ;;  %v2499_v20 = vadd.f32 %v2498_v8, %v6953_v47  ;;  %v3664_v13 = vld [vmem:[%s8119_s4 + $0x320] sm:$0xff]  ;;  %v7310_v8 = vld [vmem:[#allocation3 + $0x78] sm:$0xff] }
 0x238   : > { %v2654_v38 = vmax.f32 %v7254_v48, 0.0  ;;  %3813 = vmatmul.mubr.f32.gmra.mxu1 %v7248_v2  ;;  %4401 = vmatprep.subr.mxu0 %v6997_v17  ;;  %v5210_v51 = vpop.f32.mrf.mxu0  ;;  %v3678_v48 = vld [vmem:[%s8119_s4 + $0x390] sm:$0xff] }
 0x239   : > { %4028 = vmatmul.mubr.f32.gmra.mxu0 %v7272_v6  ;;  %3817 = vmatprep.mubr.f32.mxu1 %v2642_v56  ;;  %v2653_v47 = vmax.f32 %v7267_v53, 0.0  ;;  %v7287_v44 = vadd.f32 %v7048_v23, %v2585_v43  ;;  %v2584_v9 = vmul.f32 %v7039_v3, %v2499_v20  ;;  %v2514_v50 = vadd.f32 %v5210_v51, %v6974_v30  ;;  %v7302_v30 = vld [vmem:[#allocation3 + $0x52] sm:$0xff] }
 0x23a   : > { %2686 = vst [vmem:[#allocation3 + $0xf9] sm:$0xff] %v2654_v38  ;;  %4032 = vmatprep.mubr.f32.mxu0 %v7278_v7  ;;  %4402 = vmatpush1.msra.mxu0 %v3666_v57  ;;  %v2508_v58 = vpop.f32.mrf.mxu0 }
 0x23b   : > { %4403 = vmatprep.subr.mxu0 %v6997_v17  ;;  %2685 = vst [vmem:[#allocation3 + $0xf1] sm:$0xff] %v2653_v47  ;;  %v2656_v56 = vmax.f32 %v7287_v44, 0.0  ;;  %v7297_v59 = vadd.f32 %v7048_v23, %v2584_v9  ;;  %v2587_v46 = vmul.f32 %v7039_v3, %v2514_v50  ;;  %v2509_v45 = vadd.f32 %v2508_v58, %v6967_v37  ;;  %v7334_v50 = vld [vmem:[#allocation3 + $0x62] sm:$0xff] }
 0x23c   : > { %3818 = vmatmul.mubr.f32.gmra.mxu1 %v7278_v7  ;;  %4404 = vmatpush1.msra.mxu0 %v3665_v14  ;;  %v5213_v33 = vpop.f32.mrf.mxu0 }
 0x23d   : > { %4033 = vmatmul.mubr.f32.gmra.mxu0 %v7302_v30  ;;  %3822 = vmatprep.mubr.f32.mxu1 %v2643_v16  ;;  %2688 = vst [vmem:[#allocation3 + $0x111] sm:$0xff] %v2656_v56  ;;  %v2655_v37 = vmax.f32 %v7297_v59, 0.0  ;;  %v7316_v57 = vadd.f32 %v7048_v23, %v2587_v46  ;;  %v2586_v43 = vmul.f32 %v7039_v3, %v2509_v45  ;;  %v3663_v16 = vld [vmem:[%s8119_s4 + $0x318] sm:$0xff]  ;;  %v7340_v46 = vld [vmem:[#allocation3 + $0x80] sm:$0xff] }
 0x23e   : > { %v2524_v20 = vadd.f32 %v5213_v33, %v6988_v0  ;;  %4037 = vmatprep.mubr.f32.mxu0 %v7310_v8  ;;  %4405 = vmatprep.subr.mxu0 %v6997_v17  ;;  %v2518_v54 = vpop.f32.mrf.mxu0  ;;  %v3662_v45 = vld [vmem:[%s8119_s4 + $0x310] sm:$0xff] }
 0x23f   : > { %4406 = vmatpush1.msra.mxu0 %v3664_v13  ;;  %2687 = vst [vmem:[#allocation3 + $0x109] sm:$0xff] %v2655_v37  ;;  %v2658_v51 = vmax.f32 %v7316_v57, 0.0  ;;  %v7329_v14 = vadd.f32 %v7048_v23, %v2586_v43  ;;  %v2519_v9 = vadd.f32 %v2518_v54, %v6981_v40  ;;  %v7522_v27 = vld [vmem:[#allocation3 + $0xe0] sm:$0xff] }
 0x240   : > { %v2589_v0 = vmul.f32 %v7039_v3, %v2524_v20  ;;  %3823 = vmatmul.mubr.f32.gmra.mxu1 %v7310_v8  ;;  %4407 = vmatprep.subr.mxu0 %v6997_v17  ;;  %v5216_v58 = vpop.f32.mrf.mxu0 }
 0x241   : > { %4038 = vmatmul.mubr.f32.gmra.mxu0 %v7334_v50  ;;  %3827 = vmatprep.mubr.f32.mxu1 %v2644_v25  ;;  %2690 = vst [vmem:[#allocation3 + $0x129] sm:$0xff] %v2658_v51  ;;  %v2657_v40 = vmax.f32 %v7329_v14, 0.0  ;;  %v2588_v33 = vmul.f32 %v7039_v3, %v2519_v9  ;;  %v2534_v43 = vadd.f32 %v5216_v58, %v7004_v63  ;;  %v7374_v9 = vld [vmem:[#allocation3 + $0x90] sm:$0xff] }
 0x242   : > { %v7349_v13 = vadd.f32 %v7048_v23, %v2589_v0  ;;  %4042 = vmatprep.mubr.f32.mxu0 %v7340_v46  ;;  %4408 = vmatpush1.msra.mxu0 %v3663_v16  ;;  %v2528_v25 = vpop.f32.mrf.mxu0  ;;  %v7366_v16 = vld [vmem:[#allocation3 + $0x6a] sm:$0xff]  ;;  %v7552_v53 = vld [vmem:[#allocation3 + $0xf8] sm:$0xff] }
 0x243   : > { %4409 = vmatprep.subr.mxu0 %v6997_v17  ;;  %2689 = vst [vmem:[#allocation3 + $0x121] sm:$0xff] %v2657_v40  ;;  %v7361_v54 = vadd.f32 %v7048_v23, %v2588_v33  ;;  %v2591_v0 = vmul.f32 %v7039_v3, %v2534_v43  ;;  %v2529_v63 = vadd.f32 %v2528_v25, %v6995_v26  ;;  %v3660_v43 = vld [vmem:[%s8119_s4 + $0x300] sm:$0xff] }
 0x244   : > { %v8127_v20 = vmax.f32 %v7349_v13, 0.0  ;;  %3828 = vmatmul.mubr.f32.gmra.mxu1 %v7340_v46  ;;  %4410 = vmatpush1.msra.mxu0 %v3662_v45  ;;  %v5219_v52 = vpop.f32.mrf.mxu0  ;;  %v7608_v14 = vld [vmem:[#allocation3 + $0x112] sm:$0xff] }
 0x245   : > { %4043 = vmatmul.mubr.f32.gmra.mxu0 %v7366_v16  ;;  %3832 = vmatprep.mubr.f32.mxu1 %v2645_v4  ;;  %v2659_v26 = vmax.f32 %v7361_v54, 0.0  ;;  %v7380_v58 = vadd.f32 %v7048_v23, %v2591_v0  ;;  %v2590_v45 = vmul.f32 %v7039_v3, %v2529_v63  ;;  %v2544_v33 = vadd.f32 %v5219_v52, %v7018_v28  ;;  %v3691_v52 = vld [vmem:[%s8119_s4 + $0x3f8] sm:$0xff] }
 0x246   : > { %2692 = vst [vmem:[#allocation3 + $0x141] sm:$0xff] %v8127_v20  ;;  %4047 = vmatprep.mubr.f32.mxu0 %v7374_v9  ;;  %4411 = vmatprep.subr.mxu0 %v6997_v17  ;;  %v2538_v4 = vpop.f32.mrf.mxu0  ;;  %v7582_v59 = vld [vmem:[#allocation3 + $0x110] sm:$0xff] }
 0x247   : > { %4412 = vmatpush1.msra.mxu0 %v3661_v18  ;;  %2691 = vst [vmem:[#allocation3 + $0x139] sm:$0xff] %v2659_v26  ;;  %v8126_v25 = vmax.f32 %v7380_v58, 0.0  ;;  %v7394_v0 = vadd.f32 %v7048_v23, %v2590_v45  ;;  %v2593_v28 = vmul.f32 %v7039_v3, %v2544_v33  ;;  %v2539_v63 = vadd.f32 %v2538_v4, %v7011_v61  ;;  %v7405_v18 = vld [vmem:[#allocation3 + $0x98] sm:$0xff] }
 0x248   : > { %3833 = vmatmul.mubr.f32.gmra.mxu1 %v7374_v9  ;;  %4413 = vmatprep.subr.mxu0 %v6997_v17  ;;  %v5222_v35 = vpop.f32.mrf.mxu0  ;;  %v7626_v54 = vld [vmem:[#allocation3 + $0x12a] sm:$0xff] }
 0x249   : > { %4048 = vmatmul.mubr.f32.gmra.mxu0 %v7399_v36  ;;  %3837 = vmatprep.mubr.f32.mxu1 %v2646_v31  ;;  %2694 = vst [vmem:[#allocation3 + $0x159] sm:$0xff] %v8126_v25  ;;  %v2661_v61 = vmax.f32 %v7394_v0, 0.0  ;;  %v7414_v45 = vadd.f32 %v7048_v23, %v2593_v28  ;;  %v2592_v33 = vmul.f32 %v7039_v3, %v2539_v63  ;;  %v7436_v63 = vld [vmem:[#allocation3 + $0xa8] sm:$0xff] }
 0x24a   : > { %v2554_v4 = vadd.f32 %v5222_v35, %v2329_v21  ;;  %4052 = vmatprep.mubr.f32.mxu0 %v7405_v18  ;;  %4414 = vmatpush1.msra.mxu0 %v3660_v43  ;;  %v2548_v55 = vpop.f32.mrf.mxu0  ;;  %v7428_v21 = vld [vmem:[#allocation3 + $0x82] sm:$0xff] }
 0x24b   : > { %4415 = vmatprep.subr.mxu0 %v6997_v17  ;;  %2693 = vst [vmem:[#allocation3 + $0x151] sm:$0xff] %v2661_v61  ;;  %v2664_v31 = vmax.f32 %v7414_v45, 0.0  ;;  %v7423_v25 = vadd.f32 %v7048_v23, %v2592_v33  ;;  %v2549_v20 = vadd.f32 %v2548_v55, %v7025_v19  ;;  %v3690_v43 = vld [vmem:[%s8119_s4 + $0x3f0] sm:$0xff] }
 0x24c   : > { %v2595_v28 = vmul.f32 %v7039_v3, %v2554_v4  ;;  %3838 = vmatmul.mubr.f32.gmra.mxu1 %v7405_v18  ;;  %4416 = vmatpush2.msra.mxu0 %v3691_v52  ;;  %v7452_v4 = vld [vmem:[#allocation3 + $0x92] sm:$0xff]  ;;  %v7595_v44 = vld [vmem:[#allocation3 + $0x120] sm:$0xff] }
 0x24d   : > { %4053 = vmatmul.mubr.f32.gmra.mxu0 %v7428_v21  ;;  %3842 = vmatprep.mubr.f32.mxu1 %v2647_v15  ;;  %2696 = vst [vmem:[#allocation3 + $0x171] sm:$0xff] %v2664_v31  ;;  %v2663_v19 = vmax.f32 %v7423_v25, 0.0  ;;  %v2594_v52 = vmul.f32 %v7039_v3, %v2549_v20  ;;  %v7458_v3 = vld [vmem:[#allocation3 + $0xb0] sm:$0xff]  ;;  %v7617_v57 = vld [vmem:[#allocation3 + $0x122] sm:$0xff] }
 0x24e   : > { %v2634_v35 = vadd.f32 %v7048_v23, %v2595_v28  ;;  %4057 = vmatprep.mubr.f32.mxu0 %v7436_v63  ;;  %4417 = vmatprep.subr.mxu0 %v6997_v17  ;;  %v3688_v20 = vld [vmem:[%s8119_s4 + $0x3e0] sm:$0xff]  ;;  %v7478_v28 = vpop.f32.mrf.mxu1  ;;  %v7644_v0 = vld [vmem:[#allocation3 + $0x142] sm:$0xff] }
 0x24f   : > { %4418 = vmatpush2.msra.mxu0 %v3690_v43  ;;  %2695 = vst [vmem:[#allocation3 + $0x169] sm:$0xff] %v2663_v19  ;;  %v2633_v33 = vadd.f32 %v7048_v23, %v2594_v52  ;;  %v7466_v23 = vld [vmem:[#allocation3 + $0x9a] sm:$0xff] }
 0x250   : > { %v2666_v15 = vmax.f32 %v2634_v35, 0.0  ;;  %3843 = vmatmul.mubr.f32.gmra.mxu1 %v7436_v63  ;;  %4419 = vmatprep.subr.mxu0 %v6997_v17  ;;  %v3686_v43 = vld [vmem:[%s8119_s4 + $0x3d0] sm:$0xff]  ;;  %v7484_v35 = vld [vmem:[#allocation3 + $0xaa] sm:$0xff]  ;;  %v3776_v62 = vpop.f32.mrf.mxu1  ;;  %v3685_v52 = vld [vmem:[%s8119_s4 + $0x3c8] sm:$0xff] }
 0x251   : > { %4058 = vmatmul.mubr.f32.gmra.mxu0 %v7452_v4  ;;  %3847 = vmatprep.mubr.f32.mxu1 %v2648_v10  ;;  %v2665_v55 = vmax.f32 %v2633_v33, 0.0  ;;  %v7474_v10 = vld [vmem:[#allocation3 + $0xc0] sm:$0xff]  ;;  %v7508_v33 = vld [vmem:[#allocation3 + $0xd8] sm:$0xff] }
 0x252   : > { %2698 = vst [vmem:[#allocation3 + $0x189] sm:$0xff] %v2666_v15  ;;  %4062 = vmatprep.mubr.f32.mxu0 %v7458_v3  ;;  %4420 = vmatpush2.msra.mxu0 %v3689_v49  ;;  %v7496_v49 = vpop.f32.mrf.mxu1  ;;  %v7500_v15 = vld [vmem:[#allocation3 + $0xb2] sm:$0xff]  ;;  %v7546_v62 = vld [vmem:[#allocation3 + $0xda] sm:$0xff] }
 0x253   : > { %4421 = vmatprep.subr.mxu0 %v6997_v17  ;;  %2697 = vst [vmem:[#allocation3 + $0x181] sm:$0xff] %v2665_v55  ;;  %v7516_v55 = vld [vmem:[#allocation3 + $0xc2] sm:$0xff]  ;;  %v7662_v25 = vld [vmem:[#allocation3 + $0x15a] sm:$0xff] }
 0x254   : > { %3848 = vmatmul.mubr.f32.gmra.mxu1 %v7458_v3  ;;  %4422 = vmatpush2.msra.mxu0 %v3688_v20  ;;  %v3683_v20 = vld [vmem:[%s8119_s4 + $0x3b8] sm:$0xff]  ;;  %v3706_v45 = vld [vmem:[%s8119_s4 + $0x470] sm:$0xff] }
 0x255   : > { %4063 = vmatmul.mubr.f32.gmra.mxu0 %v7466_v23  ;;  %3852 = vmatprep.mubr.f32.mxu1 %v2649_v1  ;;  %v7490_v1 = vld [vmem:[#allocation3 + $0xc8] sm:$0xff] }
 0x256   : > { %4067 = vmatprep.mubr.f32.mxu0 %v7474_v10  ;;  %4423 = vmatprep.subr.mxu0 %v6997_v17 }
 0x257   : > { %4424 = vmatpush2.msra.mxu0 %v3687_v11  ;;  %v7530_v11 = vld [vmem:[#allocation3 + $0xca] sm:$0xff] }
 0x258   : > { %3853 = vmatmul.mubr.f32.gmra.mxu1 %v7474_v10  ;;  %4425 = vmatprep.subr.mxu0 %v6997_v17 }
 0x259   : > { %4068 = vmatmul.mubr.f32.gmra.mxu0 %v7484_v35  ;;  %3857 = vmatprep.mubr.f32.mxu1 %v2650_v41  ;;  %v3781_v41 = vpop.f32.mrf.mxu1 }
 0x25a   : > { %4072 = vmatprep.mubr.f32.mxu0 %v7490_v1  ;;  %4426 = vmatpush2.msra.mxu0 %v3686_v43  ;;  %v3680_v43 = vld [vmem:[%s8119_s4 + $0x3a0] sm:$0xff] }
 0x25b   : > { %4427 = vmatprep.subr.mxu0 %v6997_v17  ;;  %v7576_v41 = vld [vmem:[#allocation3 + $0xf2] sm:$0xff] }
 0x25c   : > { %3858 = vmatmul.mubr.f32.gmra.mxu1 %v7490_v1  ;;  %4428 = vmatpush2.msra.mxu0 %v3685_v52  ;;  %v7560_v52 = vld [vmem:[#allocation3 + $0xe2] sm:$0xff] }
 0x25d   : > { %4073 = vmatmul.mubr.f32.gmra.mxu0 %v7500_v15  ;;  %3862 = vmatprep.mubr.f32.mxu1 %v2651_v39  ;;  %v3682_v39 = vld [vmem:[%s8119_s4 + $0x3b0] sm:$0xff] }
 0x25e   : > { %4077 = vmatprep.mubr.f32.mxu0 %v7508_v33  ;;  %4429 = vmatprep.subr.mxu0 %v6997_v17 }
 0x25f   : > { %4430 = vmatpush2.msra.mxu0 %v3684_v22  ;;  %v3677_v22 = vld [vmem:[%s8119_s4 + $0x388] sm:$0xff] }
 0x260   : > { %3863 = vmatmul.mubr.f32.gmra.mxu1 %v7508_v33  ;;  %4431 = vmatprep.subr.mxu0 %v6997_v17 }
 0x261   : > { %4078 = vmatmul.mubr.f32.gmra.mxu0 %v7516_v55  ;;  %3867 = vmatprep.mubr.f32.mxu1 %v2652_v5  ;;  %v7538_v5 = vld [vmem:[#allocation3 + $0xf0] sm:$0xff] }
 0x262   : > { %4082 = vmatprep.mubr.f32.mxu0 %v7522_v27  ;;  %4432 = vmatpush2.msra.mxu0 %v3683_v20  ;;  %v7590_v20 = vld [vmem:[#allocation3 + $0xfa] sm:$0xff] }
 0x263   : > { %4433 = vmatprep.subr.mxu0 %v6997_v17 }
 0x264   : > { %3868 = vmatmul.mubr.f32.gmra.mxu1 %v7522_v27  ;;  %4434 = vmatpush2.msra.mxu0 %v3682_v39  ;;  %v7622_v39 = vld [vmem:[#allocation3 + $0x140] sm:$0xff] }
 0x265   : > { %4083 = vmatmul.mubr.f32.gmra.mxu0 %v7530_v11  ;;  %3872 = vmatprep.mubr.f32.mxu1 %v2653_v47  ;;  %v3679_v47 = vld [vmem:[%s8119_s4 + $0x398] sm:$0xff] }
 0x266   : > { %4087 = vmatprep.mubr.f32.mxu0 %v7538_v5  ;;  %4435 = vmatprep.subr.mxu0 %v6997_v17 }
 0x267   : > { %4436 = vmatpush2.msra.mxu0 %v3681_v24  ;;  %v8135_v24 = vmax.f32 %v7380_v58, 0.0  ;;  %v7653_v58 = vld [vmem:[#allocation3 + $0x152] sm:$0xff] }
 0x268   : > { %3873 = vmatmul.mubr.f32.gmra.mxu1 %v7538_v5  ;;  %4437 = vmatprep.subr.mxu0 %v6997_v17 }
 0x269   : > { %4088 = vmatmul.mubr.f32.gmra.mxu0 %v7546_v62  ;;  %3877 = vmatprep.mubr.f32.mxu1 %v2654_v38  ;;  %v7568_v38 = vld [vmem:[#allocation3 + $0x108] sm:$0xff] }
 0x26a   : > { %4092 = vmatprep.mubr.f32.mxu0 %v7552_v53  ;;  %4438 = vmatpush2.msra.mxu0 %v3680_v43  ;;  %v7640_v43 = vld [vmem:[#allocation3 + $0x158] sm:$0xff] }
 0x26b   : > { %4439 = vmatprep.subr.mxu0 %v6997_v17 }
 0x26c   : > { %3878 = vmatmul.mubr.f32.gmra.mxu1 %v7552_v53  ;;  %4440 = vmatpush2.msra.mxu0 %v3679_v47  ;;  %v7658_v47 = vld [vmem:[#allocation3 + $0x170] sm:$0xff] }
 0x26d   : > { %4093 = vmatmul.mubr.f32.gmra.mxu0 %v7560_v52  ;;  %3882 = vmatprep.mubr.f32.mxu1 %v2655_v37  ;;  %v3676_v37 = vld [vmem:[%s8119_s4 + $0x380] sm:$0xff] }
 0x26e   : > { %4097 = vmatprep.mubr.f32.mxu0 %v7568_v38  ;;  %4441 = vmatprep.subr.mxu0 %v6997_v17 }
 0x26f   : > { %4442 = vmatpush2.msra.mxu0 %v3678_v48  ;;  %v2955_v48 = vld [vmem:[#allocation3 + $0x19] sm:$0xff] }
 0x270   : > { %3883 = vmatmul.mubr.f32.gmra.mxu1 %v7568_v38  ;;  %4443 = vmatprep.subr.mxu0 %v6997_v17 }
 0x271   : > { %4098 = vmatmul.mubr.f32.gmra.mxu0 %v7576_v41  ;;  %3887 = vmatprep.mubr.f32.mxu1 %v2656_v56  ;;  %v7599_v56 = vld [vmem:[#allocation3 + $0x10a] sm:$0xff] }
 0x272   : > { %4102 = vmatprep.mubr.f32.mxu0 %v7582_v59  ;;  %4444 = vmatpush2.msra.mxu0 %v3677_v22  ;;  %v7669_v22 = vld [vmem:[#allocation3 + $0x16a] sm:$0xff] }
 0x273   : > { %4445 = vmatprep.subr.mxu0 %v6997_v17  ;;  %v7604_v17 = vld [vmem:[#allocation3 + $0x128] sm:$0xff] }
 0x274   : > { %3888 = vmatmul.mubr.f32.gmra.mxu1 %v7582_v59  ;;  %4446 = vmatpush2.msra.mxu0 %v3676_v37  ;;  %v7680_v37 = vld [vmem:[#allocation3 + $0x172] sm:$0xff] }
 0x275   : > { %4103 = vmatmul.mubr.f32.gmra.mxu0 %v7590_v20  ;;  %3892 = vmatprep.mubr.f32.mxu1 %v2657_v40  ;;  %v7613_v40 = vld [vmem:[#allocation3 + $0x138] sm:$0xff] }
 0x276   : > { %4107 = vmatprep.mubr.f32.mxu0 %v7595_v44 }
 0x278   : > { %3893 = vmatmul.mubr.f32.gmra.mxu1 %v7595_v44 }
 0x279   : > { %4108 = vmatmul.mubr.f32.gmra.mxu0 %v7599_v56  ;;  %3897 = vmatprep.mubr.f32.mxu1 %v2658_v51  ;;  %v8134_v51 = vmax.f32 %v7349_v13, 0.0  ;;  %v7635_v13 = vld [vmem:[#allocation3 + $0x13a] sm:$0xff] }
 0x27a   : > { %4112 = vmatprep.mubr.f32.mxu0 %v7604_v17 }
 0x27c   : > { %3898 = vmatmul.mubr.f32.gmra.mxu1 %v7604_v17 }
 0x27d   : > { %4113 = vmatmul.mubr.f32.gmra.mxu0 %v7608_v14  ;;  %3902 = vmatprep.mubr.f32.mxu1 %v2659_v26  ;;  %v7631_v26 = vld [vmem:[#allocation3 + $0x150] sm:$0xff] }
 0x27e   : > { %4117 = vmatprep.mubr.f32.mxu0 %v7613_v40 }
 0x280   : > { %3903 = vmatmul.mubr.f32.gmra.mxu1 %v7613_v40 }
 0x281   : > { %4118 = vmatmul.mubr.f32.gmra.mxu0 %v7617_v57  ;;  %3907 = vmatprep.mubr.f32.mxu1 %v8134_v51  ;;  %v3705_v51 = vld [vmem:[%s8119_s4 + $0x468] sm:$0xff] }
 0x282   : > { %4122 = vmatprep.mubr.f32.mxu0 %v7622_v39 }
 0x284   : > { %3908 = vmatmul.mubr.f32.gmra.mxu1 %v7622_v39 }
 0x285   : > { %4123 = vmatmul.mubr.f32.gmra.mxu0 %v7626_v54  ;;  %3912 = vmatprep.mubr.f32.mxu1 %v2661_v61  ;;  %v7649_v61 = vld [vmem:[#allocation3 + $0x168] sm:$0xff] }
 0x286   : > { %4127 = vmatprep.mubr.f32.mxu0 %v7631_v26 }
 0x288   : > { %3913 = vmatmul.mubr.f32.gmra.mxu1 %v7631_v26 }
 0x289   : > { %4128 = vmatmul.mubr.f32.gmra.mxu0 %v7635_v13  ;;  %3917 = vmatprep.mubr.f32.mxu1 %v8135_v24  ;;  %v3148_v24 = vld [vmem:[#allocation3 + $0x31] sm:$0xff] }
 0x28a   : > { %4132 = vmatprep.mubr.f32.mxu0 %v7640_v43 }
 0x28c   : > { %3918 = vmatmul.mubr.f32.gmra.mxu1 %v7640_v43 }
 0x28d   : > { %4133 = vmatmul.mubr.f32.gmra.mxu0 %v7644_v0  ;;  %3922 = vmatprep.mubr.f32.mxu1 %v2663_v19  ;;  %v7665_v19 = vld [vmem:[#allocation3 + $0x180] sm:$0xff] }
 0x28e   : > { %4137 = vmatprep.mubr.f32.mxu0 %v7649_v61 }
 0x290   : > { %3923 = vmatmul.mubr.f32.gmra.mxu1 %v7649_v61 }
 0x291   : > { %4138 = vmatmul.mubr.f32.gmra.mxu0 %v7653_v58  ;;  %3927 = vmatprep.mubr.f32.mxu1 %v2664_v31  ;;  %v7675_v31 = vld [vmem:[#allocation3 + $0x188] sm:$0xff] }
 0x292   : > { %4142 = vmatprep.mubr.f32.mxu0 %v7658_v47 }
 0x294   : > { %3928 = vmatmul.mubr.f32.gmra.mxu1 %v7658_v47 }
 0x295   : > { %4143 = vmatmul.mubr.f32.gmra.mxu0 %v7662_v25  ;;  %4222 = vmatprep.mubr.f32.mxu1 %v7156_v12  ;;  %v2956_v12 = vld [vmem:[#allocation3 + $0x21] sm:$0xff] }
 0x296   : > { %4147 = vmatprep.mubr.f32.mxu0 %v7665_v19 }
 0x298   : > { %4223 = vmatmul.mubr.f32.vlgmr.msra.gmra.mxu1 %v2955_v48  ;;  %v3149_v48 = vld [vmem:[#allocation3 + $0x39] sm:$0xff] }
 0x299   : > { %4148 = vmatmul.mubr.f32.gmra.mxu0 %v7669_v22  ;;  %4227 = vmatprep.mubr.f32.mxu1 %v7182_v60  ;;  %v3084_v60 = vld [vmem:[#allocation3 + $0x30] sm:$0xff] }
 0x29a   : > { %4152 = vmatprep.mubr.f32.mxu0 %v7675_v31  ;;  %5224 = vmatpush3.msra.mxu1 %v7078_v32  ;;  %v3704_v32 = vld [vmem:[%s8119_s4 + $0x460] sm:$0xff] }
 0x29b   : > { %5225 = vmatprep.subr.mxu1 %v3706_v45 }
 0x29c   : > { %4228 = vmatmul.mubr.f32.gmra.mxu1 %v2956_v12  ;;  %v3085_v12 = vld [vmem:[#allocation3 + $0x38] sm:$0xff] }
 0x29d   : > { %4153 = vmatmul.mubr.f32.gmra.mxu0 %v7680_v37  ;;  %4232 = vmatprep.mubr.f32.mxu1 %v7210_v34  ;;  %v3703_v34 = vld [vmem:[%s8119_s4 + $0x458] sm:$0xff] }
 0x29e   : > { %4447 = vmatprep.mubr.f32.mxu0 %v3148_v24  ;;  %5226 = vmatpush3.msra.mxu1 %v3706_v45  ;;  %v3150_v45 = vld [vmem:[#allocation3 + $0x49] sm:$0xff] }
 0x29f   : > { %5227 = vmatprep.subr.mxu1 %v3705_v51 }
 0x2a0   : > { %4233 = vmatmul.mubr.f32.gmra.mxu1 %v3148_v24  ;;  %v3086_v24 = vld [vmem:[#allocation3 + $0x48] sm:$0xff] }
 0x2a1   : > { %4448 = vmatmul.mubr.f32.vlgmr.msra.gmra.mxu0 %v3084_v60  ;;  %4237 = vmatprep.mubr.f32.mxu1 %v7240_v29  ;;  %v3702_v29 = vld [vmem:[%s8119_s4 + $0x450] sm:$0xff] }
 0x2a2   : > { %4452 = vmatprep.mubr.f32.mxu0 %v3149_v48  ;;  %5228 = vmatpush3.msra.mxu1 %v3705_v51  ;;  %v3151_v51 = vld [vmem:[#allocation3 + $0x51] sm:$0xff]  ;;  %v3152_v60 = vld [vmem:[#allocation3 + $0x61] sm:$0xff] }
 0x2a3   : > { %5229 = vmatprep.subr.mxu1 %v3704_v32 }
 0x2a4   : > { %4238 = vmatmul.mubr.f32.gmra.mxu1 %v3149_v48 }
 0x2a5   : > { %4453 = vmatmul.mubr.f32.gmra.mxu0 %v3085_v12  ;;  %4242 = vmatprep.mubr.f32.mxu1 %v7272_v6  ;;  %v3701_v6 = vld [vmem:[%s8119_s4 + $0x448] sm:$0xff] }
 0x2a6   : > { %4457 = vmatprep.mubr.f32.mxu0 %v3150_v45  ;;  %5230 = vmatpush3.msra.mxu1 %v3704_v32  ;;  %v3153_v32 = vld [vmem:[#allocation3 + $0x69] sm:$0xff] }
 0x2a7   : > { %5231 = vmatprep.subr.mxu1 %v3703_v34 }
 0x2a8   : > { %4243 = vmatmul.mubr.f32.gmra.mxu1 %v3150_v45 }
 0x2a9   : > { %4458 = vmatmul.mubr.f32.gmra.mxu0 %v3086_v24  ;;  %4247 = vmatprep.mubr.f32.mxu1 %v7302_v30  ;;  %v3700_v30 = vld [vmem:[%s8119_s4 + $0x440] sm:$0xff] }
 0x2aa   : > { %4462 = vmatprep.mubr.f32.mxu0 %v3151_v51  ;;  %5232 = vmatpush3.msra.mxu1 %v3703_v34 }
 0x2ab   : > { %5233 = vmatprep.subr.mxu1 %v3702_v29 }
 0x2ac   : > { %4248 = vmatmul.mubr.f32.gmra.mxu1 %v3151_v51 }
 0x2ad   : > { %4463 = vmatmul.mubr.f32.gmra.mxu0 %v7216_v42  ;;  %4252 = vmatprep.mubr.f32.mxu1 %v7334_v50  ;;  %v3699_v42 = vld [vmem:[%s8119_s4 + $0x438] sm:$0xff]  ;;  %v3154_v50 = vld [vmem:[#allocation3 + $0x79] sm:$0xff] }
 0x2ae   : > { %4467 = vmatprep.mubr.f32.mxu0 %v3152_v60  ;;  %5234 = vmatpush3.msra.mxu1 %v3702_v29 }
 0x2af   : > { %5235 = vmatprep.subr.mxu1 %v3701_v6 }
 0x2b0   : > { %4253 = vmatmul.mubr.f32.gmra.mxu1 %v3152_v60 }
 0x2b1   : > { %4468 = vmatmul.mubr.f32.gmra.mxu0 %v7248_v2  ;;  %4257 = vmatprep.mubr.f32.mxu1 %v7366_v16  ;;  %v3698_v2 = vld [vmem:[%s8119_s4 + $0x430] sm:$0xff] }
 0x2b2   : > { %4472 = vmatprep.mubr.f32.mxu0 %v3153_v32  ;;  %5236 = vmatpush3.msra.mxu1 %v3701_v6  ;;  %v3155_v16 = vld [vmem:[#allocation3 + $0x81] sm:$0xff] }
 0x2b3   : > { %5237 = vmatprep.subr.mxu1 %v3700_v30  ;;  %v3168_v6 = vld [vmem:[#allocation3 + $0x121] sm:$0xff] }
 0x2b4   : > { %4258 = vmatmul.mubr.f32.gmra.mxu1 %v3153_v32 }
 0x2b5   : > { %4473 = vmatmul.mubr.f32.gmra.mxu0 %v7278_v7  ;;  %4262 = vmatprep.mubr.f32.mxu1 %v7399_v36  ;;  %v3697_v7 = vld [vmem:[%s8119_s4 + $0x428] sm:$0xff] }
 0x2b6   : > { %4477 = vmatprep.mubr.f32.mxu0 %v3154_v50  ;;  %5238 = vmatpush3.msra.mxu1 %v3700_v30  ;;  %v3156_v36 = vld [vmem:[#allocation3 + $0x91] sm:$0xff] }
 0x2b7   : > { %5239 = vmatprep.subr.mxu1 %v3699_v42 }
 0x2b8   : > { %4263 = vmatmul.mubr.f32.gmra.mxu1 %v3154_v50 }
 0x2b9   : > { %4478 = vmatmul.mubr.f32.gmra.mxu0 %v7310_v8  ;;  %4267 = vmatprep.mubr.f32.mxu1 %v7428_v21  ;;  %v3696_v8 = vld [vmem:[%s8119_s4 + $0x420] sm:$0xff]  ;;  %v3157_v21 = vld [vmem:[#allocation3 + $0x99] sm:$0xff] }
 0x2ba   : > { %4482 = vmatprep.mubr.f32.mxu0 %v3155_v16  ;;  %5240 = vmatpush3.msra.mxu1 %v3699_v42  ;;  %v3169_v42 = vld [vmem:[#allocation3 + $0x129] sm:$0xff] }
 0x2bb   : > { %5241 = vmatprep.subr.mxu1 %v3698_v2 }
 0x2bc   : > { %4268 = vmatmul.mubr.f32.gmra.mxu1 %v3155_v16 }
 0x2bd   : > { %4483 = vmatmul.mubr.f32.gmra.mxu0 %v7340_v46  ;;  %4272 = vmatprep.mubr.f32.mxu1 %v7452_v4  ;;  %v3695_v46 = vld [vmem:[%s8119_s4 + $0x418] sm:$0xff] }
 0x2be   : > { %4487 = vmatprep.mubr.f32.mxu0 %v3156_v36  ;;  %5242 = vmatpush3.msra.mxu1 %v3698_v2  ;;  %v3158_v4 = vld [vmem:[#allocation3 + $0xa9] sm:$0xff] }
 0x2bf   : > { %5243 = vmatprep.subr.mxu1 %v3697_v7 }
 0x2c0   : > { %4273 = vmatmul.mubr.f32.gmra.mxu1 %v3156_v36 }
 0x2c1   : > { %4488 = vmatmul.mubr.f32.gmra.mxu0 %v7374_v9  ;;  %4277 = vmatprep.mubr.f32.mxu1 %v7466_v23  ;;  %v3694_v9 = vld [vmem:[%s8119_s4 + $0x410] sm:$0xff]  ;;  %v3159_v23 = vld [vmem:[#allocation3 + $0xb1] sm:$0xff] }
 0x2c2   : > { %4492 = vmatprep.mubr.f32.mxu0 %v3157_v21  ;;  %5244 = vmatpush3.msra.mxu1 %v3697_v7  ;;  %v3170_v7 = vld [vmem:[#allocation3 + $0x139] sm:$0xff] }
 0x2c3   : > { %5245 = vmatprep.subr.mxu1 %v3696_v8 }
 0x2c4   : > { %4278 = vmatmul.mubr.f32.gmra.mxu1 %v3157_v21 }
 0x2c5   : > { %4493 = vmatmul.mubr.f32.gmra.mxu0 %v7405_v18  ;;  %4282 = vmatprep.mubr.f32.mxu1 %v7484_v35  ;;  %v3693_v18 = vld [vmem:[%s8119_s4 + $0x408] sm:$0xff]  ;;  %v3160_v35 = vld [vmem:[#allocation3 + $0xc1] sm:$0xff] }
 0x2c6   : > { %4497 = vmatprep.mubr.f32.mxu0 %v3158_v4  ;;  %5246 = vmatpush3.msra.mxu1 %v3696_v8 }
 0x2c7   : > { %5247 = vmatprep.subr.mxu1 %v3695_v46 }
 0x2c8   : > { %4283 = vmatmul.mubr.f32.gmra.mxu1 %v3158_v4 }
 0x2c9   : > { %4498 = vmatmul.mubr.f32.gmra.mxu0 %v7436_v63  ;;  %4287 = vmatprep.mubr.f32.mxu1 %v7500_v15  ;;  %v3692_v63 = vld [vmem:[%s8119_s4 + $0x400] sm:$0xff] }
 0x2ca   : > { %4502 = vmatprep.mubr.f32.mxu0 %v3159_v23  ;;  %5248 = vmatpush3.msra.mxu1 %v3695_v46  ;;  %v3161_v15 = vld [vmem:[#allocation3 + $0xc9] sm:$0xff]  ;;  %v3171_v46 = vld [vmem:[#allocation3 + $0x141] sm:$0xff] }
 0x2cb   : > { %5249 = vmatprep.subr.mxu1 %v3694_v9 }
 0x2cc   : > { %4288 = vmatmul.mubr.f32.gmra.mxu1 %v3159_v23 }
 0x2cd   : > { %4503 = vmatmul.mubr.f32.gmra.mxu0 %v7458_v3  ;;  %4292 = vmatprep.mubr.f32.mxu1 %v7516_v55  ;;  %v3162_v3 = vld [vmem:[#allocation3 + $0xd9] sm:$0xff]  ;;  %v3164_v55 = vld [vmem:[#allocation3 + $0xf1] sm:$0xff] }
 0x2ce   : > { %4507 = vmatprep.mubr.f32.mxu0 %v3160_v35  ;;  %5250 = vmatpush3.msra.mxu1 %v3694_v9 }
 0x2cf   : > { %5251 = vmatprep.subr.mxu1 %v3693_v18 }
 0x2d0   : > { %4293 = vmatmul.mubr.f32.gmra.mxu1 %v3160_v35 }
 0x2d1   : > { %4508 = vmatmul.mubr.f32.gmra.mxu0 %v7474_v10  ;;  %4297 = vmatprep.mubr.f32.mxu1 %v7530_v11  ;;  %v3163_v10 = vld [vmem:[#allocation3 + $0xe1] sm:$0xff] }
 0x2d2   : > { %4512 = vmatprep.mubr.f32.mxu0 %v3161_v15  ;;  %5252 = vmatpush3.msra.mxu1 %v3693_v18  ;;  %v3172_v18 = vld [vmem:[#allocation3 + $0x151] sm:$0xff] }
 0x2d3   : > { %5253 = vmatprep.subr.mxu1 %v3692_v63 }
 0x2d4   : > { %4298 = vmatmul.mubr.f32.gmra.mxu1 %v3161_v15 }
 0x2d5   : > { %4513 = vmatmul.mubr.f32.gmra.mxu0 %v7490_v1  ;;  %4302 = vmatprep.mubr.f32.mxu1 %v7546_v62 }
 0x2d6   : > { %4517 = vmatprep.mubr.f32.mxu0 %v3162_v3  ;;  %5254 = vmatpush3.msra.mxu1 %v3692_v63 }
 0x2d8   : > { %4303 = vmatmul.mubr.f32.gmra.mxu1 %v3162_v3  ;;  %v3173_v3 = vld [vmem:[#allocation3 + $0x159] sm:$0xff] }
 0x2d9   : > { %4518 = vmatmul.mubr.f32.gmra.mxu0 %v7508_v33  ;;  %4307 = vmatprep.mubr.f32.mxu1 %v7560_v52  ;;  %v3165_v33 = vld [vmem:[#allocation3 + $0xf9] sm:$0xff] }
 0x2da   : > { %4522 = vmatprep.mubr.f32.mxu0 %v3163_v10 }
 0x2dc   : > { %4308 = vmatmul.mubr.f32.gmra.mxu1 %v3163_v10 }
 0x2dd   : > { %4523 = vmatmul.mubr.f32.gmra.mxu0 %v7522_v27  ;;  %4312 = vmatprep.mubr.f32.mxu1 %v7576_v41  ;;  %v3166_v27 = vld [vmem:[#allocation3 + $0x109] sm:$0xff] }
 0x2de   : > { %4527 = vmatprep.mubr.f32.mxu0 %v3164_v55 }
 0x2e0   : > { %v3784_v1 = vpop.f32.mrf.mxu1  ;;  %4313 = vmatmul.mubr.f32.gmra.mxu1 %v3164_v55  ;;  %v7755_v11 = vpop.f32.mrf.mxu0 }
 0x2e1   : > { %4528 = vmatmul.mubr.f32.gmra.mxu0 %v7538_v5  ;;  %4317 = vmatprep.mubr.f32.mxu1 %v7590_v20  ;;  %v3167_v20 = vld [vmem:[#allocation3 + $0x111] sm:$0xff] }
 0x2e2   : > { %4532 = vmatprep.mubr.f32.mxu0 %v3165_v33  ;;  %v3786_v62 = vpop.f32.mrf.mxu1  ;;  %v4001_v52 = vpop.f32.mrf.mxu0 }
 0x2e4   : > { %v3789_v48 = vpop.f32.mrf.mxu1  ;;  %4318 = vmatmul.mubr.f32.gmra.mxu1 %v3165_v33  ;;  %v3174_v33 = vld [vmem:[#allocation3 + $0x169] sm:$0xff] }
 0x2e5   : > { %v7759_v12 = vpop.f32.mrf.mxu0  ;;  %4533 = vmatmul.mubr.f32.gmra.mxu0 %v7552_v53  ;;  %4322 = vmatprep.mubr.f32.mxu1 %v7599_v56 }
 0x2e6   : > { %4537 = vmatprep.mubr.f32.mxu0 %v3166_v27  ;;  %v3791_v41 = vpop.f32.mrf.mxu1 }
 0x2e7   : > { %v4006_v34 = vpop.f32.mrf.mxu0 }
 0x2e8   : > { %v3794_v45 = vpop.f32.mrf.mxu1  ;;  %4323 = vmatmul.mubr.f32.gmra.mxu1 %v3166_v27  ;;  %v3175_v27 = vld [vmem:[#allocation3 + $0x171] sm:$0xff] }
 0x2e9   : > { %v4009_v5 = vpop.f32.mrf.mxu0  ;;  %4538 = vmatmul.mubr.f32.gmra.mxu0 %v7568_v38  ;;  %4327 = vmatprep.mubr.f32.mxu1 %v7608_v14 }
 0x2ea   : > { %v7765_v24 = vadd.f32 %v4009_v5, %v3784_v1  ;;  %4542 = vmatprep.mubr.f32.mxu0 %v3167_v20  ;;  %v3796_v29 = vpop.f32.mrf.mxu1  ;;  %v7799_v5 = vld [vmem:[#allocation3 + $0x182] sm:$0xff] }
 0x2eb   : > { %v4011_v51 = vpop.f32.mrf.mxu0  ;;  %v3176_v29 = vld [vmem:[#allocation3 + $0x181] sm:$0xff] }
 0x2ec   : > { %v3799_v53 = vpop.f32.mrf.mxu1  ;;  %4328 = vmatmul.mubr.f32.gmra.mxu1 %v3167_v20 }
 0x2ed   : > { %v4014_v56 = vpop.f32.mrf.mxu0  ;;  %4543 = vmatmul.mubr.f32.gmra.mxu0 %v7582_v59  ;;  %4332 = vmatprep.mubr.f32.mxu1 %v7617_v57 }
 0x2ee   : > { %v7769_v60 = vadd.f32 %v4014_v56, %v3789_v48  ;;  %4547 = vmatprep.mubr.f32.mxu0 %v3168_v6  ;;  %v3801_v38 = vpop.f32.mrf.mxu1 }
 0x2ef   : > { %v4016_v30 = vpop.f32.mrf.mxu0 }
 0x2f0   : > { %v3804_v14 = vpop.f32.mrf.mxu1  ;;  %4333 = vmatmul.mubr.f32.gmra.mxu1 %v3168_v6  ;;  %v7805_v6 = vld [vmem:[#allocation3 + $0x18a] sm:$0xff] }
 0x2f1   : > { %v4019_v32 = vpop.f32.mrf.mxu0  ;;  %4548 = vmatmul.mubr.f32.gmra.mxu0 %v7595_v44  ;;  %4337 = vmatprep.mubr.f32.mxu1 %v7626_v54  ;;  %v3177_v30 = vld [vmem:[#allocation3 + $0x189] sm:$0xff] }
 0x2f2   : > { %v7773_v50 = vadd.f32 %v4019_v32, %v3794_v45  ;;  %4552 = vmatprep.mubr.f32.mxu0 %v3169_v42  ;;  %v3806_v59 = vpop.f32.mrf.mxu1 }
 0x2f3   : > { %v4021_v2 = vpop.f32.mrf.mxu0 }
 0x2f4   : > { %v3809_v57 = vpop.f32.mrf.mxu1  ;;  %4338 = vmatmul.mubr.f32.gmra.mxu1 %v3169_v42  ;;  %v3178_v42 = vld [vmem:[#allocation3 + $0x199] sm:$0xff] }
 0x2f5   : > { %v4024_v16 = vpop.f32.mrf.mxu0  ;;  %4553 = vmatmul.mubr.f32.gmra.mxu0 %v7604_v17  ;;  %4342 = vmatprep.mubr.f32.mxu1 %v7635_v13  ;;  %v3212_v2 = vld [vmem:[#allocation3 + $0x32] sm:$0xff] }
 0x2f6   : > { %v7777_v36 = vadd.f32 %v4024_v16, %v3799_v53  ;;  %4557 = vmatprep.mubr.f32.mxu0 %v3170_v7  ;;  %v3811_v44 = vpop.f32.mrf.mxu1 }
 0x2f7   : > { %v4026_v8 = vpop.f32.mrf.mxu0  ;;  %v3213_v44 = vld [vmem:[#allocation3 + $0x3a] sm:$0xff] }
 0x2f8   : > { %v3814_v54 = vpop.f32.mrf.mxu1  ;;  %4343 = vmatmul.mubr.f32.gmra.mxu1 %v3170_v7  ;;  %v3179_v8 = vld [vmem:[#allocation3 + $0x1a1] sm:$0xff] }
 0x2f9   : > { %v4029_v21 = vpop.f32.mrf.mxu0  ;;  %4558 = vmatmul.mubr.f32.gmra.mxu0 %v7613_v40  ;;  %4347 = vmatprep.mubr.f32.mxu1 %v7644_v0 }
 0x2fa   : > { %v7781_v4 = vadd.f32 %v4029_v21, %v3804_v14  ;;  %4562 = vmatprep.mubr.f32.mxu0 %v3171_v46  ;;  %v3816_v17 = vpop.f32.mrf.mxu1  ;;  %v3214_v21 = vld [vmem:[#allocation3 + $0x4a] sm:$0xff] }
 0x2fb   : > { %v4031_v9 = vpop.f32.mrf.mxu0  ;;  %v5347_v17 = vld [vmem:[#allocation2] sm:$0xff] }
 0x2fc   : > { %v3819_v13 = vpop.f32.mrf.mxu1  ;;  %4348 = vmatmul.mubr.f32.gmra.mxu1 %v3171_v46 }
 0x2fd   : > { %v4034_v23 = vpop.f32.mrf.mxu0  ;;  %4563 = vmatmul.mubr.f32.gmra.mxu0 %v7622_v39  ;;  %4352 = vmatprep.mubr.f32.mxu1 %v7653_v58 }
 0x2fe   : > { %v7785_v35 = vadd.f32 %v4034_v23, %v3809_v57  ;;  %4567 = vmatprep.mubr.f32.mxu0 %v3172_v18  ;;  %v3821_v40 = vpop.f32.mrf.mxu1  ;;  %v3215_v23 = vld [vmem:[#allocation3 + $0x52] sm:$0xff] }
 0x2ff   : > { %v4036_v63 = vpop.f32.mrf.mxu0  ;;  %v3216_v40 = vld [vmem:[#allocation3 + $0x62] sm:$0xff] }
 0x300   : > { %v3824_v0 = vpop.f32.mrf.mxu1  ;;  %4353 = vmatmul.mubr.f32.gmra.mxu1 %v3172_v18 }
 0x301   : > { %v4039_v15 = vpop.f32.mrf.mxu0  ;;  %4568 = vmatmul.mubr.f32.gmra.mxu0 %v7631_v26  ;;  %4357 = vmatprep.mubr.f32.mxu1 %v7662_v25 }
 0x302   : > { %v7789_v10 = vadd.f32 %v4039_v15, %v3814_v54  ;;  %4572 = vmatprep.mubr.f32.mxu0 %v3173_v3  ;;  %v3826_v39 = vpop.f32.mrf.mxu1 }
 0x303   : > { %v4041_v55 = vpop.f32.mrf.mxu0  ;;  %v3217_v39 = vld [vmem:[#allocation3 + $0x6a] sm:$0xff] }
 0x304   : > { %v3829_v58 = vpop.f32.mrf.mxu1  ;;  %4358 = vmatmul.mubr.f32.gmra.mxu1 %v3173_v3 }
 0x305   : > { %v4044_v1 = vpop.f32.mrf.mxu0  ;;  %4573 = vmatmul.mubr.f32.gmra.mxu0 %v7640_v43  ;;  %4362 = vmatprep.mubr.f32.mxu1 %v7669_v22 }
 0x306   : > { %v7793_v62 = vadd.f32 %v4044_v1, %v3819_v13  ;;  %4577 = vmatprep.mubr.f32.mxu0 %v3174_v33  ;;  %v3831_v26 = vpop.f32.mrf.mxu1 }
 0x307   : > { %v4046_v52 = vpop.f32.mrf.mxu0 }
 0x308   : > { %v3834_v25 = vpop.f32.mrf.mxu1  ;;  %4363 = vmatmul.mubr.f32.gmra.mxu1 %v3174_v33 }
 0x309   : > { %v4049_v48 = vpop.f32.mrf.mxu0  ;;  %4578 = vmatmul.mubr.f32.gmra.mxu0 %v7649_v61  ;;  %4367 = vmatprep.mubr.f32.mxu1 %v7680_v37 }
 0x30a   : > { %v7797_v41 = vadd.f32 %v4049_v48, %v3824_v0  ;;  %4582 = vmatprep.mubr.f32.mxu0 %v3175_v27  ;;  %v3836_v43 = vpop.f32.mrf.mxu1 }
 0x30b   : > { %v4051_v34 = vpop.f32.mrf.mxu0 }
 0x30c   : > { %v3839_v45 = vpop.f32.mrf.mxu1  ;;  %4368 = vmatmul.mubr.f32.gmra.mxu1 %v3175_v27  ;;  %v3220_v27 = vld [vmem:[#allocation3 + $0x92] sm:$0xff] }
 0x30d   : > { %v4054_v20 = vpop.f32.mrf.mxu0  ;;  %4583 = vmatmul.mubr.f32.gmra.mxu0 %v7658_v47  ;;  %4372 = vmatprep.mubr.f32.mxu1 %v7799_v5 }
 0x30e   : > { %v7803_v51 = vadd.f32 %v4054_v20, %v3829_v58  ;;  %4587 = vmatprep.mubr.f32.mxu0 %v3176_v29  ;;  %v3841_v61 = vpop.f32.mrf.mxu1  ;;  %v3218_v58 = vld [vmem:[#allocation3 + $0x7a] sm:$0xff] }
 0x30f   : > { %v4056_v53 = vpop.f32.mrf.mxu0 }
 0x310   : > { %v3844_v56 = vpop.f32.mrf.mxu1  ;;  %4373 = vmatmul.mubr.f32.gmra.mxu1 %v3176_v29  ;;  %v3221_v29 = vld [vmem:[#allocation3 + $0x9a] sm:$0xff]  ;;  %v3222_v53 = vld [vmem:[#allocation3 + $0xaa] sm:$0xff] }
 0x311   : > { %v4059_v38 = vpop.f32.mrf.mxu0  ;;  %4588 = vmatmul.mubr.f32.gmra.mxu0 %v7665_v19  ;;  %4377 = vmatprep.mubr.f32.mxu1 %v7805_v6 }
 0x312   : > { %v7809_v14 = vadd.f32 %v4059_v38, %v3834_v25  ;;  %4592 = vmatprep.mubr.f32.mxu0 %v3177_v30  ;;  %v3846_v47 = vpop.f32.mrf.mxu1  ;;  %v3219_v25 = vld [vmem:[#allocation3 + $0x82] sm:$0xff] }
 0x313   : > { %v4061_v32 = vpop.f32.mrf.mxu0 }
 0x314   : > { %v3849_v59 = vpop.f32.mrf.mxu1  ;;  %4378 = vmatmul.mubr.f32.gmra.mxu1 %v3177_v30  ;;  %v3223_v32 = vld [vmem:[#allocation3 + $0xb2] sm:$0xff] }
 0x315   : > { %v4064_v57 = vpop.f32.mrf.mxu0  ;;  %4593 = vmatmul.mubr.f32.gmra.mxu0 %v7675_v31  ;;  %5255 = vmatprep.mubr.f32.mxu1 %v3212_v2 }
 0x316   : > { %v7812_v16 = vadd.f32 %v4064_v57, %v3839_v45  ;;  %v3851_v7 = vpop.f32.mrf.mxu1  ;;  %4597 = vmatprep.mubr.f32.mxu0 %v3178_v42 }
 0x317   : > { %v4066_v19 = vpop.f32.mrf.mxu0 }
 0x318   : > { %v3854_v54 = vpop.f32.mrf.mxu1  ;;  %5256 = vmatmul.mubr.f32.vlgmr.msra.gmra.mxu1 %v3213_v44  ;;  %v3225_v44 = vld [vmem:[#allocation3 + $0xca] sm:$0xff] }
 0x319   : > { %v4069_v46 = vpop.f32.mrf.mxu0  ;;  %4598 = vmatmul.mubr.f32.gmra.mxu0 %v5347_v17  ;;  %5258 = vmatprep.mubr.f32.mxu1 %v3214_v21 }
 0x31a   : > { %v7814_v9 = vadd.f32 %v4069_v46, %v3844_v56  ;;  %v3856_v13 = vpop.f32.mrf.mxu1  ;;  %4602 = vmatprep.mubr.f32.mxu0 %v3179_v8 }
 0x31b   : > { %v4071_v31 = vpop.f32.mrf.mxu0 }
 0x31c   : > { %v3859_v18 = vpop.f32.mrf.mxu1  ;;  %5259 = vmatmul.mubr.f32.gmra.mxu1 %v3215_v23  ;;  %v3227_v31 = vld [vmem:[#allocation3 + $0xe2] sm:$0xff] }
 0x31d   : > { %v4074_v63 = vpop.f32.mrf.mxu0  ;;  %4603 = vmatmul.mubr.f32.gmra.mxu0 %v5347_v17  ;;  %5261 = vmatprep.mubr.f32.mxu1 %v3216_v40 }
 0x31e   : > { %v7816_v0 = vadd.f32 %v4074_v63, %v3849_v59  ;;  %v3861_v15 = vpop.f32.mrf.mxu1  ;;  %v3224_v59 = vld [vmem:[#allocation3 + $0xc2] sm:$0xff] }
 0x31f   : > { %v4076_v3 = vpop.f32.mrf.mxu0 }
 0x320   : > { %v3864_v55 = vpop.f32.mrf.mxu1  ;;  %5262 = vmatmul.mubr.f32.gmra.mxu1 %v3217_v39  ;;  %v3229_v39 = vld [vmem:[#allocation3 + $0xfa] sm:$0xff] }
 0x321   : > { %v4079_v1 = vpop.f32.mrf.mxu0  ;;  %5264 = vmatprep.mubr.f32.mxu1 %v3218_v58  ;;  %v3230_v58 = vld [vmem:[#allocation3 + $0x10a] sm:$0xff] }
 0x322   : > { %v7818_v33 = vadd.f32 %v4079_v1, %v3854_v54  ;;  %v3866_v26 = vpop.f32.mrf.mxu1  ;;  %v3226_v54 = vld [vmem:[#allocation3 + $0xda] sm:$0xff] }
 0x323   : > { %v4081_v52 = vpop.f32.mrf.mxu0 }
 0x324   : > { %v3869_v48 = vpop.f32.mrf.mxu1  ;;  %5265 = vmatmul.mubr.f32.gmra.mxu1 %v3219_v25 }
 0x325   : > { %v4084_v43 = vpop.f32.mrf.mxu0  ;;  %5267 = vmatprep.mubr.f32.mxu1 %v3220_v27 }
 0x326   : > { %v7820_v34 = vadd.f32 %v4084_v43, %v3859_v18  ;;  %v3871_v45 = vpop.f32.mrf.mxu1  ;;  %v3228_v18 = vld [vmem:[#allocation3 + $0xf2] sm:$0xff]  ;;  %v3232_v43 = vld [vmem:[#allocation3 + $0x122] sm:$0xff] }
 0x327   : > { %v4086_v20 = vpop.f32.mrf.mxu0 }
 0x328   : > { %v3874_v61 = vpop.f32.mrf.mxu1  ;;  %5268 = vmatmul.mubr.f32.gmra.mxu1 %v3221_v29 }
 0x329   : > { %v4089_v56 = vpop.f32.mrf.mxu0  ;;  %5270 = vmatprep.mubr.f32.mxu1 %v3222_v53  ;;  %v3233_v53 = vld [vmem:[#allocation3 + $0x12a] sm:$0xff] }
 0x32a   : > { %v7822_v38 = vadd.f32 %v4089_v56, %v3864_v55  ;;  %v3876_v30 = vpop.f32.mrf.mxu1 }
 0x32b   : > { %v4091_v47 = vpop.f32.mrf.mxu0  ;;  %v3234_v30 = vld [vmem:[#allocation3 + $0x13a] sm:$0xff] }
 0x32c   : > { %v3879_v42 = vpop.f32.mrf.mxu1  ;;  %5271 = vmatmul.mubr.f32.gmra.mxu1 %v3223_v32 }
 0x32d   : > { %v4094_v2 = vpop.f32.mrf.mxu0  ;;  %5273 = vmatprep.mubr.f32.mxu1 %v3224_v59 }
 0x32e   : > { %v7824_v57 = vadd.f32 %v4094_v2, %v3869_v48  ;;  %v3881_v7 = vpop.f32.mrf.mxu1  ;;  %v3231_v48 = vld [vmem:[#allocation3 + $0x112] sm:$0xff]  ;;  %v3235_v2 = vld [vmem:[#allocation3 + $0x142] sm:$0xff] }
 0x32f   : > { %v4096_v19 = vpop.f32.mrf.mxu0 }
 0x330   : > { %v3884_v8 = vpop.f32.mrf.mxu1  ;;  %5274 = vmatmul.mubr.f32.gmra.mxu1 %v3225_v44  ;;  %v3236_v19 = vld [vmem:[#allocation3 + $0x152] sm:$0xff] }
 0x331   : > { %v4099_v21 = vpop.f32.mrf.mxu0  ;;  %5276 = vmatprep.mubr.f32.mxu1 %v3226_v54 }
 0x332   : > { %v7826_v46 = vadd.f32 %v4099_v21, %v3874_v61  ;;  %v3886_v17 = vpop.f32.mrf.mxu1 }
 0x333   : > { %v4101_v13 = vpop.f32.mrf.mxu0  ;;  %v3237_v17 = vld [vmem:[#allocation3 + $0x15a] sm:$0xff] }
 0x334   : > { %v3889_v23 = vpop.f32.mrf.mxu1  ;;  %5277 = vmatmul.mubr.f32.gmra.mxu1 %v3227_v31 }
 0x335   : > { %v4104_v40 = vpop.f32.mrf.mxu0  ;;  %5279 = vmatprep.mubr.f32.mxu1 %v3228_v18 }
 0x336   : > { %v7828_v63 = vadd.f32 %v4104_v40, %v3879_v42  ;;  %v3891_v15 = vpop.f32.mrf.mxu1 }
 0x337   : > { %v4106_v3 = vpop.f32.mrf.mxu0 }
 0x338   : > { %v3894_v55 = vpop.f32.mrf.mxu1  ;;  %5280 = vmatmul.mubr.f32.gmra.mxu1 %v3229_v39 }
 0x339   : > { %v4109_v1 = vpop.f32.mrf.mxu0  ;;  %5282 = vmatprep.mubr.f32.mxu1 %v3230_v58  ;;  %v3242_v58 = vld [vmem:[#allocation3 + $0x19a] sm:$0xff] }
 0x33a   : > { %v7830_v26 = vadd.f32 %v4109_v1, %v3884_v8  ;;  %v3896_v52 = vpop.f32.mrf.mxu1 }
 0x33b   : > { %v4111_v25 = vpop.f32.mrf.mxu0 }
 0x33c   : > { %v3899_v27 = vpop.f32.mrf.mxu1  ;;  %5283 = vmatmul.mubr.f32.gmra.mxu1 %v3231_v48 }
 0x33d   : > { %v4114_v45 = vpop.f32.mrf.mxu0  ;;  %5285 = vmatprep.mubr.f32.mxu1 %v3232_v43 }
 0x33e   : > { %v7832_v20 = vadd.f32 %v4114_v45, %v3889_v23  ;;  %v3901_v29 = vpop.f32.mrf.mxu1 }
 0x33f   : > { %v4116_v61 = vpop.f32.mrf.mxu0 }
 0x340   : > { %v3904_v56 = vpop.f32.mrf.mxu1  ;;  %5286 = vmatmul.mubr.f32.gmra.mxu1 %v3233_v53  ;;  %v4000_v61 = vadd.f32 %v7755_v11, %v7478_v28 }
 0x341   : > { %v4119_v47 = vpop.f32.mrf.mxu0  ;;  %5288 = vmatprep.mubr.f32.mxu1 %v3234_v30 }
 0x342   : > { %v7834_v32 = vadd.f32 %v4119_v47, %v3894_v55  ;;  %v3906_v42 = vpop.f32.mrf.mxu1 }
 0x343   : > { %v4121_v59 = vpop.f32.mrf.mxu0 }
 0x344   : > { %v3909_v7 = vpop.f32.mrf.mxu1  ;;  %5289 = vmatmul.mubr.f32.gmra.mxu1 %v3235_v2  ;;  %v4005_v59 = vadd.f32 %v7759_v12, %v7496_v49 }
 0x345   : > { %v4124_v44 = vpop.f32.mrf.mxu0  ;;  %5291 = vmatprep.mubr.f32.mxu1 %v3236_v19 }
 0x346   : > { %v7836_v8 = vadd.f32 %v4124_v44, %v3899_v27  ;;  %v3911_v54 = vpop.f32.mrf.mxu1 }
 0x347   : > { %v4126_v21 = vpop.f32.mrf.mxu0 }
 0x348   : > { %v3914_v13 = vpop.f32.mrf.mxu1  ;;  %5292 = vmatmul.mubr.f32.gmra.mxu1 %v3237_v17 }
 0x349   : > { %v4129_v31 = vpop.f32.mrf.mxu0  ;;  %5294 = vmatprep.mubr.f32.mxu1 %v7669_v22  ;;  %v3243_v22 = vld [vmem:[#allocation3 + $0x1a2] sm:$0xff] }
 0x34a   : > { %v7839_v23 = vadd.f32 %v4129_v31, %v3904_v56  ;;  %v3916_v18 = vpop.f32.mrf.mxu1 }
 0x34b   : > { %v4131_v40 = vpop.f32.mrf.mxu0 }
 0x34c   : > { %v3919_v15 = vpop.f32.mrf.mxu1  ;;  %5295 = vmatmul.mubr.f32.gmra.mxu1 %v7680_v37 }
 0x34d   : > { %v4134_v3 = vpop.f32.mrf.mxu0  ;;  %5297 = vmatprep.mubr.f32.mxu1 %v7799_v5 }
 0x34e   : > { %v7843_v39 = vadd.f32 %v4134_v3, %v3909_v7  ;;  %v3921_v55 = vpop.f32.mrf.mxu1 }
 0x34f   : > { %v4136_v1 = vpop.f32.mrf.mxu0 }
 0x350   : > { %v3924_v52 = vpop.f32.mrf.mxu1  ;;  %5298 = vmatmul.mubr.f32.gmra.mxu1 %v7805_v6 }
 0x351   : > { %v4139_v25 = vpop.f32.mrf.mxu0  ;;  %5300 = vmatprep.mubr.f32.mxu1 %v3242_v58 }
 0x352   : > { %v7846_v48 = vadd.f32 %v4139_v25, %v3914_v13  ;;  %v3926_v27 = vpop.f32.mrf.mxu1 }
 0x353   : > { %v4141_v43 = vpop.f32.mrf.mxu0 }
 0x354   : > { %v3929_v45 = vpop.f32.mrf.mxu1  ;;  %5301 = vmatmul.mubr.f32.gmra.mxu1 %v3243_v22 }
 0x355   : > { %v4144_v37 = vpop.f32.mrf.mxu0 }
 0x356   : > { %v7848_v29 = vadd.f32 %v4144_v37, %v3919_v15  ;;  %v3931_v5 = vpop.f32.mrf.mxu1 }
 0x357   : > { %v4146_v53 = vpop.f32.mrf.mxu0 }
 0x358   : > { %v4224_v56 = vpop.f32.mrf.mxu1 }
 0x359   : > { %v4149_v30 = vpop.f32.mrf.mxu0  ;;  %v4225_v6 = vadd.f32 %v4224_v56, %v4000_v61 }
 0x35a   : > { %v7852_v47 = vadd.f32 %v4149_v30, %v3924_v52  ;;  %v4226_v42 = vpop.f32.mrf.mxu1 }
 0x35b   : > { %v4151_v2 = vpop.f32.mrf.mxu0 }
 0x35c   : > { %v4229_v7 = vpop.f32.mrf.mxu1 }
 0x35d   : > { %v4154_v19 = vpop.f32.mrf.mxu0  ;;  %v4230_v44 = vadd.f32 %v4229_v7, %v4005_v59 }
 0x35e   : > { %v7856_v54 = vadd.f32 %v4154_v19, %v3929_v45  ;;  %v4231_v21 = vpop.f32.mrf.mxu1 }
 0x35f   : > { %v4156_v17 = vpop.f32.mrf.mxu0 }
 0x360   : > { %v4234_v13 = vpop.f32.mrf.mxu1 }
 0x361   : > { %v4235_v28 = vadd.f32 %v4234_v13, %v7765_v24  ;;  %v4449_v11 = vpop.f32.mrf.mxu0 }
 0x362   : > { %v7859_v31 = vadd.f32 %v4449_v11, %v4225_v6  ;;  %v4236_v18 = vpop.f32.mrf.mxu1 }
 0x363   : > { %v4451_v40 = vpop.f32.mrf.mxu0 }
 0x364   : > { %v4239_v15 = vpop.f32.mrf.mxu1 }
 0x365   : > { %v4240_v3 = vadd.f32 %v4239_v15, %v7769_v60  ;;  %v4454_v49 = vpop.f32.mrf.mxu0 }
 0x366   : > { %v7862_v12 = vadd.f32 %v4454_v49, %v4230_v44  ;;  %v4241_v55 = vpop.f32.mrf.mxu1 }
 0x367   : > { %v4456_v58 = vpop.f32.mrf.mxu0 }
 0x368   : > { %v4244_v1 = vpop.f32.mrf.mxu1 }
 0x369   : > { %v4245_v52 = vadd.f32 %v4244_v1, %v7773_v50  ;;  %v4459_v25 = vpop.f32.mrf.mxu0 }
 0x36a   : > { %v7865_v22 = vadd.f32 %v4459_v25, %v4235_v28  ;;  %v4246_v24 = vpop.f32.mrf.mxu1 }
 0x36b   : > { %v4461_v27 = vpop.f32.mrf.mxu0 }
 0x36c   : > { %v4249_v43 = vpop.f32.mrf.mxu1 }
 0x36d   : > { %v4250_v45 = vadd.f32 %v4249_v43, %v7777_v36  ;;  %v4464_v37 = vpop.f32.mrf.mxu0 }
 0x36e   : > { %v7868_v5 = vadd.f32 %v4464_v37, %v4240_v3  ;;  %v4251_v60 = vpop.f32.mrf.mxu1 }
 0x36f   : > { %v4466_v61 = vpop.f32.mrf.mxu0 }
 0x370   : > { %v4254_v53 = vpop.f32.mrf.mxu1 }
 0x371   : > { %v4255_v56 = vadd.f32 %v4254_v53, %v7781_v4  ;;  %v4469_v30 = vpop.f32.mrf.mxu0 }
 0x372   : > { %v7871_v6 = vadd.f32 %v4469_v30, %v4245_v52  ;;  %v4256_v50 = vpop.f32.mrf.mxu1 }
 0x373   : > { %v4471_v42 = vpop.f32.mrf.mxu0 }
 0x374   : > { %v4259_v59 = vpop.f32.mrf.mxu1 }
 0x375   : > { %v4260_v2 = vadd.f32 %v4259_v59, %v7785_v35  ;;  %v4474_v7 = vpop.f32.mrf.mxu0 }
 0x376   : > { %v7874_v19 = vadd.f32 %v4474_v7, %v4250_v45  ;;  %v4261_v36 = vpop.f32.mrf.mxu1 }
 0x377   : > { %v4476_v44 = vpop.f32.mrf.mxu0 }
 0x378   : > { %v4264_v21 = vpop.f32.mrf.mxu1 }
 0x379   : > { %v4265_v17 = vadd.f32 %v4264_v21, %v7789_v10  ;;  %v4479_v13 = vpop.f32.mrf.mxu0 }
 0x37a   : > { %v7877_v28 = vadd.f32 %v4479_v13, %v4255_v56  ;;  %v4266_v4 = vpop.f32.mrf.mxu1 }
 0x37b   : > { %v4481_v11 = vpop.f32.mrf.mxu0 }
 0x37c   : > { %v4269_v18 = vpop.f32.mrf.mxu1 }
 0x37d   : > { %v4270_v40 = vadd.f32 %v4269_v18, %v7793_v62  ;;  %v4484_v15 = vpop.f32.mrf.mxu0 }
 0x37e   : > { %v7880_v3 = vadd.f32 %v4484_v15, %v4260_v2  ;;  %v4271_v35 = vpop.f32.mrf.mxu1 }
 0x37f   : > { %v4486_v49 = vpop.f32.mrf.mxu0 }
 0x380   : > { %v4274_v55 = vpop.f32.mrf.mxu1 }
 0x381   : > { %v4275_v58 = vadd.f32 %v4274_v55, %v7797_v41  ;;  %v4489_v1 = vpop.f32.mrf.mxu0 }
 0x382   : > { %v7883_v52 = vadd.f32 %v4489_v1, %v4265_v17  ;;  %v4276_v10 = vpop.f32.mrf.mxu1 }
 0x383   : > { %v4491_v25 = vpop.f32.mrf.mxu0 }
 0x384   : > { %v4279_v24 = vpop.f32.mrf.mxu1 }
 0x385   : > { %v4280_v27 = vadd.f32 %v4279_v24, %v7803_v51  ;;  %v4494_v43 = vpop.f32.mrf.mxu0 }
 0x386   : > { %v7886_v45 = vadd.f32 %v4494_v43, %v4270_v40  ;;  %v4281_v62 = vpop.f32.mrf.mxu1 }
 0x387   : > { %v4496_v37 = vpop.f32.mrf.mxu0 }
 0x388   : > { %v4284_v60 = vpop.f32.mrf.mxu1 }
 0x389   : > { %v4285_v61 = vadd.f32 %v4284_v60, %v7809_v14  ;;  %v4499_v53 = vpop.f32.mrf.mxu0 }
 0x38a   : > { %v7889_v56 = vadd.f32 %v4499_v53, %v4275_v58  ;;  %v4286_v41 = vpop.f32.mrf.mxu1 }
 0x38b   : > { %v4501_v30 = vpop.f32.mrf.mxu0 }
 0x38c   : > { %v4289_v50 = vpop.f32.mrf.mxu1 }
 0x38d   : > { %v4290_v42 = vadd.f32 %v4289_v50, %v7812_v16  ;;  %v4504_v59 = vpop.f32.mrf.mxu0 }
 0x38e   : > { %v7892_v2 = vadd.f32 %v4504_v59, %v4280_v27  ;;  %v4291_v51 = vpop.f32.mrf.mxu1 }
 0x38f   : > { %v4506_v7 = vpop.f32.mrf.mxu0 }
 0x390   : > { %v4294_v36 = vpop.f32.mrf.mxu1 }
 0x391   : > { %v4295_v44 = vadd.f32 %v4294_v36, %v7814_v9  ;;  %v4509_v21 = vpop.f32.mrf.mxu0 }
 0x392   : > { %v7895_v17 = vadd.f32 %v4509_v21, %v4285_v61  ;;  %v4296_v14 = vpop.f32.mrf.mxu1 }
 0x393   : > { %v4511_v13 = vpop.f32.mrf.mxu0 }
 0x394   : > { %v4299_v4 = vpop.f32.mrf.mxu1 }
 0x395   : > { %v4300_v11 = vadd.f32 %v4299_v4, %v7816_v0  ;;  %v4514_v18 = vpop.f32.mrf.mxu0 }
 0x396   : > { %v7898_v40 = vadd.f32 %v4514_v18, %v4290_v42  ;;  %v4301_v16 = vpop.f32.mrf.mxu1 }
 0x397   : > { %v4516_v15 = vpop.f32.mrf.mxu0 }
 0x398   : > { %v4304_v35 = vpop.f32.mrf.mxu1 }
 0x399   : > { %v4305_v49 = vadd.f32 %v4304_v35, %v7818_v33  ;;  %v4519_v55 = vpop.f32.mrf.mxu0 }
 0x39a   : > { %v7901_v58 = vadd.f32 %v4519_v55, %v4295_v44  ;;  %v4306_v9 = vpop.f32.mrf.mxu1 }
 0x39b   : > { %v4521_v1 = vpop.f32.mrf.mxu0 }
 0x39c   : > { %v4309_v10 = vpop.f32.mrf.mxu1 }
 0x39d   : > { %v4310_v25 = vadd.f32 %v4309_v10, %v7820_v34  ;;  %v4524_v24 = vpop.f32.mrf.mxu0 }
 0x39e   : > { %v7904_v27 = vadd.f32 %v4524_v24, %v4300_v11  ;;  %v4311_v0 = vpop.f32.mrf.mxu1 }
 0x39f   : > { %v4526_v43 = vpop.f32.mrf.mxu0 }
 0x3a0   : > { %v4314_v62 = vpop.f32.mrf.mxu1 }
 0x3a1   : > { %v4315_v37 = vadd.f32 %v4314_v62, %v7822_v38  ;;  %v4529_v60 = vpop.f32.mrf.mxu0 }
 0x3a2   : > { %v7907_v61 = vadd.f32 %v4529_v60, %v4305_v49  ;;  %v4316_v33 = vpop.f32.mrf.mxu1 }
 0x3a3   : > { %v4531_v53 = vpop.f32.mrf.mxu0 }
 0x3a4   : > { %v4319_v41 = vpop.f32.mrf.mxu1 }
 0x3a5   : > { %v4320_v30 = vadd.f32 %v4319_v41, %v7824_v57  ;;  %v4534_v50 = vpop.f32.mrf.mxu0 }
 0x3a6   : > { %v7910_v42 = vadd.f32 %v4534_v50, %v4310_v25  ;;  %v4321_v34 = vpop.f32.mrf.mxu1 }
 0x3a7   : > { %v4536_v59 = vpop.f32.mrf.mxu0 }
 0x3a8   : > { %v4324_v51 = vpop.f32.mrf.mxu1 }
 0x3a9   : > { %v4325_v7 = vadd.f32 %v4324_v51, %v7826_v46  ;;  %v4539_v36 = vpop.f32.mrf.mxu0 }
 0x3aa   : > { %v7913_v44 = vadd.f32 %v4539_v36, %v4315_v37  ;;  %v4326_v38 = vpop.f32.mrf.mxu1 }
 0x3ab   : > { %v4541_v21 = vpop.f32.mrf.mxu0 }
 0x3ac   : > { %v4329_v14 = vpop.f32.mrf.mxu1 }
 0x3ad   : > { %v4330_v13 = vadd.f32 %v4329_v14, %v7828_v63  ;;  %v4544_v4 = vpop.f32.mrf.mxu0 }
 0x3ae   : > { %v7916_v11 = vadd.f32 %v4544_v4, %v4320_v30  ;;  %v4331_v57 = vpop.f32.mrf.mxu1 }
 0x3af   : > { %v4546_v18 = vpop.f32.mrf.mxu0 }
 0x3b0   : > { %v4334_v16 = vpop.f32.mrf.mxu1 }
 0x3b1   : > { %v4335_v15 = vadd.f32 %v4334_v16, %v7830_v26  ;;  %v4549_v35 = vpop.f32.mrf.mxu0 }
 0x3b2   : > { %v7919_v49 = vadd.f32 %v4549_v35, %v4325_v7  ;;  %v4336_v46 = vpop.f32.mrf.mxu1 }
 0x3b3   : > { %v4551_v55 = vpop.f32.mrf.mxu0 }
 0x3b4   : > { %v4339_v9 = vpop.f32.mrf.mxu1 }
 0x3b5   : > { %v4340_v1 = vadd.f32 %v4339_v9, %v7832_v20  ;;  %v4554_v10 = vpop.f32.mrf.mxu0 }
 0x3b6   : > { %v7922_v25 = vadd.f32 %v4554_v10, %v4330_v13  ;;  %v4341_v63 = vpop.f32.mrf.mxu1 }
 0x3b7   : > { %v4556_v24 = vpop.f32.mrf.mxu0 }
 0x3b8   : > { %v4344_v0 = vpop.f32.mrf.mxu1 }
 0x3b9   : > { %v4345_v43 = vadd.f32 %v4344_v0, %v7834_v32  ;;  %v4559_v62 = vpop.f32.mrf.mxu0 }
 0x3ba   : > { %v7925_v37 = vadd.f32 %v4559_v62, %v4335_v15  ;;  %v4346_v26 = vpop.f32.mrf.mxu1 }
 0x3bb   : > { %v4561_v60 = vpop.f32.mrf.mxu0 }
 0x3bc   : > { %v4349_v33 = vpop.f32.mrf.mxu1 }
 0x3bd   : > { %v4350_v53 = vadd.f32 %v4349_v33, %v7836_v8  ;;  %v4564_v41 = vpop.f32.mrf.mxu0  ;;  %v7960_v33 = vld [vmem:[%s8120_s5] ss:$0 sm:$0xff] }
 0x3be   : > { %v7928_v30 = vadd.f32 %v4564_v41, %v4340_v1  ;;  %v4351_v20 = vpop.f32.mrf.mxu1  ;;  %v7968_v41 = vld [vmem:[%s8121_s6] ss:$0 sm:$0xff] }
 0x3bf   : > { %v4566_v50 = vpop.f32.mrf.mxu0 }
 0x3c0   : > { %v4354_v34 = vpop.f32.mrf.mxu1 }
 0x3c1   : > { %v4355_v59 = vadd.f32 %v4354_v34, %v7839_v23  ;;  %v4569_v51 = vpop.f32.mrf.mxu0 }
 0x3c2   : > { %v7931_v7 = vadd.f32 %v4569_v51, %v4345_v43  ;;  %v4356_v32 = vpop.f32.mrf.mxu1 }
 0x3c3   : > { %v4571_v36 = vpop.f32.mrf.mxu0 }
 0x3c4   : > { %v4359_v38 = vpop.f32.mrf.mxu1 }
 0x3c5   : > { %v7934_v21 = vadd.f32 %v4359_v38, %v7843_v39  ;;  %v4574_v14 = vpop.f32.mrf.mxu0 }
 0x3c6   : > { %v7936_v13 = vadd.f32 %v4574_v14, %v4350_v53  ;;  %v4361_v8 = vpop.f32.mrf.mxu1 }
 0x3c7   : > { %v4576_v4 = vpop.f32.mrf.mxu0 }
 0x3c8   : > { %v4364_v57 = vpop.f32.mrf.mxu1 }
 0x3c9   : > { %v7939_v18 = vadd.f32 %v4364_v57, %v7846_v48  ;;  %v4579_v16 = vpop.f32.mrf.mxu0 }
 0x3ca   : > { %v7941_v23 = vadd.f32 %v4579_v16, %v4355_v59  ;;  %v4366_v15 = vpop.f32.mrf.mxu1 }
 0x3cb   : > { %v4581_v35 = vpop.f32.mrf.mxu0 }
 0x3cc   : > { %v4369_v46 = vpop.f32.mrf.mxu1 }
 0x3cd   : > { %v7944_v55 = vadd.f32 %v4369_v46, %v7848_v29  ;;  %v7946_v39 = vpop.f32.mrf.mxu0 }
 0x3ce   : > { %v4371_v9 = vpop.f32.mrf.mxu1 }
 0x3cf   : > { %v4586_v1 = vpop.f32.mrf.mxu0 }
 0x3d0   : > { %v4374_v10 = vpop.f32.mrf.mxu1 }
 0x3d1   : > { %v7949_v63 = vadd.f32 %v4374_v10, %v7852_v47  ;;  %v7951_v24 = vpop.f32.mrf.mxu0 }
 0x3d2   : > { %v4376_v48 = vpop.f32.mrf.mxu1 }
 0x3d3   : > { %v4591_v0 = vpop.f32.mrf.mxu0 }
 0x3d4   : > { %v7953_v43 = vpop.f32.mrf.mxu1 }
 0x3d5   : > { %v7955_v62 = vpop.f32.mrf.mxu0 }
 0x3d6   : > { %v4381_v26 = vpop.f32.mrf.mxu1 }
 0x3d7   : > { %v4596_v29 = vpop.f32.mrf.mxu0 }
 0x3d8   : > { %v5257_v60 = vpop.f32.mrf.mxu1 }
 0x3d9   : > { %v7962_v53 = vpop.f32.mrf.mxu0  ;;  %v4680_v47 = vadd.f32 %v5257_v60, %v7862_v12 }
 0x3da   : > { %v4674_v20 = vpop.f32.mrf.mxu1 }
 0x3db   : > { %v4841_v50 = vmul.f32 %v7960_v33, %v4680_v47  ;;  %v4601_v34 = vpop.f32.mrf.mxu0  ;;  %v4675_v59 = vadd.f32 %v4674_v20, %v7859_v31 }
 0x3dc   : > { %v5260_v51 = vpop.f32.mrf.mxu1 }
 0x3dd   : > { %v4880_v32 = vadd.f32 %v7968_v41, %v4841_v50  ;;  %v4840_v36 = vmul.f32 %v7960_v33, %v4675_v59  ;;  %v7974_v38 = vpop.f32.mrf.mxu0  ;;  %v4690_v12 = vadd.f32 %v5260_v51, %v7868_v5 }
 0x3de   : > { %v4684_v14 = vpop.f32.mrf.mxu1 }
 0x3df   : > { %v4912_v8 = vmax.f32 %v4880_v32, 0.0  ;;  %v4879_v31 = vadd.f32 %v7968_v41, %v4840_v36  ;;  %v4843_v4 = vmul.f32 %v7960_v33, %v4690_v12  ;;  %v4685_v57 = vadd.f32 %v4684_v14, %v7865_v22  ;;  %v4606_v16 = vpop.f32.mrf.mxu0 }
 0x3e0   : > { %v5263_v15 = vpop.f32.mrf.mxu1 }
 0x3e1   : > { %4944 = vst [vmem:[%s7982_s15 + $0x8] sm:$0xff] %v4912_v8  ;;  %v4911_v5 = vmax.f32 %v4879_v31, 0.0  ;;  %v4882_v35 = vadd.f32 %v7968_v41, %v4843_v4  ;;  %v4842_v46 = vmul.f32 %v7960_v33, %v4685_v57  ;;  %v4700_v9 = vadd.f32 %v5263_v15, %v7874_v19 }
 0x3e2   : > { %v4694_v1 = vpop.f32.mrf.mxu1 }
 0x3e3   : > { %4943 = vst [vmem:[%s7982_s15] sm:$0xff] %v4911_v5  ;;  %v4914_v10 = vmax.f32 %v4882_v35, 0.0  ;;  %v4881_v48 = vadd.f32 %v7968_v41, %v4842_v46  ;;  %v4845_v0 = vmul.f32 %v7960_v33, %v4700_v9  ;;  %v4695_v22 = vadd.f32 %v4694_v1, %v7871_v6 }
 0x3e4   : > { %v5266_v26 = vpop.f32.mrf.mxu1 }
 0x3e5   : > { %4946 = vst [vmem:[%s7982_s15 + $0x18] sm:$0xff] %v4914_v10  ;;  %v4913_v29 = vmax.f32 %v4881_v48, 0.0  ;;  %v4884_v60 = vadd.f32 %v7968_v41, %v4845_v0  ;;  %v4844_v47 = vmul.f32 %v7960_v33, %v4695_v22  ;;  %v4710_v19 = vadd.f32 %v5266_v26, %v7880_v3 }
 0x3e6   : > { %v4704_v20 = vpop.f32.mrf.mxu1 }
 0x3e7   : > { %4945 = vst [vmem:[%s7982_s15 + $0x10] sm:$0xff] %v4913_v29  ;;  %v4916_v50 = vmax.f32 %v4884_v60, 0.0  ;;  %v4883_v34 = vadd.f32 %v7968_v41, %v4844_v47  ;;  %v4847_v59 = vmul.f32 %v7960_v33, %v4710_v19  ;;  %v4705_v6 = vadd.f32 %v4704_v20, %v7877_v28 }
 0x3e8   : > { %v5269_v51 = vpop.f32.mrf.mxu1 }
 0x3e9   : > { %4948 = vst [vmem:[%s7982_s15 + $0x28] sm:$0xff] %v4916_v50  ;;  %v4915_v32 = vmax.f32 %v4883_v34, 0.0  ;;  %v4886_v36 = vadd.f32 %v7968_v41, %v4847_v59  ;;  %v4846_v12 = vmul.f32 %v7960_v33, %v4705_v6  ;;  %v4720_v3 = vadd.f32 %v5269_v51, %v7886_v45 }
 0x3ea   : > { %v4714_v14 = vpop.f32.mrf.mxu1 }
 0x3eb   : > { %4947 = vst [vmem:[%s7982_s15 + $0x20] sm:$0xff] %v4915_v32  ;;  %v4918_v8 = vmax.f32 %v4886_v36, 0.0  ;;  %v4885_v31 = vadd.f32 %v7968_v41, %v4846_v12  ;;  %v4849_v4 = vmul.f32 %v7960_v33, %v4720_v3  ;;  %v4715_v28 = vadd.f32 %v4714_v14, %v7883_v52 }
 0x3ec   : > { %v5272_v57 = vpop.f32.mrf.mxu1 }
 0x3ed   : > { %4950 = vst [vmem:[%s7982_s15 + $0x38] sm:$0xff] %v4918_v8  ;;  %v4917_v16 = vmax.f32 %v4885_v31, 0.0  ;;  %v4888_v15 = vadd.f32 %v7968_v41, %v4849_v4  ;;  %v4848_v5 = vmul.f32 %v7960_v33, %v4715_v28  ;;  %v4730_v45 = vadd.f32 %v5272_v57, %v7892_v2 }
 0x3ee   : > { %v4724_v35 = vpop.f32.mrf.mxu1 }
 0x3ef   : > { %4949 = vst [vmem:[%s7982_s15 + $0x30] sm:$0xff] %v4917_v16  ;;  %v4920_v46 = vmax.f32 %v4888_v15, 0.0  ;;  %v4887_v9 = vadd.f32 %v7968_v41, %v4848_v5  ;;  %v4851_v1 = vmul.f32 %v7960_v33, %v4730_v45  ;;  %v4725_v52 = vadd.f32 %v4724_v35, %v7889_v56 }
 0x3f0   : > { %v5275_v10 = vpop.f32.mrf.mxu1 }
 0x3f1   : > { %4952 = vst [vmem:[%s7982_s15 + $0x48] sm:$0xff] %v4920_v46  ;;  %v4919_v48 = vmax.f32 %v4887_v9, 0.0  ;;  %v4890_v0 = vadd.f32 %v7968_v41, %v4851_v1  ;;  %v4850_v22 = vmul.f32 %v7960_v33, %v4725_v52  ;;  %v4740_v2 = vadd.f32 %v5275_v10, %v7898_v40 }
 0x3f2   : > { %v4734_v26 = vpop.f32.mrf.mxu1 }
 0x3f3   : > { %4951 = vst [vmem:[%s7982_s15 + $0x40] sm:$0xff] %v4919_v48  ;;  %v4922_v29 = vmax.f32 %v4890_v0, 0.0  ;;  %v4889_v60 = vadd.f32 %v7968_v41, %v4850_v22  ;;  %v4853_v47 = vmul.f32 %v7960_v33, %v4740_v2  ;;  %v4735_v56 = vadd.f32 %v4734_v26, %v7895_v17 }
 0x3f4   : > { %v5278_v19 = vpop.f32.mrf.mxu1 }
 0x3f5   : > { %4954 = vst [vmem:[%s7982_s15 + $0x58] sm:$0xff] %v4922_v29  ;;  %v4921_v20 = vmax.f32 %v4889_v60, 0.0  ;;  %v4892_v50 = vadd.f32 %v7968_v41, %v4853_v47  ;;  %v4852_v34 = vmul.f32 %v7960_v33, %v4735_v56  ;;  %v4750_v40 = vadd.f32 %v5278_v19, %v7904_v27 }
 0x3f6   : > { %v4744_v59 = vpop.f32.mrf.mxu1 }
 0x3f7   : > { %4953 = vst [vmem:[%s7982_s15 + $0x50] sm:$0xff] %v4921_v20  ;;  %v4924_v6 = vmax.f32 %v4892_v50, 0.0  ;;  %v4891_v51 = vadd.f32 %v7968_v41, %v4852_v34  ;;  %v4855_v32 = vmul.f32 %v7960_v33, %v4750_v40  ;;  %v4745_v17 = vadd.f32 %v4744_v59, %v7901_v58 }
 0x3f8   : > { %v5281_v36 = vpop.f32.mrf.mxu1 }
 0x3f9   : > { %4956 = vst [vmem:[%s7982_s15 + $0x68] sm:$0xff] %v4924_v6  ;;  %v4923_v12 = vmax.f32 %v4891_v51, 0.0  ;;  %v4894_v3 = vadd.f32 %v7968_v41, %v4855_v32  ;;  %v4854_v14 = vmul.f32 %v7960_v33, %v4745_v17  ;;  %v4760_v27 = vadd.f32 %v5281_v36, %v7910_v42 }
 0x3fa   : > { %v4754_v8 = vpop.f32.mrf.mxu1 }
 0x3fb   : > { %4955 = vst [vmem:[%s7982_s15 + $0x60] sm:$0xff] %v4923_v12  ;;  %v4926_v31 = vmax.f32 %v4894_v3, 0.0  ;;  %v4893_v4 = vadd.f32 %v7968_v41, %v4854_v14  ;;  %v4857_v28 = vmul.f32 %v7960_v33, %v4760_v27  ;;  %v4755_v58 = vadd.f32 %v4754_v8, %v7907_v61 }
 0x3fc   : > { %v5284_v57 = vpop.f32.mrf.mxu1 }
 0x3fd   : > { %4958 = vst [vmem:[%s7982_s15 + $0x78] sm:$0xff] %v4926_v31  ;;  %v4925_v16 = vmax.f32 %v4893_v4, 0.0  ;;  %v4896_v15 = vadd.f32 %v7968_v41, %v4857_v28  ;;  %v4856_v5 = vmul.f32 %v7960_v33, %v4755_v58  ;;  %v4770_v42 = vadd.f32 %v5284_v57, %v7916_v11 }
 0x3fe   : > { %v4764_v45 = vpop.f32.mrf.mxu1  ;;  %v4590_v57 = vadd.f32 %v7951_v24, %v7939_v18 }
 0x3ff   : > { %4957 = vst [vmem:[%s7982_s15 + $0x70] sm:$0xff] %v4925_v16  ;;  %v4928_v35 = vmax.f32 %v4896_v15, 0.0  ;;  %v4895_v46 = vadd.f32 %v7968_v41, %v4856_v5  ;;  %v4859_v9 = vmul.f32 %v7960_v33, %v4770_v42  ;;  %v4765_v61 = vadd.f32 %v4764_v45, %v7913_v44 }
 0x400   : > { %v5287_v1 = vpop.f32.mrf.mxu1  ;;  %v4380_v16 = vadd.f32 %v7953_v43, %v7856_v54  ;;  %v4600_v43 = vadd.f32 %v7962_v53, %v7949_v63 }
 0x401   : > { %4960 = vst [vmem:[%s7982_s15 + $0x88] sm:$0xff] %v4928_v35  ;;  %v4927_v52 = vmax.f32 %v4895_v46, 0.0  ;;  %v4898_v10 = vadd.f32 %v7968_v41, %v4859_v9  ;;  %v4858_v48 = vmul.f32 %v7960_v33, %v4765_v61  ;;  %v4780_v11 = vadd.f32 %v5287_v1, %v7922_v25 }
 0x402   : > { %v4774_v0 = vpop.f32.mrf.mxu1  ;;  %v4605_v45 = vadd.f32 %v7974_v38, %v4380_v16 }
 0x403   : > { %4959 = vst [vmem:[%s7982_s15 + $0x80] sm:$0xff] %v4927_v52  ;;  %v4930_v22 = vmax.f32 %v4898_v10, 0.0  ;;  %v4897_v2 = vadd.f32 %v7968_v41, %v4858_v48  ;;  %v4861_v26 = vmul.f32 %v7960_v33, %v4780_v11  ;;  %v4775_v44 = vadd.f32 %v4774_v0, %v7919_v49 }
 0x404   : > { %v5290_v29 = vpop.f32.mrf.mxu1 }
 0x405   : > { %4962 = vst [vmem:[%s7982_s15 + $0x98] sm:$0xff] %v4930_v22  ;;  %v4929_v60 = vmax.f32 %v4897_v2, 0.0  ;;  %v4900_v47 = vadd.f32 %v7968_v41, %v4861_v26  ;;  %v4860_v56 = vmul.f32 %v7960_v33, %v4775_v44  ;;  %v4790_v25 = vadd.f32 %v5290_v29, %v7928_v30 }
 0x406   : > { %v4784_v19 = vpop.f32.mrf.mxu1  ;;  %v4585_v30 = vadd.f32 %v7946_v39, %v7934_v21  ;;  %v4595_v21 = vadd.f32 %v7955_v62, %v7944_v55 }
 0x407   : > { %4961 = vst [vmem:[%s7982_s15 + $0x90] sm:$0xff] %v4929_v60  ;;  %v4932_v20 = vmax.f32 %v4900_v47, 0.0  ;;  %v4899_v50 = vadd.f32 %v7968_v41, %v4860_v56  ;;  %v4863_v34 = vmul.f32 %v7960_v33, %v4790_v25  ;;  %v4785_v49 = vadd.f32 %v4784_v19, %v7925_v37 }
 0x408   : > { %v5293_v40 = vpop.f32.mrf.mxu1 }
 0x409   : > { %4964 = vst [vmem:[%s7982_s15 + $0xa8] sm:$0xff] %v4932_v20  ;;  %v4931_v59 = vmax.f32 %v4899_v50, 0.0  ;;  %v4902_v6 = vadd.f32 %v7968_v41, %v4863_v34  ;;  %v4862_v51 = vmul.f32 %v7960_v33, %v4785_v49  ;;  %v4800_v32 = vadd.f32 %v5293_v40, %v7936_v13 }
 0x40a   : > { %v4794_v17 = vpop.f32.mrf.mxu1 }
 0x40b   : > { %4963 = vst [vmem:[%s7982_s15 + $0xa0] sm:$0xff] %v4931_v59  ;;  %v4934_v36 = vmax.f32 %v4902_v6, 0.0  ;;  %v4901_v12 = vadd.f32 %v7968_v41, %v4862_v51  ;;  %v4865_v37 = vmul.f32 %v7960_v33, %v4800_v32  ;;  %v4795_v3 = vadd.f32 %v4794_v17, %v7931_v7 }
 0x40c   : > { %v5296_v14 = vpop.f32.mrf.mxu1 }
 0x40d   : > { %4966 = vst [vmem:[%s7982_s15 + $0xb8] sm:$0xff] %v4934_v36  ;;  %v4933_v27 = vmax.f32 %v4901_v12, 0.0  ;;  %v4904_v8 = vadd.f32 %v7968_v41, %v4865_v37  ;;  %v4864_v13 = vmul.f32 %v7960_v33, %v4795_v3  ;;  %v4810_v31 = vadd.f32 %v5296_v14, %v4585_v30 }
 0x40e   : > { %v4804_v39 = vpop.f32.mrf.mxu1 }
 0x40f   : > { %4965 = vst [vmem:[%s7982_s15 + $0xb0] sm:$0xff] %v4933_v27  ;;  %v4936_v4 = vmax.f32 %v4904_v8, 0.0  ;;  %v4903_v28 = vadd.f32 %v7968_v41, %v4864_v13  ;;  %v4867_v7 = vmul.f32 %v7960_v33, %v4810_v31  ;;  %v4805_v58 = vadd.f32 %v4804_v39, %v7941_v23 }
 0x410   : > { %v5299_v15 = vpop.f32.mrf.mxu1 }
 0x411   : > { %4968 = vst [vmem:[%s7982_s15 + $0xc8] sm:$0xff] %v4936_v4  ;;  %v4935_v55 = vmax.f32 %v4903_v28, 0.0  ;;  %v4906_v62 = vadd.f32 %v7968_v41, %v4867_v7  ;;  %v4866_v5 = vmul.f32 %v7960_v33, %v4805_v58  ;;  %v4820_v42 = vadd.f32 %v5299_v15, %v4595_v21 }
 0x412   : > { %v4814_v35 = vpop.f32.mrf.mxu1 }
 0x413   : > { %4967 = vst [vmem:[%s7982_s15 + $0xc0] sm:$0xff] %v4935_v55  ;;  %v4938_v23 = vmax.f32 %v4906_v62, 0.0  ;;  %v4905_v18 = vadd.f32 %v7968_v41, %v4866_v5  ;;  %v4869_v54 = vmul.f32 %v7960_v33, %v4820_v42  ;;  %v4815_v24 = vadd.f32 %v4814_v35, %v4590_v57 }
 0x414   : > { %v5302_v46 = vpop.f32.mrf.mxu1 }
 0x415   : > { %4970 = vst [vmem:[%s7982_s15 + $0xd8] sm:$0xff] %v4938_v23  ;;  %v4937_v9 = vmax.f32 %v4905_v18, 0.0  ;;  %v4908_v61 = vadd.f32 %v7968_v41, %v4869_v54  ;;  %v4868_v38 = vmul.f32 %v7960_v33, %v4815_v24  ;;  %v4830_v1 = vadd.f32 %v5302_v46, %v4605_v45 }
 0x416   : > { %v4824_v52 = vpop.f32.mrf.mxu1 }
 0x417   : > { %4969 = vst [vmem:[%s7982_s15 + $0xd0] sm:$0xff] %v4937_v9  ;;  %v4940_v10 = vmax.f32 %v4908_v61, 0.0  ;;  %v4907_v48 = vadd.f32 %v7968_v41, %v4868_v38  ;;  %v4871_v11 = vmul.f32 %v7960_v33, %v4830_v1  ;;  %v4825_v0 = vadd.f32 %v4824_v52, %v4600_v43 }
 0x419   : > { %4972 = vst [vmem:[%s7982_s15 + $0xe8] sm:$0xff] %v4940_v10  ;;  %v4939_v63 = vmax.f32 %v4907_v48, 0.0  ;;  %v4910_v53 = vadd.f32 %v7968_v41, %v4871_v11  ;;  %v4870_v22 = vmul.f32 %v7960_v33, %v4825_v0 }
 0x41b   : > { %4971 = vst [vmem:[%s7982_s15 + $0xe0] sm:$0xff] %v4939_v63  ;;  %v4942_v2 = vmax.f32 %v4910_v53, 0.0  ;;  %v4909_v26 = vadd.f32 %v7968_v41, %v4870_v22 }
 0x41d   : > { %4974 = vst [vmem:[%s7982_s15 + $0xf8] sm:$0xff] %v4942_v2  ;;  %v4941_v44 = vmax.f32 %v4909_v26, 0.0 }
 0x41f   : > { %4973 = vst [vmem:[%s7982_s15 + $0xf0] sm:$0xff] %v4941_v44 }
 0x420 PF: > { %s17_s24 = sadd.s32 1, %s5354_s24  }
 0x421   : > { %p14_p4 = scmp.ge.s32.totalorder %s17_s24, 4  }
 0x423   :  { %16 = sbr.rel (!%p14_p4) target bundleno = 1 (0x1), region = 84 }

</bundles_post_ra>
